<compile_context>
chip_gen: v6e
topology: v6e:2x2x1
jax: 0.10.0
libtpu: 0.0.40
codegen_flags: <defaults>
</compile_context>

<pallas_src>
import functools

import numpy as np
import jax
import jax.numpy as jnp
from jax.experimental import pallas as pl
from jax.experimental.pallas import tpu as pltpu


H0 = W0 = 16          # spatial size expected by this architecture
C_MAX = 16            # widest feature map
MARGIN = 32           # lane margin around the padded-flat slab (>= W+1)


def _plen(n, h, w):
    """Length of the padded-flat layout: n images of (h+2) rows of w."""
    return n * (h + 2) * w


def _ppos(n, h, w, H, W):
    """Padded-flat index of image n, image-row h (0 <= h < H), column w."""
    return n * (H + 2) * W + (h + 1) * W + w


# ----------------------------------------------------------------------------
# Host-built 0/1 selection matrices (compile-time constants, live in VMEM).
# ----------------------------------------------------------------------------
def _pool_matrix(n_batch, h, w):
    ho, wo = h // 2, w // 2
    s = np.zeros((_plen(n_batch, h, w), _plen(n_batch, ho, wo)), np.float32)
    for n in range(n_batch):
        for i in range(ho):
            for j in range(wo):
                s[_ppos(n, 2 * i, 2 * j, h, w), _ppos(n, i, j, ho, wo)] = 1.0
    return s


def _upsample_matrix(n_batch, h, w):
    ho, wo = 2 * h, 2 * w
    u = np.zeros((_plen(n_batch, h, w), _plen(n_batch, ho, wo)), np.float32)
    for n in range(n_batch):
        for i in range(ho):
            for j in range(wo):
                u[_ppos(n, i // 2, j // 2, h, w), _ppos(n, i, j, ho, wo)] = 1.0
    return u


@functools.lru_cache(maxsize=None)
def _aux_matrices(n_batch):
    return (jnp.asarray(_pool_matrix(n_batch, 16, 16)),   # (576, 160)
            jnp.asarray(_pool_matrix(n_batch, 8, 8)),     # (160,  48)
            jnp.asarray(_upsample_matrix(n_batch, 4, 4)),  # ( 48, 160)
            jnp.asarray(_upsample_matrix(n_batch, 8, 8)))  # (160, 576)


# ----------------------------------------------------------------------------
# The single fused kernel.
# ----------------------------------------------------------------------------
def _autoencoder_kernel(x_ref,
                        w1, b1, w2, b2, w3, b3, w4, b4, w5, b5, w6, b6,
                        s1, s2, u1, u2,
                        o_ref, pad_scr, patch_scr, *, n_batch):
    N = n_batch

    def masks(H, W, L):
        w_shift = W.bit_length() - 1                    # W is a power of two
        idx = jax.lax.broadcasted_iota(jnp.int32, (1, L), 1)
        wpos = idx & (W - 1)                            # column within a row
        rpos = idx >> w_shift                           # global padded row
        left = wpos == 0
        right = wpos == W - 1
        padrow = (rpos == 0) | (rpos == H + 1)
        for n in range(1, N):
            padrow = padrow | (rpos == n * (H + 2)) | (rpos == n * (H + 2) + H + 1)
        return left, right, padrow

    def conv3x3(x, w_ref, b_ref, H, W, Cin, Cout, act, flat_src):
        """3x3 'same' conv + bias + activation in padded-flat layout."""
        L = _plen(N, H, W)
        left, right, padrow = masks(H, W, L)
        # Stage the zero-padded input in VMEM scratch (zero border + pad rows).
        pad_scr[...] = jnp.zeros(pad_scr.shape, pad_scr.dtype)
        if flat_src:
            # x is unpadded flat (Cin, N*H*W): insert each image between pad rows.
            for n in range(N):
                dst = MARGIN + n * (H + 2) * W + W
                pad_scr[0:Cin, dst:dst + H * W] = x[:, n * H * W:(n + 1) * H * W]
        else:
            # x is already padded-flat with zero pad rows.
            pad_scr[0:Cin, MARGIN:MARGIN + L] = x
        # im2col: the 9 taps are contiguous lane slices of the padded slab.
        for t in range(9):
            dh, dw = t // 3, t % 3
            off = (dh - 1) * W + (dw - 1)
            tap = pad_scr[0:Cin, MARGIN + off:MARGIN + off + L]
            if dw == 0:                                   # left "same" border
                tap = jnp.where(left, 0.0, tap)
            elif dw == 2:                                 # right "same" border
                tap = jnp.where(right, 0.0, tap)
            patch_scr[t * Cin:(t + 1) * Cin, 0:L] = tap
        patches = patch_scr[0:9 * Cin, 0:L]               # (9*Cin, L)
        acc = jnp.dot(w_ref[...], patches,
                      preferred_element_type=jnp.float32)  # (Cout, L)
        acc = acc + b_ref[...]
        acc = jax.nn.sigmoid(acc) if act == "sigmoid" else jnp.maximum(acc, 0.0)
        # Keep pad rows exactly zero: this is what implements "same" padding
        # for the following conv and keeps the selection matmuls exact.
        return jnp.where(padrow, 0.0, acc)

    def maxpool2(x, s_ref, H, W, C):
        """2x2/2 max pool: max of 4 shifted lane slices, then compaction."""
        L = _plen(N, H, W)
        pad_scr[...] = jnp.zeros(pad_scr.shape, pad_scr.dtype)
        pad_scr[0:C, MARGIN:MARGIN + L] = x
        t01 = pad_scr[0:C, MARGIN + 1:MARGIN + 1 + L]
        t10 = pad_scr[0:C, MARGIN + W:MARGIN + W + L]
        t11 = pad_scr[0:C, MARGIN + W + 1:MARGIN + W + 1 + L]
        m = jnp.maximum(jnp.maximum(x, t01), jnp.maximum(t10, t11))
        return jnp.dot(m, s_ref[...], preferred_element_type=jnp.float32)

    def upsample2(x, u_ref):
        return jnp.dot(x, u_ref[...], preferred_element_type=jnp.float32)

    x = x_ref[...]                                                  # (1, N*256)
    # encoder
    x = conv3x3(x, w1, b1, 16, 16, 1, 16, "relu", flat_src=True)    # (16, L16)
    x = maxpool2(x, s1, 16, 16, 16)                                 # (16, L8)
    x = conv3x3(x, w2, b2, 8, 8, 16, 8, "relu", flat_src=False)     # ( 8, L8)
    x = maxpool2(x, s2, 8, 8, 8)                                    # ( 8, L4)
    x = conv3x3(x, w3, b3, 4, 4, 8, 8, "relu", flat_src=False)      # ( 8, L4)
    # decoder
    x = upsample2(x, u1)                                            # ( 8, L8)
    x = conv3x3(x, w4, b4, 8, 8, 8, 8, "relu", flat_src=False)      # ( 8, L8)
    x = upsample2(x, u2)                                            # ( 8, L16)
    x = conv3x3(x, w5, b5, 16, 16, 8, 16, "relu", flat_src=False)   # (16, L16)
    x = conv3x3(x, w6, b6, 16, 16, 16, 1, "sigmoid", flat_src=False)  # (1, L16)
    # Drop pad rows -> lane-dense (1, N*H*W) output.
    H, W = 16, 16
    for n in range(N):
        src = n * (H + 2) * W + W
        o_ref[:, n * H * W:(n + 1) * H * W] = x[:, src:src + H * W]


# ----------------------------------------------------------------------------
# Host wrapper.
# ----------------------------------------------------------------------------
def _make_conv_operands(w, b):
    """PyTorch (Cout, Cin, 3, 3) weights -> (Cout, 9*Cin) im2col matrix
    (rows ordered (dh*3+dw)*Cin + ci) and a (Cout, 1) bias column."""
    cout, cin = w.shape[0], w.shape[1]
    w2d = jnp.transpose(w, (0, 2, 3, 1)).reshape(cout, 9 * cin)
    return w2d, b.reshape(cout, 1)


def model_forward(x_nchw, params):
    n, c, h, w = x_nchw.shape
    assert (c, h, w) == (1, H0, W0), x_nchw.shape
    x_flat = x_nchw.reshape(1, n * h * w)        # NCHW with C == 1: free reshape

    layer_ops = []
    for name in ("enc1", "enc2", "enc3", "dec1", "dec2", "dec3"):
        layer_ops += list(_make_conv_operands(*params[name]))
    s1, s2, u1, u2 = _aux_matrices(n)

    l_max = _plen(n, H0, W0)
    out_flat = pl.pallas_call(
        functools.partial(_autoencoder_kernel, n_batch=n),
        out_shape=jax.ShapeDtypeStruct((1, n * h * w), jnp.float32),
        scratch_shapes=[
            pltpu.VMEM((C_MAX, MARGIN + l_max + MARGIN), jnp.float32),  # padded slab
            pltpu.VMEM((9 * C_MAX, l_max), jnp.float32),                # im2col patches
        ],
    )(x_flat, *layer_ops, s1, s2, u1, u2)
    return out_flat.reshape(n, 1, h, w)          # free reshape back to NCHW


# ----------------------------------------------------------------------------
# Parameter init (deterministic, PyTorch-conv-like uniform fan-in init).
# Weights stored in PyTorch layout (Cout, Cin, 3, 3).
# ----------------------------------------------------------------------------
def _init_conv(key, cin, cout):
    k_w, k_b = jax.random.split(key)
    bound = 1.0 / (cin * 9) ** 0.5
    w = jax.random.uniform(k_w, (cout, cin, 3, 3), jnp.float32, -bound, bound)
    b = jax.random.uniform(k_b, (cout,), jnp.float32, -bound, bound)
    return w, b


def init_params(key):
    keys = jax.random.split(key, 6)
    return {
        "enc1": _init_conv(keys[0], 1, 16),
        "enc2": _init_conv(keys[1], 16, 8),
        "enc3": _init_conv(keys[2], 8, 8),
        "dec1": _init_conv(keys[3], 8, 8),
        "dec2": _init_conv(keys[4], 8, 16),
        "dec3": _init_conv(keys[5], 16, 1),
    }


# ----------------------------------------------------------------------------
# Pure-XLA reference of the same network (for a numerical cross-check).
# ----------------------------------------------------------------------------
def _reference_forward(x, params):
    def conv(x, w, b, act):
        y = jax.lax.conv_general_dilated(
            x, w, window_strides=(1, 1), padding=((1, 1), (1, 1)),
            dimension_numbers=("NCHW", "OIHW", "NCHW"),
            precision=jax.lax.Precision.HIGHEST)
        y = y + b.reshape(1, -1, 1, 1)
        return jax.nn.sigmoid(y) if act == "sigmoid" else jnp.maximum(y, 0.0)

    def pool(x):
        return jax.lax.reduce_window(x, -jnp.inf, jax.lax.max,
                                     (1, 1, 2, 2), (1, 1, 2, 2), "VALID")

    def up(x):
        return jnp.repeat(jnp.repeat(x, 2, axis=2), 2, axis=3)

    x = conv(x, *params["enc1"], "relu"); x = pool(x)
    x = conv(x, *params["enc2"], "relu"); x = pool(x)
    x = conv(x, *params["enc3"], "relu")
    x = up(x); x = conv(x, *params["dec1"], "relu")
    x = up(x); x = conv(x, *params["dec2"], "relu")
    x = conv(x, *params["dec3"], "sigmoid")
    return x


if __name__ == "__main__":
    key = jax.random.PRNGKey(0)
    k_x, k_p = jax.random.split(key)

    # NCHW input consistent with Conv2d(1, ...): batch=2, 1 channel, 16x16.
    x = jax.random.normal(k_x, (2, 1, 16, 16), dtype=jnp.float32)
    params = init_params(k_p)

    fwd = jax.jit(model_forward)
    out = jax.block_until_ready(fwd(x, params))

    assert out.shape == (2, 1, 16, 16), out.shape
    assert out.dtype == jnp.float32
    assert bool(jnp.all(jnp.isfinite(out)))
    assert bool(jnp.all((out >= 0.0) & (out <= 1.0)))      # sigmoid range

    # Numerical cross-check against the XLA reference implementation.
    ref = _reference_forward(x, params)
    max_err = float(jnp.max(jnp.abs(out - ref)))
    assert max_err < 3e-2, max_err

    print("KERNEL_OK")
</pallas_src>

<mosaic_0001>
module attributes {stable_mosaic.version = 11 : i64} {
  func.func @_autoencoder_kernel(%arg0: memref<1x512xf32, #tpu.memory_space<vmem>>, %arg1: memref<16x9xf32, #tpu.memory_space<vmem>>, %arg2: memref<16x1xf32, #tpu.memory_space<vmem>>, %arg3: memref<8x144xf32, #tpu.memory_space<vmem>>, %arg4: memref<8x1xf32, #tpu.memory_space<vmem>>, %arg5: memref<8x72xf32, #tpu.memory_space<vmem>>, %arg6: memref<8x1xf32, #tpu.memory_space<vmem>>, %arg7: memref<8x72xf32, #tpu.memory_space<vmem>>, %arg8: memref<8x1xf32, #tpu.memory_space<vmem>>, %arg9: memref<16x72xf32, #tpu.memory_space<vmem>>, %arg10: memref<16x1xf32, #tpu.memory_space<vmem>>, %arg11: memref<1x144xf32, #tpu.memory_space<vmem>>, %arg12: memref<1x1xf32, #tpu.memory_space<vmem>>, %arg13: memref<576x160xf32, #tpu.memory_space<vmem>>, %arg14: memref<160x48xf32, #tpu.memory_space<vmem>>, %arg15: memref<48x160xf32, #tpu.memory_space<vmem>>, %arg16: memref<160x576xf32, #tpu.memory_space<vmem>>, %arg17: memref<1x512xf32, #tpu.memory_space<vmem>>, %arg18: memref<16x640xf32, #tpu.memory_space<vmem>>, %arg19: memref<144x576xf32, #tpu.memory_space<vmem>>) attributes {dimension_semantics = [], scalar_prefetch = 0 : i64, scratch_operands = 2 : i64, tpu.core_type = #tpu.core_type<tc>} {
    %c0 = arith.constant 0 : index
    %c0_0 = arith.constant 0 : index
    %0 = vector.load %arg0[%c0, %c0_0] : memref<1x512xf32, #tpu.memory_space<vmem>>, vector<1x512xf32>
    %1 = tpu.iota {dimensions = array<i32: 1>} : vector<1x576xi32>
    %c15_i32 = arith.constant 15 : i32
    %2 = vector.broadcast %c15_i32 : i32 to vector<1x576xi32>
    %3 = arith.andi %1, %2 : vector<1x576xi32>
    %c4_i32 = arith.constant 4 : i32
    %4 = vector.broadcast %c4_i32 : i32 to vector<1x576xi32>
    %5 = arith.shrsi %1, %4 : vector<1x576xi32>
    %c0_i32 = arith.constant 0 : i32
    %6 = vector.broadcast %c0_i32 : i32 to vector<1x576xi32>
    %7 = arith.cmpi eq, %3, %6 : vector<1x576xi32>
    %c15_i32_1 = arith.constant 15 : i32
    %8 = vector.broadcast %c15_i32_1 : i32 to vector<1x576xi32>
    %9 = arith.cmpi eq, %3, %8 : vector<1x576xi32>
    %c0_i32_2 = arith.constant 0 : i32
    %10 = vector.broadcast %c0_i32_2 : i32 to vector<1x576xi32>
    %11 = arith.cmpi eq, %5, %10 : vector<1x576xi32>
    %c17_i32 = arith.constant 17 : i32
    %12 = vector.broadcast %c17_i32 : i32 to vector<1x576xi32>
    %13 = arith.cmpi eq, %5, %12 : vector<1x576xi32>
    %14 = arith.ori %11, %13 : vector<1x576xi1>
    %c18_i32 = arith.constant 18 : i32
    %15 = vector.broadcast %c18_i32 : i32 to vector<1x576xi32>
    %16 = arith.cmpi eq, %5, %15 : vector<1x576xi32>
    %17 = arith.ori %14, %16 : vector<1x576xi1>
    %c35_i32 = arith.constant 35 : i32
    %18 = vector.broadcast %c35_i32 : i32 to vector<1x576xi32>
    %19 = arith.cmpi eq, %5, %18 : vector<1x576xi32>
    %20 = arith.ori %17, %19 : vector<1x576xi1>
    %cst = arith.constant 0.000000e+00 : f32
    %21 = vector.broadcast %cst : f32 to vector<16x640xf32>
    %c0_3 = arith.constant 0 : index
    %c0_4 = arith.constant 0 : index
    %22 = vector.load %arg18[%c0_3, %c0_4] : memref<16x640xf32, #tpu.memory_space<vmem>>, vector<16x640xf32>
    tpu.vector_store %arg18[%c0_3, %c0_4], %21 {strides = array<i32>} : memref<16x640xf32, #tpu.memory_space<vmem>>, vector<16x640xf32>,
    %23 = vector.extract_strided_slice %0 {offsets = [0, 0], sizes = [1, 256], strides = [1, 1]} : vector<1x512xf32> to vector<1x256xf32>
    %c0_5 = arith.constant 0 : index
    %c48 = arith.constant 48 : index
    %24 = vector.load %arg18[%c0_5, %c48] : memref<16x640xf32, #tpu.memory_space<vmem>>, vector<1x256xf32>
    tpu.vector_store %arg18[%c0_5, %c48], %23 {strides = array<i32>} : memref<16x640xf32, #tpu.memory_space<vmem>>, vector<1x256xf32>,
    %25 = vector.extract_strided_slice %0 {offsets = [0, 256], sizes = [1, 256], strides = [1, 1]} : vector<1x512xf32> to vector<1x256xf32>
    %c0_6 = arith.constant 0 : index
    %c336 = arith.constant 336 : index
    %26 = vector.load %arg18[%c0_6, %c336] : memref<16x640xf32, #tpu.memory_space<vmem>>, vector<1x256xf32>
    tpu.vector_store %arg18[%c0_6, %c336], %25 {strides = array<i32>} : memref<16x640xf32, #tpu.memory_space<vmem>>, vector<1x256xf32>,
    %c0_7 = arith.constant 0 : index
    %c15 = arith.constant 15 : index
    %27 = vector.load %arg18[%c0_7, %c15] : memref<16x640xf32, #tpu.memory_space<vmem>>, vector<1x576xf32>
    %cst_8 = arith.constant 0.000000e+00 : f32
    %28 = vector.broadcast %cst_8 : f32 to vector<1x576xf32>
    %29 = arith.select %7, %28, %27 : vector<1x576xi1>, vector<1x576xf32>
    %c0_9 = arith.constant 0 : index
    %c0_10 = arith.constant 0 : index
    %30 = vector.load %arg19[%c0_9, %c0_10] : memref<144x576xf32, #tpu.memory_space<vmem>>, vector<1x576xf32>
    tpu.vector_store %arg19[%c0_9, %c0_10], %29 {strides = array<i32>} : memref<144x576xf32, #tpu.memory_space<vmem>>, vector<1x576xf32>,
    %c0_11 = arith.constant 0 : index
    %c16 = arith.constant 16 : index
    %31 = vector.load %arg18[%c0_11, %c16] : memref<16x640xf32, #tpu.memory_space<vmem>>, vector<1x576xf32>
    %c1 = arith.constant 1 : index
    %c0_12 = arith.constant 0 : index
    %32 = vector.load %arg19[%c1, %c0_12] : memref<144x576xf32, #tpu.memory_space<vmem>>, vector<1x576xf32>
    tpu.vector_store %arg19[%c1, %c0_12], %31 {strides = array<i32>} : memref<144x576xf32, #tpu.memory_space<vmem>>, vector<1x576xf32>,
    %c0_13 = arith.constant 0 : index
    %c17 = arith.constant 17 : index
    %33 = vector.load %arg18[%c0_13, %c17] : memref<16x640xf32, #tpu.memory_space<vmem>>, vector<1x576xf32>
    %cst_14 = arith.constant 0.000000e+00 : f32
    %34 = vector.broadcast %cst_14 : f32 to vector<1x576xf32>
    %35 = arith.select %9, %34, %33 : vector<1x576xi1>, vector<1x576xf32>
    %c2 = arith.constant 2 : index
    %c0_15 = arith.constant 0 : index
    %36 = vector.load %arg19[%c2, %c0_15] : memref<144x576xf32, #tpu.memory_space<vmem>>, vector<1x576xf32>
    tpu.vector_store %arg19[%c2, %c0_15], %35 {strides = array<i32>} : memref<144x576xf32, #tpu.memory_space<vmem>>, vector<1x576xf32>,
    %c0_16 = arith.constant 0 : index
    %c31 = arith.constant 31 : index
    %37 = vector.load %arg18[%c0_16, %c31] : memref<16x640xf32, #tpu.memory_space<vmem>>, vector<1x576xf32>
    %cst_17 = arith.constant 0.000000e+00 : f32
    %38 = vector.broadcast %cst_17 : f32 to vector<1x576xf32>
    %39 = arith.select %7, %38, %37 : vector<1x576xi1>, vector<1x576xf32>
    %c3 = arith.constant 3 : index
    %c0_18 = arith.constant 0 : index
    %40 = vector.load %arg19[%c3, %c0_18] : memref<144x576xf32, #tpu.memory_space<vmem>>, vector<1x576xf32>
    tpu.vector_store %arg19[%c3, %c0_18], %39 {strides = array<i32>} : memref<144x576xf32, #tpu.memory_space<vmem>>, vector<1x576xf32>,
    %c0_19 = arith.constant 0 : index
    %c32 = arith.constant 32 : index
    %41 = vector.load %arg18[%c0_19, %c32] : memref<16x640xf32, #tpu.memory_space<vmem>>, vector<1x576xf32>
    %c4 = arith.constant 4 : index
    %c0_20 = arith.constant 0 : index
    %42 = vector.load %arg19[%c4, %c0_20] : memref<144x576xf32, #tpu.memory_space<vmem>>, vector<1x576xf32>
    tpu.vector_store %arg19[%c4, %c0_20], %41 {strides = array<i32>} : memref<144x576xf32, #tpu.memory_space<vmem>>, vector<1x576xf32>,
    %c0_21 = arith.constant 0 : index
    %c33 = arith.constant 33 : index
    %43 = vector.load %arg18[%c0_21, %c33] : memref<16x640xf32, #tpu.memory_space<vmem>>, vector<1x576xf32>
    %cst_22 = arith.constant 0.000000e+00 : f32
    %44 = vector.broadcast %cst_22 : f32 to vector<1x576xf32>
    %45 = arith.select %9, %44, %43 : vector<1x576xi1>, vector<1x576xf32>
    %c5 = arith.constant 5 : index
    %c0_23 = arith.constant 0 : index
    %46 = vector.load %arg19[%c5, %c0_23] : memref<144x576xf32, #tpu.memory_space<vmem>>, vector<1x576xf32>
    tpu.vector_store %arg19[%c5, %c0_23], %45 {strides = array<i32>} : memref<144x576xf32, #tpu.memory_space<vmem>>, vector<1x576xf32>,
    %c0_24 = arith.constant 0 : index
    %c47 = arith.constant 47 : index
    %47 = vector.load %arg18[%c0_24, %c47] : memref<16x640xf32, #tpu.memory_space<vmem>>, vector<1x576xf32>
    %cst_25 = arith.constant 0.000000e+00 : f32
    %48 = vector.broadcast %cst_25 : f32 to vector<1x576xf32>
    %49 = arith.select %7, %48, %47 : vector<1x576xi1>, vector<1x576xf32>
    %c6 = arith.constant 6 : index
    %c0_26 = arith.constant 0 : index
    %50 = vector.load %arg19[%c6, %c0_26] : memref<144x576xf32, #tpu.memory_space<vmem>>, vector<1x576xf32>
    tpu.vector_store %arg19[%c6, %c0_26], %49 {strides = array<i32>} : memref<144x576xf32, #tpu.memory_space<vmem>>, vector<1x576xf32>,
    %c0_27 = arith.constant 0 : index
    %c48_28 = arith.constant 48 : index
    %51 = vector.load %arg18[%c0_27, %c48_28] : memref<16x640xf32, #tpu.memory_space<vmem>>, vector<1x576xf32>
    %c7 = arith.constant 7 : index
    %c0_29 = arith.constant 0 : index
    %52 = vector.load %arg19[%c7, %c0_29] : memref<144x576xf32, #tpu.memory_space<vmem>>, vector<1x576xf32>
    tpu.vector_store %arg19[%c7, %c0_29], %51 {strides = array<i32>} : memref<144x576xf32, #tpu.memory_space<vmem>>, vector<1x576xf32>,
    %c0_30 = arith.constant 0 : index
    %c49 = arith.constant 49 : index
    %53 = vector.load %arg18[%c0_30, %c49] : memref<16x640xf32, #tpu.memory_space<vmem>>, vector<1x576xf32>
    %cst_31 = arith.constant 0.000000e+00 : f32
    %54 = vector.broadcast %cst_31 : f32 to vector<1x576xf32>
    %55 = arith.select %9, %54, %53 : vector<1x576xi1>, vector<1x576xf32>
    %c8 = arith.constant 8 : index
    %c0_32 = arith.constant 0 : index
    %56 = vector.load %arg19[%c8, %c0_32] : memref<144x576xf32, #tpu.memory_space<vmem>>, vector<1x576xf32>
    tpu.vector_store %arg19[%c8, %c0_32], %55 {strides = array<i32>} : memref<144x576xf32, #tpu.memory_space<vmem>>, vector<1x576xf32>,
    %c0_33 = arith.constant 0 : index
    %c0_34 = arith.constant 0 : index
    %57 = vector.load %arg19[%c0_33, %c0_34] : memref<144x576xf32, #tpu.memory_space<vmem>>, vector<9x576xf32>
    %c0_35 = arith.constant 0 : index
    %c0_36 = arith.constant 0 : index
    %58 = vector.load %arg1[%c0_35, %c0_36] : memref<16x9xf32, #tpu.memory_space<vmem>>, vector<16x9xf32>
    %cst_37 = arith.constant dense<0.000000e+00> : vector<16x576xf32>
    %59 = tpu.matmul %58, %57, %cst_37 {dimension_numbers = #tpu.dot_dimension_numbers<[1], [0], [0], [1], [0, 0, 1, 1], [], []>} : vector<16x9xf32>, vector<9x576xf32>, vector<16x576xf32> -> vector<16x576xf32>
    %c0_38 = arith.constant 0 : index
    %c0_39 = arith.constant 0 : index
    %60 = vector.load %arg2[%c0_38, %c0_39] : memref<16x1xf32, #tpu.memory_space<vmem>>, vector<16x1xf32>
    %61 = vector.broadcast %60 : vector<16x1xf32> to vector<16x576xf32>
    %62 = arith.addf %59, %61 : vector<16x576xf32>
    %cst_40 = arith.constant 0.000000e+00 : f32
    %63 = vector.broadcast %cst_40 : f32 to vector<16x576xf32>
    %64 = arith.maximumf %62, %63 : vector<16x576xf32>
    %cst_41 = arith.constant 0.000000e+00 : f32
    %65 = vector.shape_cast %20 : vector<1x576xi1> to vector<1x576xi1>
    %66 = vector.broadcast %65 : vector<1x576xi1> to vector<16x576xi1>
    %67 = vector.broadcast %cst_41 : f32 to vector<16x576xf32>
    %68 = arith.select %66, %67, %64 : vector<16x576xi1>, vector<16x576xf32>
    %cst_42 = arith.constant 0.000000e+00 : f32
    %69 = vector.broadcast %cst_42 : f32 to vector<16x640xf32>
    %c0_43 = arith.constant 0 : index
    %c0_44 = arith.constant 0 : index
    %70 = vector.load %arg18[%c0_43, %c0_44] : memref<16x640xf32, #tpu.memory_space<vmem>>, vector<16x640xf32>
    tpu.vector_store %arg18[%c0_43, %c0_44], %69 {strides = array<i32>} : memref<16x640xf32, #tpu.memory_space<vmem>>, vector<16x640xf32>,
    %c0_45 = arith.constant 0 : index
    %c32_46 = arith.constant 32 : index
    %71 = vector.load %arg18[%c0_45, %c32_46] : memref<16x640xf32, #tpu.memory_space<vmem>>, vector<16x576xf32>
    tpu.vector_store %arg18[%c0_45, %c32_46], %68 {strides = array<i32>} : memref<16x640xf32, #tpu.memory_space<vmem>>, vector<16x576xf32>,
    %c0_47 = arith.constant 0 : index
    %c33_48 = arith.constant 33 : index
    %72 = vector.load %arg18[%c0_47, %c33_48] : memref<16x640xf32, #tpu.memory_space<vmem>>, vector<16x576xf32>
    %c0_49 = arith.constant 0 : index
    %c48_50 = arith.constant 48 : index
    %73 = vector.load %arg18[%c0_49, %c48_50] : memref<16x640xf32, #tpu.memory_space<vmem>>, vector<16x576xf32>
    %c0_51 = arith.constant 0 : index
    %c49_52 = arith.constant 49 : index
    %74 = vector.load %arg18[%c0_51, %c49_52] : memref<16x640xf32, #tpu.memory_space<vmem>>, vector<16x576xf32>
    %75 = arith.maximumf %68, %72 : vector<16x576xf32>
    %76 = arith.maximumf %73, %74 : vector<16x576xf32>
    %77 = arith.maximumf %75, %76 : vector<16x576xf32>
    %c0_53 = arith.constant 0 : index
    %c0_54 = arith.constant 0 : index
    %78 = vector.load %arg13[%c0_53, %c0_54] : memref<576x160xf32, #tpu.memory_space<vmem>>, vector<576x160xf32>
    %cst_55 = arith.constant dense<0.000000e+00> : vector<16x160xf32>
    %79 = tpu.matmul %77, %78, %cst_55 {dimension_numbers = #tpu.dot_dimension_numbers<[1], [0], [0], [1], [0, 0, 1, 1], [], []>} : vector<16x576xf32>, vector<576x160xf32>, vector<16x160xf32> -> vector<16x160xf32>
    %80 = tpu.iota {dimensions = array<i32: 1>} : vector<1x160xi32>
    %c7_i32 = arith.constant 7 : i32
    %81 = vector.broadcast %c7_i32 : i32 to vector<1x160xi32>
    %82 = arith.andi %80, %81 : vector<1x160xi32>
    %c3_i32 = arith.constant 3 : i32
    %83 = vector.broadcast %c3_i32 : i32 to vector<1x160xi32>
    %84 = arith.shrsi %80, %83 : vector<1x160xi32>
    %c0_i32_56 = arith.constant 0 : i32
    %85 = vector.broadcast %c0_i32_56 : i32 to vector<1x160xi32>
    %86 = arith.cmpi eq, %82, %85 : vector<1x160xi32>
    %c7_i32_57 = arith.constant 7 : i32
    %87 = vector.broadcast %c7_i32_57 : i32 to vector<1x160xi32>
    %88 = arith.cmpi eq, %82, %87 : vector<1x160xi32>
    %c0_i32_58 = arith.constant 0 : i32
    %89 = vector.broadcast %c0_i32_58 : i32 to vector<1x160xi32>
    %90 = arith.cmpi eq, %84, %89 : vector<1x160xi32>
    %c9_i32 = arith.constant 9 : i32
    %91 = vector.broadcast %c9_i32 : i32 to vector<1x160xi32>
    %92 = arith.cmpi eq, %84, %91 : vector<1x160xi32>
    %93 = arith.ori %90, %92 : vector<1x160xi1>
    %c10_i32 = arith.constant 10 : i32
    %94 = vector.broadcast %c10_i32 : i32 to vector<1x160xi32>
    %95 = arith.cmpi eq, %84, %94 : vector<1x160xi32>
    %96 = arith.ori %93, %95 : vector<1x160xi1>
    %c19_i32 = arith.constant 19 : i32
    %97 = vector.broadcast %c19_i32 : i32 to vector<1x160xi32>
    %98 = arith.cmpi eq, %84, %97 : vector<1x160xi32>
    %99 = arith.ori %96, %98 : vector<1x160xi1>
    %cst_59 = arith.constant 0.000000e+00 : f32
    %100 = vector.broadcast %cst_59 : f32 to vector<16x640xf32>
    %c0_60 = arith.constant 0 : index
    %c0_61 = arith.constant 0 : index
    %101 = vector.load %arg18[%c0_60, %c0_61] : memref<16x640xf32, #tpu.memory_space<vmem>>, vector<16x640xf32>
    tpu.vector_store %arg18[%c0_60, %c0_61], %100 {strides = array<i32>} : memref<16x640xf32, #tpu.memory_space<vmem>>, vector<16x640xf32>,
    %c0_62 = arith.constant 0 : index
    %c32_63 = arith.constant 32 : index
    %102 = vector.load %arg18[%c0_62, %c32_63] : memref<16x640xf32, #tpu.memory_space<vmem>>, vector<16x160xf32>
    tpu.vector_store %arg18[%c0_62, %c32_63], %79 {strides = array<i32>} : memref<16x640xf32, #tpu.memory_space<vmem>>, vector<16x160xf32>,
    %c0_64 = arith.constant 0 : index
    %c23 = arith.constant 23 : index
    %103 = vector.load %arg18[%c0_64, %c23] : memref<16x640xf32, #tpu.memory_space<vmem>>, vector<16x160xf32>
    %cst_65 = arith.constant 0.000000e+00 : f32
    %104 = vector.shape_cast %86 : vector<1x160xi1> to vector<1x160xi1>
    %105 = vector.broadcast %104 : vector<1x160xi1> to vector<16x160xi1>
    %106 = vector.broadcast %cst_65 : f32 to vector<16x160xf32>
    %107 = arith.select %105, %106, %103 : vector<16x160xi1>, vector<16x160xf32>
    %c0_66 = arith.constant 0 : index
    %c0_67 = arith.constant 0 : index
    %108 = vector.load %arg19[%c0_66, %c0_67] : memref<144x576xf32, #tpu.memory_space<vmem>>, vector<16x160xf32>
    tpu.vector_store %arg19[%c0_66, %c0_67], %107 {strides = array<i32>} : memref<144x576xf32, #tpu.memory_space<vmem>>, vector<16x160xf32>,
    %c0_68 = arith.constant 0 : index
    %c24 = arith.constant 24 : index
    %109 = vector.load %arg18[%c0_68, %c24] : memref<16x640xf32, #tpu.memory_space<vmem>>, vector<16x160xf32>
    %c16_69 = arith.constant 16 : index
    %c0_70 = arith.constant 0 : index
    %110 = vector.load %arg19[%c16_69, %c0_70] : memref<144x576xf32, #tpu.memory_space<vmem>>, vector<16x160xf32>
    tpu.vector_store %arg19[%c16_69, %c0_70], %109 {strides = array<i32>} : memref<144x576xf32, #tpu.memory_space<vmem>>, vector<16x160xf32>,
    %c0_71 = arith.constant 0 : index
    %c25 = arith.constant 25 : index
    %111 = vector.load %arg18[%c0_71, %c25] : memref<16x640xf32, #tpu.memory_space<vmem>>, vector<16x160xf32>
    %cst_72 = arith.constant 0.000000e+00 : f32
    %112 = vector.shape_cast %88 : vector<1x160xi1> to vector<1x160xi1>
    %113 = vector.broadcast %112 : vector<1x160xi1> to vector<16x160xi1>
    %114 = vector.broadcast %cst_72 : f32 to vector<16x160xf32>
    %115 = arith.select %113, %114, %111 : vector<16x160xi1>, vector<16x160xf32>
    %c32_73 = arith.constant 32 : index
    %c0_74 = arith.constant 0 : index
    %116 = vector.load %arg19[%c32_73, %c0_74] : memref<144x576xf32, #tpu.memory_space<vmem>>, vector<16x160xf32>
    tpu.vector_store %arg19[%c32_73, %c0_74], %115 {strides = array<i32>} : memref<144x576xf32, #tpu.memory_space<vmem>>, vector<16x160xf32>,
    %c0_75 = arith.constant 0 : index
    %c31_76 = arith.constant 31 : index
    %117 = vector.load %arg18[%c0_75, %c31_76] : memref<16x640xf32, #tpu.memory_space<vmem>>, vector<16x160xf32>
    %cst_77 = arith.constant 0.000000e+00 : f32
    %118 = vector.shape_cast %86 : vector<1x160xi1> to vector<1x160xi1>
    %119 = vector.broadcast %118 : vector<1x160xi1> to vector<16x160xi1>
    %120 = vector.broadcast %cst_77 : f32 to vector<16x160xf32>
    %121 = arith.select %119, %120, %117 : vector<16x160xi1>, vector<16x160xf32>
    %c48_78 = arith.constant 48 : index
    %c0_79 = arith.constant 0 : index
    %122 = vector.load %arg19[%c48_78, %c0_79] : memref<144x576xf32, #tpu.memory_space<vmem>>, vector<16x160xf32>
    tpu.vector_store %arg19[%c48_78, %c0_79], %121 {strides = array<i32>} : memref<144x576xf32, #tpu.memory_space<vmem>>, vector<16x160xf32>,
    %c0_80 = arith.constant 0 : index
    %c32_81 = arith.constant 32 : index
    %123 = vector.load %arg18[%c0_80, %c32_81] : memref<16x640xf32, #tpu.memory_space<vmem>>, vector<16x160xf32>
    %c64 = arith.constant 64 : index
    %c0_82 = arith.constant 0 : index
    %124 = vector.load %arg19[%c64, %c0_82] : memref<144x576xf32, #tpu.memory_space<vmem>>, vector<16x160xf32>
    tpu.vector_store %arg19[%c64, %c0_82], %123 {strides = array<i32>} : memref<144x576xf32, #tpu.memory_space<vmem>>, vector<16x160xf32>,
    %c0_83 = arith.constant 0 : index
    %c33_84 = arith.constant 33 : index
    %125 = vector.load %arg18[%c0_83, %c33_84] : memref<16x640xf32, #tpu.memory_space<vmem>>, vector<16x160xf32>
    %cst_85 = arith.constant 0.000000e+00 : f32
    %126 = vector.shape_cast %88 : vector<1x160xi1> to vector<1x160xi1>
    %127 = vector.broadcast %126 : vector<1x160xi1> to vector<16x160xi1>
    %128 = vector.broadcast %cst_85 : f32 to vector<16x160xf32>
    %129 = arith.select %127, %128, %125 : vector<16x160xi1>, vector<16x160xf32>
    %c80 = arith.constant 80 : index
    %c0_86 = arith.constant 0 : index
    %130 = vector.load %arg19[%c80, %c0_86] : memref<144x576xf32, #tpu.memory_space<vmem>>, vector<16x160xf32>
    tpu.vector_store %arg19[%c80, %c0_86], %129 {strides = array<i32>} : memref<144x576xf32, #tpu.memory_space<vmem>>, vector<16x160xf32>,
    %c0_87 = arith.constant 0 : index
    %c39 = arith.constant 39 : index
    %131 = vector.load %arg18[%c0_87, %c39] : memref<16x640xf32, #tpu.memory_space<vmem>>, vector<16x160xf32>
    %cst_88 = arith.constant 0.000000e+00 : f32
    %132 = vector.shape_cast %86 : vector<1x160xi1> to vector<1x160xi1>
    %133 = vector.broadcast %132 : vector<1x160xi1> to vector<16x160xi1>
    %134 = vector.broadcast %cst_88 : f32 to vector<16x160xf32>
    %135 = arith.select %133, %134, %131 : vector<16x160xi1>, vector<16x160xf32>
    %c96 = arith.constant 96 : index
    %c0_89 = arith.constant 0 : index
    %136 = vector.load %arg19[%c96, %c0_89] : memref<144x576xf32, #tpu.memory_space<vmem>>, vector<16x160xf32>
    tpu.vector_store %arg19[%c96, %c0_89], %135 {strides = array<i32>} : memref<144x576xf32, #tpu.memory_space<vmem>>, vector<16x160xf32>,
    %c0_90 = arith.constant 0 : index
    %c40 = arith.constant 40 : index
    %137 = vector.load %arg18[%c0_90, %c40] : memref<16x640xf32, #tpu.memory_space<vmem>>, vector<16x160xf32>
    %c112 = arith.constant 112 : index
    %c0_91 = arith.constant 0 : index
    %138 = vector.load %arg19[%c112, %c0_91] : memref<144x576xf32, #tpu.memory_space<vmem>>, vector<16x160xf32>
    tpu.vector_store %arg19[%c112, %c0_91], %137 {strides = array<i32>} : memref<144x576xf32, #tpu.memory_space<vmem>>, vector<16x160xf32>,
    %c0_92 = arith.constant 0 : index
    %c41 = arith.constant 41 : index
    %139 = vector.load %arg18[%c0_92, %c41] : memref<16x640xf32, #tpu.memory_space<vmem>>, vector<16x160xf32>
    %cst_93 = arith.constant 0.000000e+00 : f32
    %140 = vector.shape_cast %88 : vector<1x160xi1> to vector<1x160xi1>
    %141 = vector.broadcast %140 : vector<1x160xi1> to vector<16x160xi1>
    %142 = vector.broadcast %cst_93 : f32 to vector<16x160xf32>
    %143 = arith.select %141, %142, %139 : vector<16x160xi1>, vector<16x160xf32>
    %c128 = arith.constant 128 : index
    %c0_94 = arith.constant 0 : index
    %144 = vector.load %arg19[%c128, %c0_94] : memref<144x576xf32, #tpu.memory_space<vmem>>, vector<16x160xf32>
    tpu.vector_store %arg19[%c128, %c0_94], %143 {strides = array<i32>} : memref<144x576xf32, #tpu.memory_space<vmem>>, vector<16x160xf32>,
    %c0_95 = arith.constant 0 : index
    %c0_96 = arith.constant 0 : index
    %145 = vector.load %arg19[%c0_95, %c0_96] : memref<144x576xf32, #tpu.memory_space<vmem>>, vector<144x160xf32>
    %c0_97 = arith.constant 0 : index
    %c0_98 = arith.constant 0 : index
    %146 = vector.load %arg3[%c0_97, %c0_98] : memref<8x144xf32, #tpu.memory_space<vmem>>, vector<8x144xf32>
    %cst_99 = arith.constant dense<0.000000e+00> : vector<8x160xf32>
    %147 = tpu.matmul %146, %145, %cst_99 {dimension_numbers = #tpu.dot_dimension_numbers<[1], [0], [0], [1], [0, 0, 1, 1], [], []>} : vector<8x144xf32>, vector<144x160xf32>, vector<8x160xf32> -> vector<8x160xf32>
    %c0_100 = arith.constant 0 : index
    %c0_101 = arith.constant 0 : index
    %148 = vector.load %arg4[%c0_100, %c0_101] : memref<8x1xf32, #tpu.memory_space<vmem>>, vector<8x1xf32>
    %149 = vector.broadcast %148 : vector<8x1xf32> to vector<8x160xf32>
    %150 = arith.addf %147, %149 : vector<8x160xf32>
    %cst_102 = arith.constant 0.000000e+00 : f32
    %151 = vector.broadcast %cst_102 : f32 to vector<8x160xf32>
    %152 = arith.maximumf %150, %151 : vector<8x160xf32>
    %cst_103 = arith.constant 0.000000e+00 : f32
    %153 = vector.shape_cast %99 : vector<1x160xi1> to vector<1x160xi1>
    %154 = vector.broadcast %153 : vector<1x160xi1> to vector<8x160xi1>
    %155 = vector.broadcast %cst_103 : f32 to vector<8x160xf32>
    %156 = arith.select %154, %155, %152 : vector<8x160xi1>, vector<8x160xf32>
    %cst_104 = arith.constant 0.000000e+00 : f32
    %157 = vector.broadcast %cst_104 : f32 to vector<16x640xf32>
    %c0_105 = arith.constant 0 : index
    %c0_106 = arith.constant 0 : index
    %158 = vector.load %arg18[%c0_105, %c0_106] : memref<16x640xf32, #tpu.memory_space<vmem>>, vector<16x640xf32>
    tpu.vector_store %arg18[%c0_105, %c0_106], %157 {strides = array<i32>} : memref<16x640xf32, #tpu.memory_space<vmem>>, vector<16x640xf32>,
    %c0_107 = arith.constant 0 : index
    %c32_108 = arith.constant 32 : index
    %159 = vector.load %arg18[%c0_107, %c32_108] : memref<16x640xf32, #tpu.memory_space<vmem>>, vector<8x160xf32>
    tpu.vector_store %arg18[%c0_107, %c32_108], %156 {strides = array<i32>} : memref<16x640xf32, #tpu.memory_space<vmem>>, vector<8x160xf32>,
    %c0_109 = arith.constant 0 : index
    %c33_110 = arith.constant 33 : index
    %160 = vector.load %arg18[%c0_109, %c33_110] : memref<16x640xf32, #tpu.memory_space<vmem>>, vector<8x160xf32>
    %c0_111 = arith.constant 0 : index
    %c40_112 = arith.constant 40 : index
    %161 = vector.load %arg18[%c0_111, %c40_112] : memref<16x640xf32, #tpu.memory_space<vmem>>, vector<8x160xf32>
    %c0_113 = arith.constant 0 : index
    %c41_114 = arith.constant 41 : index
    %162 = vector.load %arg18[%c0_113, %c41_114] : memref<16x640xf32, #tpu.memory_space<vmem>>, vector<8x160xf32>
    %163 = arith.maximumf %156, %160 : vector<8x160xf32>
    %164 = arith.maximumf %161, %162 : vector<8x160xf32>
    %165 = arith.maximumf %163, %164 : vector<8x160xf32>
    %c0_115 = arith.constant 0 : index
    %c0_116 = arith.constant 0 : index
    %166 = vector.load %arg14[%c0_115, %c0_116] : memref<160x48xf32, #tpu.memory_space<vmem>>, vector<160x48xf32>
    %cst_117 = arith.constant dense<0.000000e+00> : vector<8x48xf32>
    %167 = tpu.matmul %165, %166, %cst_117 {dimension_numbers = #tpu.dot_dimension_numbers<[1], [0], [0], [1], [0, 0, 1, 1], [], []>} : vector<8x160xf32>, vector<160x48xf32>, vector<8x48xf32> -> vector<8x48xf32>
    %168 = tpu.iota {dimensions = array<i32: 1>} : vector<1x48xi32>
    %c3_i32_118 = arith.constant 3 : i32
    %169 = vector.broadcast %c3_i32_118 : i32 to vector<1x48xi32>
    %170 = arith.andi %168, %169 : vector<1x48xi32>
    %c2_i32 = arith.constant 2 : i32
    %171 = vector.broadcast %c2_i32 : i32 to vector<1x48xi32>
    %172 = arith.shrsi %168, %171 : vector<1x48xi32>
    %c0_i32_119 = arith.constant 0 : i32
    %173 = vector.broadcast %c0_i32_119 : i32 to vector<1x48xi32>
    %174 = arith.cmpi eq, %170, %173 : vector<1x48xi32>
    %c3_i32_120 = arith.constant 3 : i32
    %175 = vector.broadcast %c3_i32_120 : i32 to vector<1x48xi32>
    %176 = arith.cmpi eq, %170, %175 : vector<1x48xi32>
    %c0_i32_121 = arith.constant 0 : i32
    %177 = vector.broadcast %c0_i32_121 : i32 to vector<1x48xi32>
    %178 = arith.cmpi eq, %172, %177 : vector<1x48xi32>
    %c5_i32 = arith.constant 5 : i32
    %179 = vector.broadcast %c5_i32 : i32 to vector<1x48xi32>
    %180 = arith.cmpi eq, %172, %179 : vector<1x48xi32>
    %181 = arith.ori %178, %180 : vector<1x48xi1>
    %c6_i32 = arith.constant 6 : i32
    %182 = vector.broadcast %c6_i32 : i32 to vector<1x48xi32>
    %183 = arith.cmpi eq, %172, %182 : vector<1x48xi32>
    %184 = arith.ori %181, %183 : vector<1x48xi1>
    %c11_i32 = arith.constant 11 : i32
    %185 = vector.broadcast %c11_i32 : i32 to vector<1x48xi32>
    %186 = arith.cmpi eq, %172, %185 : vector<1x48xi32>
    %187 = arith.ori %184, %186 : vector<1x48xi1>
    %cst_122 = arith.constant 0.000000e+00 : f32
    %188 = vector.broadcast %cst_122 : f32 to vector<16x640xf32>
    %c0_123 = arith.constant 0 : index
    %c0_124 = arith.constant 0 : index
    %189 = vector.load %arg18[%c0_123, %c0_124] : memref<16x640xf32, #tpu.memory_space<vmem>>, vector<16x640xf32>
    tpu.vector_store %arg18[%c0_123, %c0_124], %188 {strides = array<i32>} : memref<16x640xf32, #tpu.memory_space<vmem>>, vector<16x640xf32>,
    %c0_125 = arith.constant 0 : index
    %c32_126 = arith.constant 32 : index
    %190 = vector.load %arg18[%c0_125, %c32_126] : memref<16x640xf32, #tpu.memory_space<vmem>>, vector<8x48xf32>
    tpu.vector_store %arg18[%c0_125, %c32_126], %167 {strides = array<i32>} : memref<16x640xf32, #tpu.memory_space<vmem>>, vector<8x48xf32>,
    %c0_127 = arith.constant 0 : index
    %c27 = arith.constant 27 : index
    %191 = vector.load %arg18[%c0_127, %c27] : memref<16x640xf32, #tpu.memory_space<vmem>>, vector<8x48xf32>
    %cst_128 = arith.constant 0.000000e+00 : f32
    %192 = vector.shape_cast %174 : vector<1x48xi1> to vector<1x48xi1>
    %193 = vector.broadcast %192 : vector<1x48xi1> to vector<8x48xi1>
    %194 = vector.broadcast %cst_128 : f32 to vector<8x48xf32>
    %195 = arith.select %193, %194, %191 : vector<8x48xi1>, vector<8x48xf32>
    %c0_129 = arith.constant 0 : index
    %c0_130 = arith.constant 0 : index
    %196 = vector.load %arg19[%c0_129, %c0_130] : memref<144x576xf32, #tpu.memory_space<vmem>>, vector<8x48xf32>
    tpu.vector_store %arg19[%c0_129, %c0_130], %195 {strides = array<i32>} : memref<144x576xf32, #tpu.memory_space<vmem>>, vector<8x48xf32>,
    %c0_131 = arith.constant 0 : index
    %c28 = arith.constant 28 : index
    %197 = vector.load %arg18[%c0_131, %c28] : memref<16x640xf32, #tpu.memory_space<vmem>>, vector<8x48xf32>
    %c8_132 = arith.constant 8 : index
    %c0_133 = arith.constant 0 : index
    %198 = vector.load %arg19[%c8_132, %c0_133] : memref<144x576xf32, #tpu.memory_space<vmem>>, vector<8x48xf32>
    tpu.vector_store %arg19[%c8_132, %c0_133], %197 {strides = array<i32>} : memref<144x576xf32, #tpu.memory_space<vmem>>, vector<8x48xf32>,
    %c0_134 = arith.constant 0 : index
    %c29 = arith.constant 29 : index
    %199 = vector.load %arg18[%c0_134, %c29] : memref<16x640xf32, #tpu.memory_space<vmem>>, vector<8x48xf32>
    %cst_135 = arith.constant 0.000000e+00 : f32
    %200 = vector.shape_cast %176 : vector<1x48xi1> to vector<1x48xi1>
    %201 = vector.broadcast %200 : vector<1x48xi1> to vector<8x48xi1>
    %202 = vector.broadcast %cst_135 : f32 to vector<8x48xf32>
    %203 = arith.select %201, %202, %199 : vector<8x48xi1>, vector<8x48xf32>
    %c16_136 = arith.constant 16 : index
    %c0_137 = arith.constant 0 : index
    %204 = vector.load %arg19[%c16_136, %c0_137] : memref<144x576xf32, #tpu.memory_space<vmem>>, vector<8x48xf32>
    tpu.vector_store %arg19[%c16_136, %c0_137], %203 {strides = array<i32>} : memref<144x576xf32, #tpu.memory_space<vmem>>, vector<8x48xf32>,
    %c0_138 = arith.constant 0 : index
    %c31_139 = arith.constant 31 : index
    %205 = vector.load %arg18[%c0_138, %c31_139] : memref<16x640xf32, #tpu.memory_space<vmem>>, vector<8x48xf32>
    %cst_140 = arith.constant 0.000000e+00 : f32
    %206 = vector.shape_cast %174 : vector<1x48xi1> to vector<1x48xi1>
    %207 = vector.broadcast %206 : vector<1x48xi1> to vector<8x48xi1>
    %208 = vector.broadcast %cst_140 : f32 to vector<8x48xf32>
    %209 = arith.select %207, %208, %205 : vector<8x48xi1>, vector<8x48xf32>
    %c24_141 = arith.constant 24 : index
    %c0_142 = arith.constant 0 : index
    %210 = vector.load %arg19[%c24_141, %c0_142] : memref<144x576xf32, #tpu.memory_space<vmem>>, vector<8x48xf32>
    tpu.vector_store %arg19[%c24_141, %c0_142], %209 {strides = array<i32>} : memref<144x576xf32, #tpu.memory_space<vmem>>, vector<8x48xf32>,
    %c0_143 = arith.constant 0 : index
    %c32_144 = arith.constant 32 : index
    %211 = vector.load %arg18[%c0_143, %c32_144] : memref<16x640xf32, #tpu.memory_space<vmem>>, vector<8x48xf32>
    %c32_145 = arith.constant 32 : index
    %c0_146 = arith.constant 0 : index
    %212 = vector.load %arg19[%c32_145, %c0_146] : memref<144x576xf32, #tpu.memory_space<vmem>>, vector<8x48xf32>
    tpu.vector_store %arg19[%c32_145, %c0_146], %211 {strides = array<i32>} : memref<144x576xf32, #tpu.memory_space<vmem>>, vector<8x48xf32>,
    %c0_147 = arith.constant 0 : index
    %c33_148 = arith.constant 33 : index
    %213 = vector.load %arg18[%c0_147, %c33_148] : memref<16x640xf32, #tpu.memory_space<vmem>>, vector<8x48xf32>
    %cst_149 = arith.constant 0.000000e+00 : f32
    %214 = vector.shape_cast %176 : vector<1x48xi1> to vector<1x48xi1>
    %215 = vector.broadcast %214 : vector<1x48xi1> to vector<8x48xi1>
    %216 = vector.broadcast %cst_149 : f32 to vector<8x48xf32>
    %217 = arith.select %215, %216, %213 : vector<8x48xi1>, vector<8x48xf32>
    %c40_150 = arith.constant 40 : index
    %c0_151 = arith.constant 0 : index
    %218 = vector.load %arg19[%c40_150, %c0_151] : memref<144x576xf32, #tpu.memory_space<vmem>>, vector<8x48xf32>
    tpu.vector_store %arg19[%c40_150, %c0_151], %217 {strides = array<i32>} : memref<144x576xf32, #tpu.memory_space<vmem>>, vector<8x48xf32>,
    %c0_152 = arith.constant 0 : index
    %c35 = arith.constant 35 : index
    %219 = vector.load %arg18[%c0_152, %c35] : memref<16x640xf32, #tpu.memory_space<vmem>>, vector<8x48xf32>
    %cst_153 = arith.constant 0.000000e+00 : f32
    %220 = vector.shape_cast %174 : vector<1x48xi1> to vector<1x48xi1>
    %221 = vector.broadcast %220 : vector<1x48xi1> to vector<8x48xi1>
    %222 = vector.broadcast %cst_153 : f32 to vector<8x48xf32>
    %223 = arith.select %221, %222, %219 : vector<8x48xi1>, vector<8x48xf32>
    %c48_154 = arith.constant 48 : index
    %c0_155 = arith.constant 0 : index
    %224 = vector.load %arg19[%c48_154, %c0_155] : memref<144x576xf32, #tpu.memory_space<vmem>>, vector<8x48xf32>
    tpu.vector_store %arg19[%c48_154, %c0_155], %223 {strides = array<i32>} : memref<144x576xf32, #tpu.memory_space<vmem>>, vector<8x48xf32>,
    %c0_156 = arith.constant 0 : index
    %c36 = arith.constant 36 : index
    %225 = vector.load %arg18[%c0_156, %c36] : memref<16x640xf32, #tpu.memory_space<vmem>>, vector<8x48xf32>
    %c56 = arith.constant 56 : index
    %c0_157 = arith.constant 0 : index
    %226 = vector.load %arg19[%c56, %c0_157] : memref<144x576xf32, #tpu.memory_space<vmem>>, vector<8x48xf32>
    tpu.vector_store %arg19[%c56, %c0_157], %225 {strides = array<i32>} : memref<144x576xf32, #tpu.memory_space<vmem>>, vector<8x48xf32>,
    %c0_158 = arith.constant 0 : index
    %c37 = arith.constant 37 : index
    %227 = vector.load %arg18[%c0_158, %c37] : memref<16x640xf32, #tpu.memory_space<vmem>>, vector<8x48xf32>
    %cst_159 = arith.constant 0.000000e+00 : f32
    %228 = vector.shape_cast %176 : vector<1x48xi1> to vector<1x48xi1>
    %229 = vector.broadcast %228 : vector<1x48xi1> to vector<8x48xi1>
    %230 = vector.broadcast %cst_159 : f32 to vector<8x48xf32>
    %231 = arith.select %229, %230, %227 : vector<8x48xi1>, vector<8x48xf32>
    %c64_160 = arith.constant 64 : index
    %c0_161 = arith.constant 0 : index
    %232 = vector.load %arg19[%c64_160, %c0_161] : memref<144x576xf32, #tpu.memory_space<vmem>>, vector<8x48xf32>
    tpu.vector_store %arg19[%c64_160, %c0_161], %231 {strides = array<i32>} : memref<144x576xf32, #tpu.memory_space<vmem>>, vector<8x48xf32>,
    %c0_162 = arith.constant 0 : index
    %c0_163 = arith.constant 0 : index
    %233 = vector.load %arg19[%c0_162, %c0_163] : memref<144x576xf32, #tpu.memory_space<vmem>>, vector<72x48xf32>
    %c0_164 = arith.constant 0 : index
    %c0_165 = arith.constant 0 : index
    %234 = vector.load %arg5[%c0_164, %c0_165] : memref<8x72xf32, #tpu.memory_space<vmem>>, vector<8x72xf32>
    %cst_166 = arith.constant dense<0.000000e+00> : vector<8x48xf32>
    %235 = tpu.matmul %234, %233, %cst_166 {dimension_numbers = #tpu.dot_dimension_numbers<[1], [0], [0], [1], [0, 0, 1, 1], [], []>} : vector<8x72xf32>, vector<72x48xf32>, vector<8x48xf32> -> vector<8x48xf32>
    %c0_167 = arith.constant 0 : index
    %c0_168 = arith.constant 0 : index
    %236 = vector.load %arg6[%c0_167, %c0_168] : memref<8x1xf32, #tpu.memory_space<vmem>>, vector<8x1xf32>
    %237 = vector.broadcast %236 : vector<8x1xf32> to vector<8x48xf32>
    %238 = arith.addf %235, %237 : vector<8x48xf32>
    %cst_169 = arith.constant 0.000000e+00 : f32
    %239 = vector.broadcast %cst_169 : f32 to vector<8x48xf32>
    %240 = arith.maximumf %238, %239 : vector<8x48xf32>
    %cst_170 = arith.constant 0.000000e+00 : f32
    %241 = vector.shape_cast %187 : vector<1x48xi1> to vector<1x48xi1>
    %242 = vector.broadcast %241 : vector<1x48xi1> to vector<8x48xi1>
    %243 = vector.broadcast %cst_170 : f32 to vector<8x48xf32>
    %244 = arith.select %242, %243, %240 : vector<8x48xi1>, vector<8x48xf32>
    %c0_171 = arith.constant 0 : index
    %c0_172 = arith.constant 0 : index
    %245 = vector.load %arg15[%c0_171, %c0_172] : memref<48x160xf32, #tpu.memory_space<vmem>>, vector<48x160xf32>
    %cst_173 = arith.constant dense<0.000000e+00> : vector<8x160xf32>
    %246 = tpu.matmul %244, %245, %cst_173 {dimension_numbers = #tpu.dot_dimension_numbers<[1], [0], [0], [1], [0, 0, 1, 1], [], []>} : vector<8x48xf32>, vector<48x160xf32>, vector<8x160xf32> -> vector<8x160xf32>
    %247 = tpu.iota {dimensions = array<i32: 1>} : vector<1x160xi32>
    %c7_i32_174 = arith.constant 7 : i32
    %248 = vector.broadcast %c7_i32_174 : i32 to vector<1x160xi32>
    %249 = arith.andi %247, %248 : vector<1x160xi32>
    %c3_i32_175 = arith.constant 3 : i32
    %250 = vector.broadcast %c3_i32_175 : i32 to vector<1x160xi32>
    %251 = arith.shrsi %247, %250 : vector<1x160xi32>
    %c0_i32_176 = arith.constant 0 : i32
    %252 = vector.broadcast %c0_i32_176 : i32 to vector<1x160xi32>
    %253 = arith.cmpi eq, %249, %252 : vector<1x160xi32>
    %c7_i32_177 = arith.constant 7 : i32
    %254 = vector.broadcast %c7_i32_177 : i32 to vector<1x160xi32>
    %255 = arith.cmpi eq, %249, %254 : vector<1x160xi32>
    %c0_i32_178 = arith.constant 0 : i32
    %256 = vector.broadcast %c0_i32_178 : i32 to vector<1x160xi32>
    %257 = arith.cmpi eq, %251, %256 : vector<1x160xi32>
    %c9_i32_179 = arith.constant 9 : i32
    %258 = vector.broadcast %c9_i32_179 : i32 to vector<1x160xi32>
    %259 = arith.cmpi eq, %251, %258 : vector<1x160xi32>
    %260 = arith.ori %257, %259 : vector<1x160xi1>
    %c10_i32_180 = arith.constant 10 : i32
    %261 = vector.broadcast %c10_i32_180 : i32 to vector<1x160xi32>
    %262 = arith.cmpi eq, %251, %261 : vector<1x160xi32>
    %263 = arith.ori %260, %262 : vector<1x160xi1>
    %c19_i32_181 = arith.constant 19 : i32
    %264 = vector.broadcast %c19_i32_181 : i32 to vector<1x160xi32>
    %265 = arith.cmpi eq, %251, %264 : vector<1x160xi32>
    %266 = arith.ori %263, %265 : vector<1x160xi1>
    %cst_182 = arith.constant 0.000000e+00 : f32
    %267 = vector.broadcast %cst_182 : f32 to vector<16x640xf32>
    %c0_183 = arith.constant 0 : index
    %c0_184 = arith.constant 0 : index
    %268 = vector.load %arg18[%c0_183, %c0_184] : memref<16x640xf32, #tpu.memory_space<vmem>>, vector<16x640xf32>
    tpu.vector_store %arg18[%c0_183, %c0_184], %267 {strides = array<i32>} : memref<16x640xf32, #tpu.memory_space<vmem>>, vector<16x640xf32>,
    %c0_185 = arith.constant 0 : index
    %c32_186 = arith.constant 32 : index
    %269 = vector.load %arg18[%c0_185, %c32_186] : memref<16x640xf32, #tpu.memory_space<vmem>>, vector<8x160xf32>
    tpu.vector_store %arg18[%c0_185, %c32_186], %246 {strides = array<i32>} : memref<16x640xf32, #tpu.memory_space<vmem>>, vector<8x160xf32>,
    %c0_187 = arith.constant 0 : index
    %c23_188 = arith.constant 23 : index
    %270 = vector.load %arg18[%c0_187, %c23_188] : memref<16x640xf32, #tpu.memory_space<vmem>>, vector<8x160xf32>
    %cst_189 = arith.constant 0.000000e+00 : f32
    %271 = vector.shape_cast %253 : vector<1x160xi1> to vector<1x160xi1>
    %272 = vector.broadcast %271 : vector<1x160xi1> to vector<8x160xi1>
    %273 = vector.broadcast %cst_189 : f32 to vector<8x160xf32>
    %274 = arith.select %272, %273, %270 : vector<8x160xi1>, vector<8x160xf32>
    %c0_190 = arith.constant 0 : index
    %c0_191 = arith.constant 0 : index
    %275 = vector.load %arg19[%c0_190, %c0_191] : memref<144x576xf32, #tpu.memory_space<vmem>>, vector<8x160xf32>
    tpu.vector_store %arg19[%c0_190, %c0_191], %274 {strides = array<i32>} : memref<144x576xf32, #tpu.memory_space<vmem>>, vector<8x160xf32>,
    %c0_192 = arith.constant 0 : index
    %c24_193 = arith.constant 24 : index
    %276 = vector.load %arg18[%c0_192, %c24_193] : memref<16x640xf32, #tpu.memory_space<vmem>>, vector<8x160xf32>
    %c8_194 = arith.constant 8 : index
    %c0_195 = arith.constant 0 : index
    %277 = vector.load %arg19[%c8_194, %c0_195] : memref<144x576xf32, #tpu.memory_space<vmem>>, vector<8x160xf32>
    tpu.vector_store %arg19[%c8_194, %c0_195], %276 {strides = array<i32>} : memref<144x576xf32, #tpu.memory_space<vmem>>, vector<8x160xf32>,
    %c0_196 = arith.constant 0 : index
    %c25_197 = arith.constant 25 : index
    %278 = vector.load %arg18[%c0_196, %c25_197] : memref<16x640xf32, #tpu.memory_space<vmem>>, vector<8x160xf32>
    %cst_198 = arith.constant 0.000000e+00 : f32
    %279 = vector.shape_cast %255 : vector<1x160xi1> to vector<1x160xi1>
    %280 = vector.broadcast %279 : vector<1x160xi1> to vector<8x160xi1>
    %281 = vector.broadcast %cst_198 : f32 to vector<8x160xf32>
    %282 = arith.select %280, %281, %278 : vector<8x160xi1>, vector<8x160xf32>
    %c16_199 = arith.constant 16 : index
    %c0_200 = arith.constant 0 : index
    %283 = vector.load %arg19[%c16_199, %c0_200] : memref<144x576xf32, #tpu.memory_space<vmem>>, vector<8x160xf32>
    tpu.vector_store %arg19[%c16_199, %c0_200], %282 {strides = array<i32>} : memref<144x576xf32, #tpu.memory_space<vmem>>, vector<8x160xf32>,
    %c0_201 = arith.constant 0 : index
    %c31_202 = arith.constant 31 : index
    %284 = vector.load %arg18[%c0_201, %c31_202] : memref<16x640xf32, #tpu.memory_space<vmem>>, vector<8x160xf32>
    %cst_203 = arith.constant 0.000000e+00 : f32
    %285 = vector.shape_cast %253 : vector<1x160xi1> to vector<1x160xi1>
    %286 = vector.broadcast %285 : vector<1x160xi1> to vector<8x160xi1>
    %287 = vector.broadcast %cst_203 : f32 to vector<8x160xf32>
    %288 = arith.select %286, %287, %284 : vector<8x160xi1>, vector<8x160xf32>
    %c24_204 = arith.constant 24 : index
    %c0_205 = arith.constant 0 : index
    %289 = vector.load %arg19[%c24_204, %c0_205] : memref<144x576xf32, #tpu.memory_space<vmem>>, vector<8x160xf32>
    tpu.vector_store %arg19[%c24_204, %c0_205], %288 {strides = array<i32>} : memref<144x576xf32, #tpu.memory_space<vmem>>, vector<8x160xf32>,
    %c0_206 = arith.constant 0 : index
    %c32_207 = arith.constant 32 : index
    %290 = vector.load %arg18[%c0_206, %c32_207] : memref<16x640xf32, #tpu.memory_space<vmem>>, vector<8x160xf32>
    %c32_208 = arith.constant 32 : index
    %c0_209 = arith.constant 0 : index
    %291 = vector.load %arg19[%c32_208, %c0_209] : memref<144x576xf32, #tpu.memory_space<vmem>>, vector<8x160xf32>
    tpu.vector_store %arg19[%c32_208, %c0_209], %290 {strides = array<i32>} : memref<144x576xf32, #tpu.memory_space<vmem>>, vector<8x160xf32>,
    %c0_210 = arith.constant 0 : index
    %c33_211 = arith.constant 33 : index
    %292 = vector.load %arg18[%c0_210, %c33_211] : memref<16x640xf32, #tpu.memory_space<vmem>>, vector<8x160xf32>
    %cst_212 = arith.constant 0.000000e+00 : f32
    %293 = vector.shape_cast %255 : vector<1x160xi1> to vector<1x160xi1>
    %294 = vector.broadcast %293 : vector<1x160xi1> to vector<8x160xi1>
    %295 = vector.broadcast %cst_212 : f32 to vector<8x160xf32>
    %296 = arith.select %294, %295, %292 : vector<8x160xi1>, vector<8x160xf32>
    %c40_213 = arith.constant 40 : index
    %c0_214 = arith.constant 0 : index
    %297 = vector.load %arg19[%c40_213, %c0_214] : memref<144x576xf32, #tpu.memory_space<vmem>>, vector<8x160xf32>
    tpu.vector_store %arg19[%c40_213, %c0_214], %296 {strides = array<i32>} : memref<144x576xf32, #tpu.memory_space<vmem>>, vector<8x160xf32>,
    %c0_215 = arith.constant 0 : index
    %c39_216 = arith.constant 39 : index
    %298 = vector.load %arg18[%c0_215, %c39_216] : memref<16x640xf32, #tpu.memory_space<vmem>>, vector<8x160xf32>
    %cst_217 = arith.constant 0.000000e+00 : f32
    %299 = vector.shape_cast %253 : vector<1x160xi1> to vector<1x160xi1>
    %300 = vector.broadcast %299 : vector<1x160xi1> to vector<8x160xi1>
    %301 = vector.broadcast %cst_217 : f32 to vector<8x160xf32>
    %302 = arith.select %300, %301, %298 : vector<8x160xi1>, vector<8x160xf32>
    %c48_218 = arith.constant 48 : index
    %c0_219 = arith.constant 0 : index
    %303 = vector.load %arg19[%c48_218, %c0_219] : memref<144x576xf32, #tpu.memory_space<vmem>>, vector<8x160xf32>
    tpu.vector_store %arg19[%c48_218, %c0_219], %302 {strides = array<i32>} : memref<144x576xf32, #tpu.memory_space<vmem>>, vector<8x160xf32>,
    %c0_220 = arith.constant 0 : index
    %c40_221 = arith.constant 40 : index
    %304 = vector.load %arg18[%c0_220, %c40_221] : memref<16x640xf32, #tpu.memory_space<vmem>>, vector<8x160xf32>
    %c56_222 = arith.constant 56 : index
    %c0_223 = arith.constant 0 : index
    %305 = vector.load %arg19[%c56_222, %c0_223] : memref<144x576xf32, #tpu.memory_space<vmem>>, vector<8x160xf32>
    tpu.vector_store %arg19[%c56_222, %c0_223], %304 {strides = array<i32>} : memref<144x576xf32, #tpu.memory_space<vmem>>, vector<8x160xf32>,
    %c0_224 = arith.constant 0 : index
    %c41_225 = arith.constant 41 : index
    %306 = vector.load %arg18[%c0_224, %c41_225] : memref<16x640xf32, #tpu.memory_space<vmem>>, vector<8x160xf32>
    %cst_226 = arith.constant 0.000000e+00 : f32
    %307 = vector.shape_cast %255 : vector<1x160xi1> to vector<1x160xi1>
    %308 = vector.broadcast %307 : vector<1x160xi1> to vector<8x160xi1>
    %309 = vector.broadcast %cst_226 : f32 to vector<8x160xf32>
    %310 = arith.select %308, %309, %306 : vector<8x160xi1>, vector<8x160xf32>
    %c64_227 = arith.constant 64 : index
    %c0_228 = arith.constant 0 : index
    %311 = vector.load %arg19[%c64_227, %c0_228] : memref<144x576xf32, #tpu.memory_space<vmem>>, vector<8x160xf32>
    tpu.vector_store %arg19[%c64_227, %c0_228], %310 {strides = array<i32>} : memref<144x576xf32, #tpu.memory_space<vmem>>, vector<8x160xf32>,
    %c0_229 = arith.constant 0 : index
    %c0_230 = arith.constant 0 : index
    %312 = vector.load %arg19[%c0_229, %c0_230] : memref<144x576xf32, #tpu.memory_space<vmem>>, vector<72x160xf32>
    %c0_231 = arith.constant 0 : index
    %c0_232 = arith.constant 0 : index
    %313 = vector.load %arg7[%c0_231, %c0_232] : memref<8x72xf32, #tpu.memory_space<vmem>>, vector<8x72xf32>
    %cst_233 = arith.constant dense<0.000000e+00> : vector<8x160xf32>
    %314 = tpu.matmul %313, %312, %cst_233 {dimension_numbers = #tpu.dot_dimension_numbers<[1], [0], [0], [1], [0, 0, 1, 1], [], []>} : vector<8x72xf32>, vector<72x160xf32>, vector<8x160xf32> -> vector<8x160xf32>
    %c0_234 = arith.constant 0 : index
    %c0_235 = arith.constant 0 : index
    %315 = vector.load %arg8[%c0_234, %c0_235] : memref<8x1xf32, #tpu.memory_space<vmem>>, vector<8x1xf32>
    %316 = vector.broadcast %315 : vector<8x1xf32> to vector<8x160xf32>
    %317 = arith.addf %314, %316 : vector<8x160xf32>
    %cst_236 = arith.constant 0.000000e+00 : f32
    %318 = vector.broadcast %cst_236 : f32 to vector<8x160xf32>
    %319 = arith.maximumf %317, %318 : vector<8x160xf32>
    %cst_237 = arith.constant 0.000000e+00 : f32
    %320 = vector.shape_cast %266 : vector<1x160xi1> to vector<1x160xi1>
    %321 = vector.broadcast %320 : vector<1x160xi1> to vector<8x160xi1>
    %322 = vector.broadcast %cst_237 : f32 to vector<8x160xf32>
    %323 = arith.select %321, %322, %319 : vector<8x160xi1>, vector<8x160xf32>
    %c0_238 = arith.constant 0 : index
    %c0_239 = arith.constant 0 : index
    %324 = vector.load %arg16[%c0_238, %c0_239] : memref<160x576xf32, #tpu.memory_space<vmem>>, vector<160x576xf32>
    %cst_240 = arith.constant dense<0.000000e+00> : vector<8x576xf32>
    %325 = tpu.matmul %323, %324, %cst_240 {dimension_numbers = #tpu.dot_dimension_numbers<[1], [0], [0], [1], [0, 0, 1, 1], [], []>} : vector<8x160xf32>, vector<160x576xf32>, vector<8x576xf32> -> vector<8x576xf32>
    %326 = tpu.iota {dimensions = array<i32: 1>} : vector<1x576xi32>
    %c15_i32_241 = arith.constant 15 : i32
    %327 = vector.broadcast %c15_i32_241 : i32 to vector<1x576xi32>
    %328 = arith.andi %326, %327 : vector<1x576xi32>
    %c4_i32_242 = arith.constant 4 : i32
    %329 = vector.broadcast %c4_i32_242 : i32 to vector<1x576xi32>
    %330 = arith.shrsi %326, %329 : vector<1x576xi32>
    %c0_i32_243 = arith.constant 0 : i32
    %331 = vector.broadcast %c0_i32_243 : i32 to vector<1x576xi32>
    %332 = arith.cmpi eq, %328, %331 : vector<1x576xi32>
    %c15_i32_244 = arith.constant 15 : i32
    %333 = vector.broadcast %c15_i32_244 : i32 to vector<1x576xi32>
    %334 = arith.cmpi eq, %328, %333 : vector<1x576xi32>
    %c0_i32_245 = arith.constant 0 : i32
    %335 = vector.broadcast %c0_i32_245 : i32 to vector<1x576xi32>
    %336 = arith.cmpi eq, %330, %335 : vector<1x576xi32>
    %c17_i32_246 = arith.constant 17 : i32
    %337 = vector.broadcast %c17_i32_246 : i32 to vector<1x576xi32>
    %338 = arith.cmpi eq, %330, %337 : vector<1x576xi32>
    %339 = arith.ori %336, %338 : vector<1x576xi1>
    %c18_i32_247 = arith.constant 18 : i32
    %340 = vector.broadcast %c18_i32_247 : i32 to vector<1x576xi32>
    %341 = arith.cmpi eq, %330, %340 : vector<1x576xi32>
    %342 = arith.ori %339, %341 : vector<1x576xi1>
    %c35_i32_248 = arith.constant 35 : i32
    %343 = vector.broadcast %c35_i32_248 : i32 to vector<1x576xi32>
    %344 = arith.cmpi eq, %330, %343 : vector<1x576xi32>
    %345 = arith.ori %342, %344 : vector<1x576xi1>
    %cst_249 = arith.constant 0.000000e+00 : f32
    %346 = vector.broadcast %cst_249 : f32 to vector<16x640xf32>
    %c0_250 = arith.constant 0 : index
    %c0_251 = arith.constant 0 : index
    %347 = vector.load %arg18[%c0_250, %c0_251] : memref<16x640xf32, #tpu.memory_space<vmem>>, vector<16x640xf32>
    tpu.vector_store %arg18[%c0_250, %c0_251], %346 {strides = array<i32>} : memref<16x640xf32, #tpu.memory_space<vmem>>, vector<16x640xf32>,
    %c0_252 = arith.constant 0 : index
    %c32_253 = arith.constant 32 : index
    %348 = vector.load %arg18[%c0_252, %c32_253] : memref<16x640xf32, #tpu.memory_space<vmem>>, vector<8x576xf32>
    tpu.vector_store %arg18[%c0_252, %c32_253], %325 {strides = array<i32>} : memref<16x640xf32, #tpu.memory_space<vmem>>, vector<8x576xf32>,
    %c0_254 = arith.constant 0 : index
    %c15_255 = arith.constant 15 : index
    %349 = vector.load %arg18[%c0_254, %c15_255] : memref<16x640xf32, #tpu.memory_space<vmem>>, vector<8x576xf32>
    %cst_256 = arith.constant 0.000000e+00 : f32
    %350 = vector.shape_cast %332 : vector<1x576xi1> to vector<1x576xi1>
    %351 = vector.broadcast %350 : vector<1x576xi1> to vector<8x576xi1>
    %352 = vector.broadcast %cst_256 : f32 to vector<8x576xf32>
    %353 = arith.select %351, %352, %349 : vector<8x576xi1>, vector<8x576xf32>
    %c0_257 = arith.constant 0 : index
    %c0_258 = arith.constant 0 : index
    %354 = vector.load %arg19[%c0_257, %c0_258] : memref<144x576xf32, #tpu.memory_space<vmem>>, vector<8x576xf32>
    tpu.vector_store %arg19[%c0_257, %c0_258], %353 {strides = array<i32>} : memref<144x576xf32, #tpu.memory_space<vmem>>, vector<8x576xf32>,
    %c0_259 = arith.constant 0 : index
    %c16_260 = arith.constant 16 : index
    %355 = vector.load %arg18[%c0_259, %c16_260] : memref<16x640xf32, #tpu.memory_space<vmem>>, vector<8x576xf32>
    %c8_261 = arith.constant 8 : index
    %c0_262 = arith.constant 0 : index
    %356 = vector.load %arg19[%c8_261, %c0_262] : memref<144x576xf32, #tpu.memory_space<vmem>>, vector<8x576xf32>
    tpu.vector_store %arg19[%c8_261, %c0_262], %355 {strides = array<i32>} : memref<144x576xf32, #tpu.memory_space<vmem>>, vector<8x576xf32>,
    %c0_263 = arith.constant 0 : index
    %c17_264 = arith.constant 17 : index
    %357 = vector.load %arg18[%c0_263, %c17_264] : memref<16x640xf32, #tpu.memory_space<vmem>>, vector<8x576xf32>
    %cst_265 = arith.constant 0.000000e+00 : f32
    %358 = vector.shape_cast %334 : vector<1x576xi1> to vector<1x576xi1>
    %359 = vector.broadcast %358 : vector<1x576xi1> to vector<8x576xi1>
    %360 = vector.broadcast %cst_265 : f32 to vector<8x576xf32>
    %361 = arith.select %359, %360, %357 : vector<8x576xi1>, vector<8x576xf32>
    %c16_266 = arith.constant 16 : index
    %c0_267 = arith.constant 0 : index
    %362 = vector.load %arg19[%c16_266, %c0_267] : memref<144x576xf32, #tpu.memory_space<vmem>>, vector<8x576xf32>
    tpu.vector_store %arg19[%c16_266, %c0_267], %361 {strides = array<i32>} : memref<144x576xf32, #tpu.memory_space<vmem>>, vector<8x576xf32>,
    %c0_268 = arith.constant 0 : index
    %c31_269 = arith.constant 31 : index
    %363 = vector.load %arg18[%c0_268, %c31_269] : memref<16x640xf32, #tpu.memory_space<vmem>>, vector<8x576xf32>
    %cst_270 = arith.constant 0.000000e+00 : f32
    %364 = vector.shape_cast %332 : vector<1x576xi1> to vector<1x576xi1>
    %365 = vector.broadcast %364 : vector<1x576xi1> to vector<8x576xi1>
    %366 = vector.broadcast %cst_270 : f32 to vector<8x576xf32>
    %367 = arith.select %365, %366, %363 : vector<8x576xi1>, vector<8x576xf32>
    %c24_271 = arith.constant 24 : index
    %c0_272 = arith.constant 0 : index
    %368 = vector.load %arg19[%c24_271, %c0_272] : memref<144x576xf32, #tpu.memory_space<vmem>>, vector<8x576xf32>
    tpu.vector_store %arg19[%c24_271, %c0_272], %367 {strides = array<i32>} : memref<144x576xf32, #tpu.memory_space<vmem>>, vector<8x576xf32>,
    %c0_273 = arith.constant 0 : index
    %c32_274 = arith.constant 32 : index
    %369 = vector.load %arg18[%c0_273, %c32_274] : memref<16x640xf32, #tpu.memory_space<vmem>>, vector<8x576xf32>
    %c32_275 = arith.constant 32 : index
    %c0_276 = arith.constant 0 : index
    %370 = vector.load %arg19[%c32_275, %c0_276] : memref<144x576xf32, #tpu.memory_space<vmem>>, vector<8x576xf32>
    tpu.vector_store %arg19[%c32_275, %c0_276], %369 {strides = array<i32>} : memref<144x576xf32, #tpu.memory_space<vmem>>, vector<8x576xf32>,
    %c0_277 = arith.constant 0 : index
    %c33_278 = arith.constant 33 : index
    %371 = vector.load %arg18[%c0_277, %c33_278] : memref<16x640xf32, #tpu.memory_space<vmem>>, vector<8x576xf32>
    %cst_279 = arith.constant 0.000000e+00 : f32
    %372 = vector.shape_cast %334 : vector<1x576xi1> to vector<1x576xi1>
    %373 = vector.broadcast %372 : vector<1x576xi1> to vector<8x576xi1>
    %374 = vector.broadcast %cst_279 : f32 to vector<8x576xf32>
    %375 = arith.select %373, %374, %371 : vector<8x576xi1>, vector<8x576xf32>
    %c40_280 = arith.constant 40 : index
    %c0_281 = arith.constant 0 : index
    %376 = vector.load %arg19[%c40_280, %c0_281] : memref<144x576xf32, #tpu.memory_space<vmem>>, vector<8x576xf32>
    tpu.vector_store %arg19[%c40_280, %c0_281], %375 {strides = array<i32>} : memref<144x576xf32, #tpu.memory_space<vmem>>, vector<8x576xf32>,
    %c0_282 = arith.constant 0 : index
    %c47_283 = arith.constant 47 : index
    %377 = vector.load %arg18[%c0_282, %c47_283] : memref<16x640xf32, #tpu.memory_space<vmem>>, vector<8x576xf32>
    %cst_284 = arith.constant 0.000000e+00 : f32
    %378 = vector.shape_cast %332 : vector<1x576xi1> to vector<1x576xi1>
    %379 = vector.broadcast %378 : vector<1x576xi1> to vector<8x576xi1>
    %380 = vector.broadcast %cst_284 : f32 to vector<8x576xf32>
    %381 = arith.select %379, %380, %377 : vector<8x576xi1>, vector<8x576xf32>
    %c48_285 = arith.constant 48 : index
    %c0_286 = arith.constant 0 : index
    %382 = vector.load %arg19[%c48_285, %c0_286] : memref<144x576xf32, #tpu.memory_space<vmem>>, vector<8x576xf32>
    tpu.vector_store %arg19[%c48_285, %c0_286], %381 {strides = array<i32>} : memref<144x576xf32, #tpu.memory_space<vmem>>, vector<8x576xf32>,
    %c0_287 = arith.constant 0 : index
    %c48_288 = arith.constant 48 : index
    %383 = vector.load %arg18[%c0_287, %c48_288] : memref<16x640xf32, #tpu.memory_space<vmem>>, vector<8x576xf32>
    %c56_289 = arith.constant 56 : index
    %c0_290 = arith.constant 0 : index
    %384 = vector.load %arg19[%c56_289, %c0_290] : memref<144x576xf32, #tpu.memory_space<vmem>>, vector<8x576xf32>
    tpu.vector_store %arg19[%c56_289, %c0_290], %383 {strides = array<i32>} : memref<144x576xf32, #tpu.memory_space<vmem>>, vector<8x576xf32>,
    %c0_291 = arith.constant 0 : index
    %c49_292 = arith.constant 49 : index
    %385 = vector.load %arg18[%c0_291, %c49_292] : memref<16x640xf32, #tpu.memory_space<vmem>>, vector<8x576xf32>
    %cst_293 = arith.constant 0.000000e+00 : f32
    %386 = vector.shape_cast %334 : vector<1x576xi1> to vector<1x576xi1>
    %387 = vector.broadcast %386 : vector<1x576xi1> to vector<8x576xi1>
    %388 = vector.broadcast %cst_293 : f32 to vector<8x576xf32>
    %389 = arith.select %387, %388, %385 : vector<8x576xi1>, vector<8x576xf32>
    %c64_294 = arith.constant 64 : index
    %c0_295 = arith.constant 0 : index
    %390 = vector.load %arg19[%c64_294, %c0_295] : memref<144x576xf32, #tpu.memory_space<vmem>>, vector<8x576xf32>
    tpu.vector_store %arg19[%c64_294, %c0_295], %389 {strides = array<i32>} : memref<144x576xf32, #tpu.memory_space<vmem>>, vector<8x576xf32>,
    %c0_296 = arith.constant 0 : index
    %c0_297 = arith.constant 0 : index
    %391 = vector.load %arg19[%c0_296, %c0_297] : memref<144x576xf32, #tpu.memory_space<vmem>>, vector<72x576xf32>
    %c0_298 = arith.constant 0 : index
    %c0_299 = arith.constant 0 : index
    %392 = vector.load %arg9[%c0_298, %c0_299] : memref<16x72xf32, #tpu.memory_space<vmem>>, vector<16x72xf32>
    %cst_300 = arith.constant dense<0.000000e+00> : vector<16x576xf32>
    %393 = tpu.matmul %392, %391, %cst_300 {dimension_numbers = #tpu.dot_dimension_numbers<[1], [0], [0], [1], [0, 0, 1, 1], [], []>} : vector<16x72xf32>, vector<72x576xf32>, vector<16x576xf32> -> vector<16x576xf32>
    %c0_301 = arith.constant 0 : index
    %c0_302 = arith.constant 0 : index
    %394 = vector.load %arg10[%c0_301, %c0_302] : memref<16x1xf32, #tpu.memory_space<vmem>>, vector<16x1xf32>
    %395 = vector.broadcast %394 : vector<16x1xf32> to vector<16x576xf32>
    %396 = arith.addf %393, %395 : vector<16x576xf32>
    %cst_303 = arith.constant 0.000000e+00 : f32
    %397 = vector.broadcast %cst_303 : f32 to vector<16x576xf32>
    %398 = arith.maximumf %396, %397 : vector<16x576xf32>
    %cst_304 = arith.constant 0.000000e+00 : f32
    %399 = vector.shape_cast %345 : vector<1x576xi1> to vector<1x576xi1>
    %400 = vector.broadcast %399 : vector<1x576xi1> to vector<16x576xi1>
    %401 = vector.broadcast %cst_304 : f32 to vector<16x576xf32>
    %402 = arith.select %400, %401, %398 : vector<16x576xi1>, vector<16x576xf32>
    %403 = tpu.iota {dimensions = array<i32: 1>} : vector<1x576xi32>
    %c15_i32_305 = arith.constant 15 : i32
    %404 = vector.broadcast %c15_i32_305 : i32 to vector<1x576xi32>
    %405 = arith.andi %403, %404 : vector<1x576xi32>
    %c4_i32_306 = arith.constant 4 : i32
    %406 = vector.broadcast %c4_i32_306 : i32 to vector<1x576xi32>
    %407 = arith.shrsi %403, %406 : vector<1x576xi32>
    %c0_i32_307 = arith.constant 0 : i32
    %408 = vector.broadcast %c0_i32_307 : i32 to vector<1x576xi32>
    %409 = arith.cmpi eq, %405, %408 : vector<1x576xi32>
    %c15_i32_308 = arith.constant 15 : i32
    %410 = vector.broadcast %c15_i32_308 : i32 to vector<1x576xi32>
    %411 = arith.cmpi eq, %405, %410 : vector<1x576xi32>
    %c0_i32_309 = arith.constant 0 : i32
    %412 = vector.broadcast %c0_i32_309 : i32 to vector<1x576xi32>
    %413 = arith.cmpi eq, %407, %412 : vector<1x576xi32>
    %c17_i32_310 = arith.constant 17 : i32
    %414 = vector.broadcast %c17_i32_310 : i32 to vector<1x576xi32>
    %415 = arith.cmpi eq, %407, %414 : vector<1x576xi32>
    %416 = arith.ori %413, %415 : vector<1x576xi1>
    %c18_i32_311 = arith.constant 18 : i32
    %417 = vector.broadcast %c18_i32_311 : i32 to vector<1x576xi32>
    %418 = arith.cmpi eq, %407, %417 : vector<1x576xi32>
    %419 = arith.ori %416, %418 : vector<1x576xi1>
    %c35_i32_312 = arith.constant 35 : i32
    %420 = vector.broadcast %c35_i32_312 : i32 to vector<1x576xi32>
    %421 = arith.cmpi eq, %407, %420 : vector<1x576xi32>
    %422 = arith.ori %419, %421 : vector<1x576xi1>
    %cst_313 = arith.constant 0.000000e+00 : f32
    %423 = vector.broadcast %cst_313 : f32 to vector<16x640xf32>
    %c0_314 = arith.constant 0 : index
    %c0_315 = arith.constant 0 : index
    %424 = vector.load %arg18[%c0_314, %c0_315] : memref<16x640xf32, #tpu.memory_space<vmem>>, vector<16x640xf32>
    tpu.vector_store %arg18[%c0_314, %c0_315], %423 {strides = array<i32>} : memref<16x640xf32, #tpu.memory_space<vmem>>, vector<16x640xf32>,
    %c0_316 = arith.constant 0 : index
    %c32_317 = arith.constant 32 : index
    %425 = vector.load %arg18[%c0_316, %c32_317] : memref<16x640xf32, #tpu.memory_space<vmem>>, vector<16x576xf32>
    tpu.vector_store %arg18[%c0_316, %c32_317], %402 {strides = array<i32>} : memref<16x640xf32, #tpu.memory_space<vmem>>, vector<16x576xf32>,
    %c0_318 = arith.constant 0 : index
    %c15_319 = arith.constant 15 : index
    %426 = vector.load %arg18[%c0_318, %c15_319] : memref<16x640xf32, #tpu.memory_space<vmem>>, vector<16x576xf32>
    %cst_320 = arith.constant 0.000000e+00 : f32
    %427 = vector.shape_cast %409 : vector<1x576xi1> to vector<1x576xi1>
    %428 = vector.broadcast %427 : vector<1x576xi1> to vector<16x576xi1>
    %429 = vector.broadcast %cst_320 : f32 to vector<16x576xf32>
    %430 = arith.select %428, %429, %426 : vector<16x576xi1>, vector<16x576xf32>
    %c0_321 = arith.constant 0 : index
    %c0_322 = arith.constant 0 : index
    %431 = vector.load %arg19[%c0_321, %c0_322] : memref<144x576xf32, #tpu.memory_space<vmem>>, vector<16x576xf32>
    tpu.vector_store %arg19[%c0_321, %c0_322], %430 {strides = array<i32>} : memref<144x576xf32, #tpu.memory_space<vmem>>, vector<16x576xf32>,
    %c0_323 = arith.constant 0 : index
    %c16_324 = arith.constant 16 : index
    %432 = vector.load %arg18[%c0_323, %c16_324] : memref<16x640xf32, #tpu.memory_space<vmem>>, vector<16x576xf32>
    %c16_325 = arith.constant 16 : index
    %c0_326 = arith.constant 0 : index
    %433 = vector.load %arg19[%c16_325, %c0_326] : memref<144x576xf32, #tpu.memory_space<vmem>>, vector<16x576xf32>
    tpu.vector_store %arg19[%c16_325, %c0_326], %432 {strides = array<i32>} : memref<144x576xf32, #tpu.memory_space<vmem>>, vector<16x576xf32>,
    %c0_327 = arith.constant 0 : index
    %c17_328 = arith.constant 17 : index
    %434 = vector.load %arg18[%c0_327, %c17_328] : memref<16x640xf32, #tpu.memory_space<vmem>>, vector<16x576xf32>
    %cst_329 = arith.constant 0.000000e+00 : f32
    %435 = vector.shape_cast %411 : vector<1x576xi1> to vector<1x576xi1>
    %436 = vector.broadcast %435 : vector<1x576xi1> to vector<16x576xi1>
    %437 = vector.broadcast %cst_329 : f32 to vector<16x576xf32>
    %438 = arith.select %436, %437, %434 : vector<16x576xi1>, vector<16x576xf32>
    %c32_330 = arith.constant 32 : index
    %c0_331 = arith.constant 0 : index
    %439 = vector.load %arg19[%c32_330, %c0_331] : memref<144x576xf32, #tpu.memory_space<vmem>>, vector<16x576xf32>
    tpu.vector_store %arg19[%c32_330, %c0_331], %438 {strides = array<i32>} : memref<144x576xf32, #tpu.memory_space<vmem>>, vector<16x576xf32>,
    %c0_332 = arith.constant 0 : index
    %c31_333 = arith.constant 31 : index
    %440 = vector.load %arg18[%c0_332, %c31_333] : memref<16x640xf32, #tpu.memory_space<vmem>>, vector<16x576xf32>
    %cst_334 = arith.constant 0.000000e+00 : f32
    %441 = vector.shape_cast %409 : vector<1x576xi1> to vector<1x576xi1>
    %442 = vector.broadcast %441 : vector<1x576xi1> to vector<16x576xi1>
    %443 = vector.broadcast %cst_334 : f32 to vector<16x576xf32>
    %444 = arith.select %442, %443, %440 : vector<16x576xi1>, vector<16x576xf32>
    %c48_335 = arith.constant 48 : index
    %c0_336 = arith.constant 0 : index
    %445 = vector.load %arg19[%c48_335, %c0_336] : memref<144x576xf32, #tpu.memory_space<vmem>>, vector<16x576xf32>
    tpu.vector_store %arg19[%c48_335, %c0_336], %444 {strides = array<i32>} : memref<144x576xf32, #tpu.memory_space<vmem>>, vector<16x576xf32>,
    %c0_337 = arith.constant 0 : index
    %c32_338 = arith.constant 32 : index
    %446 = vector.load %arg18[%c0_337, %c32_338] : memref<16x640xf32, #tpu.memory_space<vmem>>, vector<16x576xf32>
    %c64_339 = arith.constant 64 : index
    %c0_340 = arith.constant 0 : index
    %447 = vector.load %arg19[%c64_339, %c0_340] : memref<144x576xf32, #tpu.memory_space<vmem>>, vector<16x576xf32>
    tpu.vector_store %arg19[%c64_339, %c0_340], %446 {strides = array<i32>} : memref<144x576xf32, #tpu.memory_space<vmem>>, vector<16x576xf32>,
    %c0_341 = arith.constant 0 : index
    %c33_342 = arith.constant 33 : index
    %448 = vector.load %arg18[%c0_341, %c33_342] : memref<16x640xf32, #tpu.memory_space<vmem>>, vector<16x576xf32>
    %cst_343 = arith.constant 0.000000e+00 : f32
    %449 = vector.shape_cast %411 : vector<1x576xi1> to vector<1x576xi1>
    %450 = vector.broadcast %449 : vector<1x576xi1> to vector<16x576xi1>
    %451 = vector.broadcast %cst_343 : f32 to vector<16x576xf32>
    %452 = arith.select %450, %451, %448 : vector<16x576xi1>, vector<16x576xf32>
    %c80_344 = arith.constant 80 : index
    %c0_345 = arith.constant 0 : index
    %453 = vector.load %arg19[%c80_344, %c0_345] : memref<144x576xf32, #tpu.memory_space<vmem>>, vector<16x576xf32>
    tpu.vector_store %arg19[%c80_344, %c0_345], %452 {strides = array<i32>} : memref<144x576xf32, #tpu.memory_space<vmem>>, vector<16x576xf32>,
    %c0_346 = arith.constant 0 : index
    %c47_347 = arith.constant 47 : index
    %454 = vector.load %arg18[%c0_346, %c47_347] : memref<16x640xf32, #tpu.memory_space<vmem>>, vector<16x576xf32>
    %cst_348 = arith.constant 0.000000e+00 : f32
    %455 = vector.shape_cast %409 : vector<1x576xi1> to vector<1x576xi1>
    %456 = vector.broadcast %455 : vector<1x576xi1> to vector<16x576xi1>
    %457 = vector.broadcast %cst_348 : f32 to vector<16x576xf32>
    %458 = arith.select %456, %457, %454 : vector<16x576xi1>, vector<16x576xf32>
    %c96_349 = arith.constant 96 : index
    %c0_350 = arith.constant 0 : index
    %459 = vector.load %arg19[%c96_349, %c0_350] : memref<144x576xf32, #tpu.memory_space<vmem>>, vector<16x576xf32>
    tpu.vector_store %arg19[%c96_349, %c0_350], %458 {strides = array<i32>} : memref<144x576xf32, #tpu.memory_space<vmem>>, vector<16x576xf32>,
    %c0_351 = arith.constant 0 : index
    %c48_352 = arith.constant 48 : index
    %460 = vector.load %arg18[%c0_351, %c48_352] : memref<16x640xf32, #tpu.memory_space<vmem>>, vector<16x576xf32>
    %c112_353 = arith.constant 112 : index
    %c0_354 = arith.constant 0 : index
    %461 = vector.load %arg19[%c112_353, %c0_354] : memref<144x576xf32, #tpu.memory_space<vmem>>, vector<16x576xf32>
    tpu.vector_store %arg19[%c112_353, %c0_354], %460 {strides = array<i32>} : memref<144x576xf32, #tpu.memory_space<vmem>>, vector<16x576xf32>,
    %c0_355 = arith.constant 0 : index
    %c49_356 = arith.constant 49 : index
    %462 = vector.load %arg18[%c0_355, %c49_356] : memref<16x640xf32, #tpu.memory_space<vmem>>, vector<16x576xf32>
    %cst_357 = arith.constant 0.000000e+00 : f32
    %463 = vector.shape_cast %411 : vector<1x576xi1> to vector<1x576xi1>
    %464 = vector.broadcast %463 : vector<1x576xi1> to vector<16x576xi1>
    %465 = vector.broadcast %cst_357 : f32 to vector<16x576xf32>
    %466 = arith.select %464, %465, %462 : vector<16x576xi1>, vector<16x576xf32>
    %c128_358 = arith.constant 128 : index
    %c0_359 = arith.constant 0 : index
    %467 = vector.load %arg19[%c128_358, %c0_359] : memref<144x576xf32, #tpu.memory_space<vmem>>, vector<16x576xf32>
    tpu.vector_store %arg19[%c128_358, %c0_359], %466 {strides = array<i32>} : memref<144x576xf32, #tpu.memory_space<vmem>>, vector<16x576xf32>,
    %c0_360 = arith.constant 0 : index
    %c0_361 = arith.constant 0 : index
    %468 = vector.load %arg19[%c0_360, %c0_361] : memref<144x576xf32, #tpu.memory_space<vmem>>, vector<144x576xf32>
    %c0_362 = arith.constant 0 : index
    %c0_363 = arith.constant 0 : index
    %469 = vector.load %arg11[%c0_362, %c0_363] : memref<1x144xf32, #tpu.memory_space<vmem>>, vector<1x144xf32>
    %cst_364 = arith.constant dense<0.000000e+00> : vector<1x576xf32>
    %470 = tpu.matmul %469, %468, %cst_364 {dimension_numbers = #tpu.dot_dimension_numbers<[1], [0], [0], [1], [0, 0, 1, 1], [], []>} : vector<1x144xf32>, vector<144x576xf32>, vector<1x576xf32> -> vector<1x576xf32>
    %c0_365 = arith.constant 0 : index
    %c0_366 = arith.constant 0 : index
    %471 = vector.load %arg12[%c0_365, %c0_366] : memref<1x1xf32, #tpu.memory_space<vmem>>, vector<1x1xf32>
    %472 = vector.broadcast %471 : vector<1x1xf32> to vector<1x576xf32>
    %473 = arith.addf %470, %472 : vector<1x576xf32>
    %474 = arith.negf %473 : vector<1x576xf32>
    %475 = math.exp %474 : vector<1x576xf32>
    %cst_367 = arith.constant 1.000000e+00 : f32
    %476 = vector.broadcast %cst_367 : f32 to vector<1x576xf32>
    %477 = arith.addf %476, %475 : vector<1x576xf32>
    %478 = arith.divf %476, %477 : vector<1x576xf32>
    %cst_368 = arith.constant 0.000000e+00 : f32
    %479 = vector.broadcast %cst_368 : f32 to vector<1x576xf32>
    %480 = arith.select %422, %479, %478 : vector<1x576xi1>, vector<1x576xf32>
    %481 = vector.extract_strided_slice %480 {offsets = [0, 16], sizes = [1, 256], strides = [1, 1]} : vector<1x576xf32> to vector<1x256xf32>
    %c0_369 = arith.constant 0 : index
    %c0_370 = arith.constant 0 : index
    %482 = vector.load %arg17[%c0_369, %c0_370] : memref<1x512xf32, #tpu.memory_space<vmem>>, vector<1x256xf32>
    tpu.vector_store %arg17[%c0_369, %c0_370], %481 {strides = array<i32>} : memref<1x512xf32, #tpu.memory_space<vmem>>, vector<1x256xf32>,
    %483 = vector.extract_strided_slice %480 {offsets = [0, 304], sizes = [1, 256], strides = [1, 1]} : vector<1x576xf32> to vector<1x256xf32>
    %c0_371 = arith.constant 0 : index
    %c256 = arith.constant 256 : index
    %484 = vector.load %arg17[%c0_371, %c256] : memref<1x512xf32, #tpu.memory_space<vmem>>, vector<1x256xf32>
    tpu.vector_store %arg17[%c0_371, %c256], %483 {strides = array<i32>} : memref<1x512xf32, #tpu.memory_space<vmem>>, vector<1x256xf32>,
    return
  }
}

</mosaic_0001>

<bundles_post_ra>
// kernel: model_forward.1
= control target key start
LH: loop header
LB: loop body
LE: loop exit
PB: predicated region body
PF: predicated region fallthrough
CT: control target
= control target key end

     0   :  { %s8227_s0 = inlined_call_operand.vmem [shape: f32[1,512], index: 0, kind: input, shape index: {}]   ;;  %s8228_s1 = inlined_call_operand.vmem [shape: f32[16,9], index: 1, kind: input, shape index: {}]   ;;  %s8229_s2 = inlined_call_operand.vmem [shape: f32[16,1], index: 2, kind: input, shape index: {}]   ;;  %s8230_s3 = inlined_call_operand.vmem [shape: f32[8,144], index: 3, kind: input, shape index: {}]   ;;  %s8231_s4 = inlined_call_operand.vmem [shape: f32[8,1], index: 4, kind: input, shape index: {}]   ;;  %s8232_s5 = inlined_call_operand.vmem [shape: f32[8,72], index: 5, kind: input, shape index: {}]   ;;  %s8233_s6 = inlined_call_operand.vmem [shape: f32[8,1], index: 6, kind: input, shape index: {}]   ;;  %s8234_s7 = inlined_call_operand.vmem [shape: f32[8,72], index: 7, kind: input, shape index: {}]   ;;  %s8235_s8 = inlined_call_operand.vmem [shape: f32[8,1], index: 8, kind: input, shape index: {}]   ;;  %s8236_s9 = inlined_call_operand.vmem [shape: f32[16,72], index: 9, kind: input, shape index: {}]   ;;  %s8237_s10 = inlined_call_operand.vmem [shape: f32[16,1], index: 10, kind: input, shape index: {}]   ;;  %s8238_s11 = inlined_call_operand.vmem [shape: f32[1,144], index: 11, kind: input, shape index: {}]   ;;  %s8239_s12 = inlined_call_operand.<no memory space> [shape: f32[1,1], index: 12, kind: input, shape index: {}]   ;;  %s8240_s13 = inlined_call_operand.vmem [shape: f32[576,160], index: 13, kind: input, shape index: {}]   ;;  %s8241_s14 = inlined_call_operand.hbm [shape: f32[160,48], index: 14, kind: input, shape index: {}]   ;;  %s8242_s15 = inlined_call_operand.hbm [shape: f32[48,160], index: 15, kind: input, shape index: {}]   ;;  %s8243_s16 = inlined_call_operand.hbm [shape: f32[160,576], index: 16, kind: input, shape index: {}]   ;;  %s8244_s17 = inlined_call_operand.vmem [shape: f32[1,512], index: 17, kind: output, shape index: {}]  }
   0x1   :  { %8333 = sst [smem:[#allocation29_spill]] %s8227_s0  ;;  %v22_v0 = vstv %s8239_s12 }
   0x2   :  { %8334 = sst [smem:[#allocation30_spill]] %s8228_s1  ;;  %23 = vst [vmem:[#allocation4] sm:$0x1] %v22_v0 }
   0x3   :  { %24 = vsyncpa [#allocation6], 0 }
   0x4   :  { %25 = vsyncpa [#allocation8], 0  ;;  %s5547_s26 = smov [#allocation7]  }
   0x5   :  { %s71_s27 = sshll.u32 %s5547_s26, 4  ;;  %s72_s27 = int_to_ptr.vmem [resolvable:$true] %s71_s27 }
   0x6   :  { %s5491_s28 = scalar_lea.vmem %s72_s27, 1536  ;;  %p5496_p1 = scmp.lt.s32.totalorder %s72_s27, %s72_s27 }
   0x7   :  { %p5492_p0 = scmp.ne.s32.totalorder %s72_s27, %s5491_s28  ;;  %p5497_p2 = scmp.lt.s32.totalorder %s5491_s28, %s5491_s28 }
   0x9   :  { %p5498_p3 = por %p5497_p2, %p5496_p1 }
   0xb   :  { %p5499_p4 = pnand %p5498_p3, %p5492_p0 }
   0xd   :  { %5502 = shalt.err (!%p5499_p4)
}
   0xe   :  { %s5548_s29 = smov 256   ;;  %s5549_s0 = smov 16  }
   0xf   :  { %77 = dma.hbm_to_vmem [thread:$0]  %s8242_s15, 1536, %s72_s27, [#allocation8], %s5548_s29, %s5548_s29, %s5549_s0  }
  0x10   :  { %s5550_s12 = smov [#allocation5]  }
  0x11   :  { %s59_s19 = sshll.u32 %s5550_s12, 4  ;;  %s60_s19 = int_to_ptr.vmem [resolvable:$true] %s59_s19 }
  0x12   :  { %s5511_s1 = scalar_lea.vmem %s60_s19, 2560  ;;  %p5516_p6 = scmp.lt.s32.totalorder %s60_s19, %s60_s19 }
  0x13   :  { %p5512_p5 = scmp.ne.s32.totalorder %s60_s19, %s5511_s1  ;;  %p5517_p7 = scmp.lt.s32.totalorder %s5511_s1, %s5511_s1 }
  0x15   :  { %p5518_p8 = por %p5517_p7, %p5516_p6 }
  0x17   :  { %p5519_p9 = pnand %p5518_p8, %p5512_p5 }
  0x19   :  { %5522 = shalt.err (!%p5519_p9)
}
  0x1a   :  { %s5551_s20 = smov 128   ;;  %s5552_s21 = smov 8  }
  0x1b   :  { %65 = dma.hbm_to_vmem [thread:$0]  %s8241_s14, 2560, %s60_s19, [#allocation6], %s5551_s20, %s5551_s20, %s5552_s21  }
  0x1c   :  { %s5553_s24 = smov [#allocation9]  }
  0x1d   :  { %s83_s25 = sshll.u32 %s5553_s24, 4  ;;  %s84_s25 = int_to_ptr.vmem [resolvable:$true] %s83_s25 }
  0x1e   :  { %s5531_s15 = scalar_lea.vmem %s84_s25, 12800  ;;  %p5536_p11 = scmp.lt.s32.totalorder %s84_s25, %s84_s25 }
  0x1f   :  { %p5532_p10 = scmp.ne.s32.totalorder %s84_s25, %s5531_s15  ;;  %p5537_p12 = scmp.lt.s32.totalorder %s5531_s15, %s5531_s15 }
  0x21   :  { %p5538_p13 = por %p5537_p12, %p5536_p11 }
  0x23   :  { %p5539_p0 = pnand %p5538_p13, %p5532_p10 }
  0x25   :  { %5542 = shalt.err (!%p5539_p0)
}
  0x26   :  { %s5554_s26 = smov 640   ;;  %s5555_s27 = smov 40  }
  0x27   :  { %89 = dma.hbm_to_vmem [thread:$0]  %s8243_s16, 12800, %s84_s25, [#allocation8], %s5554_s26, %s5554_s26, %s5555_s27  }
  0x28   :  { %5543 = dma.done.wait [#allocation6], 2560  }
  0x29   :  { %5544 = vsyncadd [#allocation6], 4294964736 }
  0x2a   :  { %5545 = dma.done.wait [#allocation8], 14336  }
  0x2b   :  { %5546 = vsyncadd [#allocation8], 4294952960  ;;  %v5556_v1 = vmov 0.0   ;;  %s8335_s0 = sld [smem:[#allocation29_spill]]  ;;  %s5557_s30 = smov 48   ;;  %v8313_v3 = vlaneseq  ;;  %vm8249_vm2 = vcmask 392192  }
  0x2c   :  { %161 = vst [vmem:[#allocation2] sm:$0xff] %v5556_v1  ;;  %162 = vst [vmem:[#allocation2 + $0x8] sm:$0xff] %v5556_v1  ;;  %930 = vmatprep.mubr.f32.mxu1 %v5556_v1  ;;  %s5558_s18 = smov 80   ;;  %vm8253_vm6 = vcmask 654336   ;;  %s5559_s12 = smov 79   ;;  %vm8248_vm8 = vcmask 646144  }
  0x2d   :  { %163 = vst [vmem:[#allocation2 + $0x10] sm:$0xff] %v5556_v1  ;;  %164 = vst [vmem:[#allocation2 + $0x18] sm:$0xff] %v5556_v1  ;;  %vm179_vm0 = vcmp.ge.s32.totalorder %v8313_v3, 48  ;;  %vm180_vm1 = vcmp.lt.s32.totalorder %v8313_v3, 304  ;;  %vm191_vm4 = vcmp.ge.s32.totalorder %v8313_v3, 80  ;;  %vm192_vm5 = vcmp.lt.s32.totalorder %v8313_v3, 336 }
  0x2e   :  { %165 = vst [vmem:[#allocation2 + $0x20] sm:$0xff] %v5556_v1  ;;  %1130 = vst [vmem:[#allocation2 + $0x28] sm:$0xff] %v5556_v1  ;;  %v5706_v11 = vshrl.u32 %v8313_v3, 7  ;;  %s8268_s19 = smov 113   ;;  %s5561_s1 = smov 111   ;;  %vm8246_vm14 = vcmask 924672  }
  0x2f   :  { %1134 = vst [vmem:[#allocation2 + $0x48] sm:$0xff] %v5556_v1  ;;  %1780 = vst [vmem:[#allocation2 + $0x30] sm:$0xff] %v5556_v1  ;;  %s5562_s20 = smov 97   ;;  %s5563_s21 = smov 95  }
  0x30   :  { %vm181_vm3 = vmand %vm179_vm0, %vm180_vm1  ;;  %v5709_v12 = vsub.s32 2, %v5706_v11  ;;  %v5712_v13 = vsub.s32 0, %v5706_v11  ;;  %v5717_v19 = vsub.s32 4, %v5706_v11  ;;  %v5720_v20 = vsub.s32 1, %v5706_v11  ;;  %s5564_s22 = smov 81   ;;  %s5565_s23 = smov 112  }
  0x31   :  { %v99_v2 = vld [vmem:[%s8335_s0] sm:$0xf]  ;;  %vm193_vm7 = vmand %vm191_vm4, %vm192_vm5  ;;  %v5725_v23 = vsub.s32 3, %v5706_v11  ;;  %s5566_s24 = smov 96   ;;  %vm5886_vm1 = vcmp.lt.s32.totalorder %v8313_v3, 576  ;;  %s8359_s29 = sld [smem:[#allocation30_spill]] }
  0x32   :  { %172 = vrot.lane.b32.xlu0 %v99_v2, %s5557_s30  ;;  %s5569_s0 = smov 32   ;;  %s5570_s30 = smov 127  }
  0x33   :  { %s5572_s25 = smov 89   ;;  %s5573_s15 = smov 103  }
  0x34   :  { %s5574_s26 = smov 104   ;;  %s5575_s27 = smov 105  }
  0x35   :  { %s5579_s28 = smov 93   ;;  %s5583_s16 = smov 101  }
  0x36   :  { %184 = vrot.lane.b32.xlu0 %v99_v2, %s5558_s18 }
  0xa4   :  { %v173_v4 = vpop.permute.xlu0 %172 }
  0xa5   :  { %v174_v5 = vrot.slane %v173_v4, 7 }
  0xa7   :  { %v176_v6 = vsel %vm8249_vm2, %v174_v5, %v173_v4  ;;  %vm8252_vm2 = vcmask 662528  }
  0xa8   :  { %182 = vst.msk [vmem:[#allocation2] ss:$8 sm:$0x7] %vm181_vm3, %v176_v6  ;;  %v185_v7 = vpop.permute.xlu0 %184 }
  0xa9   :  { %v186_v8 = vrot.slane %v185_v7, 1  ;;  %v187_v9 = vrot.slane %v185_v7, 2 }
  0xab   :  { %v189_v10 = vsel %vm8253_vm6, %v186_v8, %v187_v9 }
  0xac   :  { %195 = vst.msk [vmem:[#allocation2 + $0x10] ss:$8 sm:$0x7] %vm193_vm7, %v189_v10  ;;  %vm8247_vm7 = vcmask 908288  }
  0xb3   :  { %v722_v14 = vld [vmem:[#allocation2] ss:$8 sm:$0xf] }
  0xb4   :  { %v723_v15 = vld [vmem:[#allocation2] ss:$8 sm:$0x10] }
  0xb5   :  { %v724_v16 = vor.u32 %v723_v15, %v722_v14  ;;  %v197_v21 = vld [vmem:[#allocation2] ss:$8 sm:$0xf] }
  0xb6   :  { %v198_v22 = vld [vmem:[#allocation2] ss:$8 sm:$0x10]  ;;  %v832_v15 = vld [vmem:[%s8229_s2 + $0x8] sm:$0xff] }
  0xb7   :  { %v737_v17 = vrot.slane %v724_v16, %v5709_v12  ;;  %v729_v18 = vrot.slane %v724_v16, %v5712_v13  ;;  %v309_v24 = vld [vmem:[#allocation2] ss:$8 sm:$0xf]  ;;  %v745_v34 = vrot.slane %v724_v16, %v5717_v19  ;;  %v733_v35 = vrot.slane %v724_v16, %v5720_v20 }
  0xb8   :  { %v310_v25 = vld [vmem:[#allocation2] ss:$8 sm:$0x10]  ;;  %v199_v36 = vor.u32 %v198_v22, %v197_v21  ;;  %v741_v41 = vrot.slane %v724_v16, %v5725_v23  ;;  %v5567_v16 = vmov 0  }
  0xb9   :  { %750 = vrot.lane.b32.xlu0 %v737_v17, %s5559_s12  ;;  %746 = vrot.lane.b32.xlu1 %v729_v18, %s5559_s12  ;;  %v406_v26 = vld [vmem:[#allocation2] ss:$8 sm:$0xf]  ;;  %v311_v45 = vor.u32 %v310_v25, %v309_v24  ;;  %v5814_v17 = vand.u32 127, %v8313_v3 }
  0xba   :  { %v407_v27 = vld [vmem:[#allocation2] ss:$8 sm:$0x10]  ;;  %v208_v42 = vrot.slane %v199_v36, %v5720_v20  ;;  %v216_v43 = vrot.slane %v199_v36, %v5725_v23  ;;  %v204_v44 = vrot.slane %v199_v36, %v5712_v13  ;;  %v212_v47 = vrot.slane %v199_v36, %v5709_v12  ;;  %5223 = vset.pattern.permute.xlu1 %v5567_v16 }
  0xbb   :  { %v516_v28 = vld [vmem:[#allocation2] ss:$8 sm:$0xf]  ;;  %v316_v46 = vrot.slane %v311_v45, %v5712_v13  ;;  %v324_v48 = vrot.slane %v311_v45, %v5709_v12  ;;  %v220_v49 = vrot.slane %v199_v36, %v5717_v19  ;;  %v332_v50 = vrot.slane %v311_v45, %v5717_v19  ;;  %5224 = vset.pattern.permute.xlu0 %v5567_v16 }
  0xbc   :  { %v517_v29 = vld [vmem:[#allocation2] ss:$8 sm:$0x10]  ;;  %v320_v51 = vrot.slane %v311_v45, %v5720_v20  ;;  %v408_v52 = vor.u32 %v407_v27, %v406_v26  ;;  %v328_v54 = vrot.slane %v311_v45, %v5725_v23  ;;  %v5817_v18 = vadd.s32 128, %v5814_v17 }
  0xbd   :  { %v613_v30 = vld [vmem:[#allocation2] ss:$8 sm:$0xf]  ;;  %754 = vrot.lane.b32.xlu0 %v745_v34, %s5559_s12  ;;  %748 = vrot.lane.b32.xlu1 %v733_v35, %s5559_s12  ;;  %v518_v57 = vor.u32 %v517_v29, %v516_v28  ;;  %v106_v21 = vand.u32 15, %v5814_v17  ;;  %v5828_v24 = vadd.s32 384, %v5814_v17 }
  0xbe   :  { %v614_v31 = vld [vmem:[#allocation2] ss:$8 sm:$0x10]  ;;  %v417_v53 = vrot.slane %v408_v52, %v5720_v20  ;;  %v425_v55 = vrot.slane %v408_v52, %v5725_v23  ;;  %v413_v56 = vrot.slane %v408_v52, %v5712_v13  ;;  %v421_v59 = vrot.slane %v408_v52, %v5709_v12 }
  0xbf   :  { %v5727_v32 = vld [vmem:[#allocation2] ss:$8 sm:$0xf]  ;;  %v523_v58 = vrot.slane %v518_v57, %v5712_v13  ;;  %v531_v60 = vrot.slane %v518_v57, %v5709_v12  ;;  %v429_v61 = vrot.slane %v408_v52, %v5717_v19  ;;  %v539_v62 = vrot.slane %v518_v57, %v5717_v19 }
  0xc0   :  { %v5729_v33 = vld [vmem:[#allocation2] ss:$8 sm:$0x10]  ;;  %v527_v63 = vrot.slane %v518_v57, %v5720_v20  ;;  %v615_v0 = vor.u32 %v614_v31, %v613_v30  ;;  %v535_v4 = vrot.slane %v518_v57, %v5725_v23  ;;  %v107_v22 = vand.u32 15, %v5817_v18 }
  0xc1   :  { %v5733_v37 = vld [vmem:[#allocation2] ss:$8 sm:$0xf]  ;;  %752 = vrot.lane.b32.xlu1 %v741_v41, %s5559_s12  ;;  %223 = vrot.lane.b32.xlu0 %v208_v42, %s8268_s19  ;;  %v298_v7 = vor.u32 %v5729_v33, %v5727_v32  ;;  %v5568_v27 = vmov 1966171168   ;;  %vm5831_vm9 = vcmp.eq.s32.totalorder %v106_v21, 15 }
  0xc2   :  { %v5735_v38 = vld [vmem:[#allocation2] ss:$8 sm:$0x10]  ;;  %v624_v2 = vrot.slane %v615_v0, %v5720_v20  ;;  %v632_v5 = vrot.slane %v615_v0, %v5725_v23  ;;  %v620_v6 = vrot.slane %v615_v0, %v5712_v13  ;;  %v628_v8 = vrot.slane %v615_v0, %v5709_v12 }
  0xc3   :  { %v5737_v39 = vld [vmem:[#allocation2] ss:$8 sm:$0xf]  ;;  %v712_v9 = vor.u32 %v5735_v38, %v5733_v37  ;;  %v636_v10 = vrot.slane %v615_v0, %v5717_v19  ;;  %v5820_v19 = vadd.s32 512, %v5814_v17  ;;  %v5825_v23 = vadd.s32 256, %v5814_v17 }
  0xc4   :  { %v5739_v40 = vld [vmem:[#allocation2] ss:$8 sm:$0x10]  ;;  %1125 = vst [vmem:[#allocation2] sm:$0xff] %v5556_v1  ;;  %1775 = vst [vmem:[#allocation2 + $0x8] sm:$0xff] %v5556_v1  ;;  %v254_v28 = vunpack.c.l.s4 %v5568_v27  ;;  %v8336_v30 = vmov 0 }
  0xc5   :  { %1129 = vst [vmem:[#allocation2 + $0x20] sm:$0xff] %v5556_v1  ;;  %227 = vrot.lane.b32.xlu0 %v216_v43, %s8268_s19  ;;  %221 = vrot.lane.b32.xlu1 %v204_v44, %s8268_s19  ;;  %v505_v14 = vor.u32 %v5739_v40, %v5737_v39  ;;  %v831_v12 = vld [vmem:[%s8229_s2] sm:$0xff]  ;;  %v110_v29 = vand.u32 15, %v5820_v19  ;;  %v8337_v30 = vsel %vm5831_vm9, 4294967295, %v8336_v30  ;;  %vm5835_vm10 = vcmp.eq.s32.totalorder %v107_v22, 15  ;;  %s5576_s2 = smov 87  }
  0xc6   :  { %v8338_v31 = vmov 0  ;;  %v108_v32 = vand.u32 15, %v5825_v23  ;;  %v109_v33 = vand.u32 15, %v5828_v24  ;;  %v255_v36 = vunpack.c.0.s8 %v254_v28 }
  0xc7   :  { %v8339_v31 = vsel %vm5835_vm10, 4294967295, %v8338_v31  ;;  %vm5847_vm11 = vcmp.eq.s32.totalorder %v110_v29, 15  ;;  %v8340_v41 = vmov 0  ;;  %v8342_v42 = vmov 0 }
  0xc8   :  { %v8341_v41 = vsel %vm5847_vm11, 4294967295, %v8340_v41  ;;  %vm5851_vm12 = vcmp.eq.s32.totalorder %v108_v32, 15  ;;  %vm5855_vm13 = vcmp.eq.s32.totalorder %v109_v33, 15  ;;  %v8344_v43 = vmov 0 }
  0xc9   :  { %333 = vrot.lane.b32.xlu0 %v316_v46, %s5561_s1  ;;  %225 = vrot.lane.b32.xlu1 %v212_v47, %s8268_s19  ;;  %v8343_v42 = vsel %vm5851_vm12, 4294967295, %v8342_v42  ;;  %v8345_v43 = vsel %vm5855_vm13, 4294967295, %v8344_v43  ;;  %v5860_v46 = vsub.s32 %v255_v36, %v5706_v11  ;;  %vm5873_vm15 = vcmp.eq.s32.totalorder %v107_v22, 0 }
  0xca   :  { %vm5877_vm0 = vcmp.eq.s32.totalorder %v106_v21, 0  ;;  %vm5892_vm3 = vcmp.eq.s32.totalorder %v110_v29, 0  ;;  %vm5896_vm4 = vcmp.eq.s32.totalorder %v108_v32, 0  ;;  %vm5901_vm5 = vcmp.eq.s32.totalorder %v109_v33, 0 }
  0xcb   :  { %8346 = vst [vmem:[#allocation12_spill] sm:$0xff] %v5860_v46 }
  0xcd   :  { %337 = vrot.lane.b32.xlu0 %v324_v48, %s5561_s1  ;;  %229 = vrot.lane.b32.xlu1 %v220_v49, %s8268_s19  ;;  %s5580_s19 = smov 99  }
  0xd1   :  { %341 = vrot.lane.b32.xlu0 %v332_v50, %s5561_s1  ;;  %335 = vrot.lane.b32.xlu1 %v320_v51, %s5561_s1 }
  0xd5   :  { %432 = vrot.lane.b32.xlu0 %v417_v53, %s5562_s20  ;;  %339 = vrot.lane.b32.xlu1 %v328_v54, %s5561_s1 }
  0xd9   :  { %436 = vrot.lane.b32.xlu0 %v425_v55, %s5562_s20  ;;  %430 = vrot.lane.b32.xlu1 %v413_v56, %s5562_s20 }
  0xdd   :  { %540 = vrot.lane.b32.xlu0 %v523_v58, %s5563_s21  ;;  %434 = vrot.lane.b32.xlu1 %v421_v59, %s5562_s20  ;;  %v8347_v59 = vmov 0 }
  0xde   :  { %v8348_v59 = vsel %vm5873_vm15, 4294967295, %v8347_v59 }
  0xe1   :  { %544 = vrot.lane.b32.xlu0 %v531_v60, %s5563_s21  ;;  %438 = vrot.lane.b32.xlu1 %v429_v61, %s5562_s20  ;;  %v8349_v60 = vmov 0 }
  0xe2   :  { %v8350_v60 = vsel %vm5877_vm0, 4294967295, %v8349_v60 }
  0xe5   :  { %548 = vrot.lane.b32.xlu0 %v539_v62, %s5563_s21  ;;  %542 = vrot.lane.b32.xlu1 %v527_v63, %s5563_s21 }
  0xe9   :  { %639 = vrot.lane.b32.xlu0 %v624_v2, %s5564_s22  ;;  %546 = vrot.lane.b32.xlu1 %v535_v4, %s5563_s21 }
  0xed   :  { %643 = vrot.lane.b32.xlu0 %v632_v5, %s5564_s22  ;;  %637 = vrot.lane.b32.xlu1 %v620_v6, %s5564_s22  ;;  %v830_v5 = vld [vmem:[%s8359_s29 + $0x8] sm:$0xff] }
  0xf1   :  { %300 = vrot.lane.b32.xlu0 %v298_v7, %s5565_s23  ;;  %641 = vrot.lane.b32.xlu1 %v628_v8, %s5564_s22  ;;  %v8353_v7 = vmov 0 }
  0xf2   :  { %v8354_v7 = vsel %vm5892_vm3, 4294967295, %v8353_v7 }
  0xf5   :  { %714 = vrot.lane.b32.xlu0 %v712_v9, %s5558_s18  ;;  %645 = vrot.lane.b32.xlu1 %v636_v10, %s5564_s22  ;;  %v8355_v9 = vmov 0 }
  0xf6   :  { %v8356_v9 = vsel %vm5896_vm4, 4294967295, %v8355_v9 }
  0xf9   :  { %507 = vrot.lane.b32.xlu1 %v505_v14, %s5566_s24  ;;  %840 = vperm.xlu0 %5224, %v832_v15   ;;  %v8357_v14 = vmov 0 }
  0xfa   :  { %v8358_v14 = vsel %vm5901_vm5, 4294967295, %v8357_v14 }
  0xfd   :  { %835 = vperm.xlu1 %5223, %v831_v12  }
 0x12b   :  { %v751_v25 = vpop.permute.xlu0 %750  ;;  %v747_v26 = vpop.permute.xlu1 %746 }
 0x12f   :  { %v755_v34 = vpop.permute.xlu0 %754  ;;  %v749_v35 = vpop.permute.xlu1 %748 }
 0x130   :  { %v757_v37 = vsel %vm8248_vm8, %v747_v26, %v749_v35  ;;  %v758_v38 = vsel %vm8248_vm8, %v749_v35, %v751_v25  ;;  %v770_v50 = vsel %vm5847_vm11, 0.0, %v755_v34 }
 0x131   :  { %v766_v39 = vsel %vm5831_vm9, 0.0, %v757_v37  ;;  %v767_v40 = vsel %vm5835_vm10, 0.0, %v758_v38  ;;  %v798_v11 = vrot.slane %v770_v50, %v5860_v46 }
 0x132   :  { %v776_v47 = vcombine.low %v766_v39, %v767_v40 }
 0x133   :  { %v753_v44 = vpop.permute.xlu1 %752  ;;  %v224_v45 = vpop.permute.xlu0 %223  ;;  %v813_v63 = vrot.slane %v798_v11, %v5860_v46 }
 0x134   :  { %v759_v48 = vsel %vm8248_vm8, %v751_v25, %v753_v44  ;;  %v760_v49 = vsel %vm8248_vm8, %v753_v44, %v755_v34  ;;  %v784_v56 = vrot.slane %v776_v47, %v5860_v46  ;;  %vm8254_vm8 = vcmask 777216  }
 0x135   :  { %v768_v51 = vsel %vm5851_vm12, 0.0, %v759_v48  ;;  %v769_v52 = vsel %vm5855_vm13, 0.0, %v760_v49 }
 0x136   :  { %v777_v53 = vcombine.low %v768_v51, %v769_v52 }
 0x137   :  { %v228_v54 = vpop.permute.xlu0 %227  ;;  %v222_v55 = vpop.permute.xlu1 %221 }
 0x138   :  { %v791_v57 = vrot.slane %v777_v53, %v5860_v46  ;;  %v232_v2 = vsel %vm8246_vm14, %v222_v55, %v224_v45 }
 0x139   :  { %v241_v12 = vsel %vm5877_vm0, 0.0, %v232_v2 }
 0x13a   :  { %v799_v58 = vcombine.low %v784_v56, %v791_v57 }
 0x13b   :  { %v334_v61 = vpop.permute.xlu0 %333  ;;  %v226_v62 = vpop.permute.xlu1 %225 }
 0x13c   :  { %v806_v0 = vrot.slane %v799_v58, %v5860_v46  ;;  %v233_v4 = vsel %vm8246_vm14, %v224_v45, %v226_v62  ;;  %v234_v10 = vsel %vm8246_vm14, %v226_v62, %v228_v54 }
 0x13d   :  { %v242_v6 = vsel %vm5873_vm15, 0.0, %v233_v4  ;;  %v243_v26 = vsel %vm5896_vm4, 0.0, %v234_v10 }
 0x13e   :  { %v814_v8 = vcombine.low %v806_v0, %v813_v63  ;;  %v251_v21 = vcombine.low %v241_v12, %v242_v6 }
 0x13f   :  { %v338_v15 = vpop.permute.xlu0 %337  ;;  %v230_v16 = vpop.permute.xlu1 %229 }
 0x140   :  { %817 = vst.msk [vmem:[#allocation3 + $0x28] ss:$8 sm:$0xf] %vm5886_vm1, %v814_v8  ;;  %818 = vst.msk [vmem:[#allocation3 + $0x28] ss:$8 sm:$0x10] %vm5886_vm1, %v814_v8  ;;  %v235_v22 = vsel %vm8246_vm14, %v228_v54, %v230_v16  ;;  %v259_v34 = vrot.slane %v251_v21, %v5860_v46 }
 0x141   :  { %v245_v25 = vsel %vm5892_vm3, 0.0, %v230_v16  ;;  %v244_v27 = vsel %vm5901_vm5, 0.0, %v235_v22  ;;  %vm850_vm14 = vcmask 1040384  }
 0x142   :  { %v252_v28 = vcombine.low %v243_v26, %v244_v27  ;;  %v273_v29 = vrot.slane %v245_v25, %v5860_v46 }
 0x143   :  { %v342_v32 = vpop.permute.xlu0 %341  ;;  %v336_v33 = vpop.permute.xlu1 %335 }
 0x144   :  { %v266_v35 = vrot.slane %v252_v28, %v5860_v46  ;;  %v344_v36 = vsel %vm8247_vm7, %v334_v61, %v336_v33  ;;  %v345_v37 = vsel %vm8247_vm7, %v336_v33, %v338_v15  ;;  %v288_v44 = vrot.slane %v273_v29, %v5860_v46 }
 0x145   :  { %v353_v38 = vsel %vm5831_vm9, 0.0, %v344_v36  ;;  %v354_v39 = vsel %vm5835_vm10, 0.0, %v345_v37  ;;  %v357_v54 = vsel %vm5847_vm11, 0.0, %v342_v32 }
 0x146   :  { %v274_v40 = vcombine.low %v259_v34, %v266_v35  ;;  %v363_v51 = vcombine.low %v353_v38, %v354_v39  ;;  %v385_v62 = vrot.slane %v357_v54, %v5860_v46 }
 0x147   :  { %v433_v45 = vpop.permute.xlu0 %432  ;;  %v340_v47 = vpop.permute.xlu1 %339  ;;  %v825_v48 = vld [vmem:[#allocation3 + $0x30] sm:$0x1]  ;;  %v824_v49 = vld [vmem:[#allocation3 + $0x28] sm:$0x1] }
 0x148   :  { %v281_v50 = vrot.slane %v274_v40, %v5860_v46  ;;  %v346_v52 = vsel %vm8247_vm7, %v338_v15, %v340_v47  ;;  %v347_v53 = vsel %vm8247_vm7, %v340_v47, %v342_v32  ;;  %5071 = vmatprep.subr.msk.mxu1 %vm850_vm14, %v825_v48  ;;  %v371_v63 = vrot.slane %v363_v51, %v5860_v46 }
 0x149   :  { %v355_v55 = vsel %vm5851_vm12, 0.0, %v346_v52  ;;  %v356_v11 = vsel %vm5855_vm13, 0.0, %v347_v53  ;;  %5072 = vmatpush1.msk.msra.mxu1 %vm850_vm14, %v824_v49  ;;  %vm8250_vm7 = vcmask 793600   ;;  %v400_v8 = vrot.slane %v385_v62, %v5860_v46 }
 0x14a   :  { %v289_v56 = vcombine.low %v281_v50, %v288_v44  ;;  %v364_v57 = vcombine.low %v355_v55, %v356_v11 }
 0x14b   :  { %v437_v58 = vpop.permute.xlu0 %436  ;;  %v431_v61 = vpop.permute.xlu1 %430 }
 0x14c   :  { %294 = vst.msk [vmem:[#allocation3] ss:$8 sm:$0xf] %vm5886_vm1, %v289_v56  ;;  %295 = vst.msk [vmem:[#allocation3] ss:$8 sm:$0x10] %vm5886_vm1, %v289_v56  ;;  %v378_v0 = vrot.slane %v364_v57, %v5860_v46  ;;  %v441_v12 = vsel %vm8250_vm7, %v431_v61, %v433_v45 }
 0x14d   :  { %v450_v25 = vsel %vm5877_vm0, 0.0, %v441_v12 }
 0x14e   :  { %v386_v2 = vcombine.low %v371_v63, %v378_v0 }
 0x14f   :  { %v541_v4 = vpop.permute.xlu0 %540  ;;  %v435_v6 = vpop.permute.xlu1 %434 }
 0x150   :  { %v393_v10 = vrot.slane %v386_v2, %v5860_v46  ;;  %v442_v15 = vsel %vm8250_vm7, %v433_v45, %v435_v6  ;;  %v443_v22 = vsel %vm8250_vm7, %v435_v6, %v437_v58 }
 0x151   :  { %v451_v16 = vsel %vm5873_vm15, 0.0, %v442_v15  ;;  %v452_v33 = vsel %vm5896_vm4, 0.0, %v443_v22 }
 0x152   :  { %v401_v21 = vcombine.low %v393_v10, %v400_v8  ;;  %v460_v28 = vcombine.low %v450_v25, %v451_v16 }
 0x153   :  { %v545_v26 = vpop.permute.xlu0 %544  ;;  %v439_v27 = vpop.permute.xlu1 %438 }
 0x154   :  { %404 = vst.msk [vmem:[#allocation3 + $0x2] ss:$8 sm:$0xf] %vm5886_vm1, %v401_v21  ;;  %405 = vst.msk [vmem:[#allocation3 + $0x2] ss:$8 sm:$0x10] %vm5886_vm1, %v401_v21  ;;  %v444_v29 = vsel %vm8250_vm7, %v437_v58, %v439_v27  ;;  %v468_v39 = vrot.slane %v460_v28, %v5860_v46 }
 0x155   :  { %v454_v32 = vsel %vm5892_vm3, 0.0, %v439_v27  ;;  %v453_v34 = vsel %vm5901_vm5, 0.0, %v444_v29  ;;  %vm8251_vm7 = vcmask 916480  }
 0x156   :  { %v461_v35 = vcombine.low %v452_v33, %v453_v34  ;;  %v482_v36 = vrot.slane %v454_v32, %v5860_v46 }
 0x157   :  { %v549_v37 = vpop.permute.xlu0 %548  ;;  %v543_v38 = vpop.permute.xlu1 %542 }
 0x158   :  { %v475_v40 = vrot.slane %v461_v35, %v5860_v46  ;;  %v551_v44 = vsel %vm8254_vm8, %v541_v4, %v543_v38  ;;  %v552_v45 = vsel %vm8254_vm8, %v543_v38, %v545_v26  ;;  %v497_v50 = vrot.slane %v482_v36, %v5860_v46 }
 0x159   :  { %v560_v47 = vsel %vm5831_vm9, 0.0, %v551_v44  ;;  %v561_v48 = vsel %vm5835_vm10, 0.0, %v552_v45  ;;  %v564_v51 = vsel %vm5847_vm11, 0.0, %v549_v37 }
 0x15a   :  { %v483_v49 = vcombine.low %v468_v39, %v475_v40  ;;  %v570_v55 = vcombine.low %v560_v47, %v561_v48  ;;  %v592_v63 = vrot.slane %v564_v51, %v5860_v46 }
 0x15b   :  { %v640_v52 = vpop.permute.xlu0 %639  ;;  %v547_v53 = vpop.permute.xlu1 %546 }
 0x15c   :  { %v490_v54 = vrot.slane %v483_v49, %v5860_v46  ;;  %v553_v11 = vsel %vm8254_vm8, %v545_v26, %v547_v53  ;;  %v554_v56 = vsel %vm8254_vm8, %v547_v53, %v549_v37  ;;  %v578_v4 = vrot.slane %v570_v55, %v5860_v46 }
 0x15d   :  { %v562_v57 = vsel %vm5851_vm12, 0.0, %v553_v11  ;;  %v563_v58 = vsel %vm5855_vm13, 0.0, %v554_v56  ;;  %v607_v10 = vrot.slane %v592_v63, %v5860_v46 }
 0x15e   :  { %v498_v61 = vcombine.low %v490_v54, %v497_v50  ;;  %v571_v62 = vcombine.low %v562_v57, %v563_v58  ;;  %v829_v58 = vld [vmem:[%s8359_s29] sm:$0xff]  ;;  %s5581_s29 = smov 100  }
 0x15f   :  { %v644_v0 = vpop.permute.xlu0 %643  ;;  %v638_v2 = vpop.permute.xlu1 %637 }
 0x160   :  { %501 = vst.msk [vmem:[#allocation3 + $0x3] ss:$8 sm:$0xf] %vm5886_vm1, %v498_v61  ;;  %502 = vst.msk [vmem:[#allocation3 + $0x3] ss:$8 sm:$0x10] %vm5886_vm1, %v498_v61  ;;  %v585_v6 = vrot.slane %v571_v62, %v5860_v46  ;;  %v648_v21 = vsel %vm8252_vm2, %v638_v2, %v640_v52 }
 0x161   :  { %v657_v32 = vsel %vm5877_vm0, 0.0, %v648_v21  ;;  %v827_v61 = vld [vmem:[#allocation3 + $0x40] sm:$0x1]  ;;  %v826_v62 = vld [vmem:[#allocation3 + $0x38] sm:$0x1]  ;;  %v8360_v21 = vmov 0 }
 0x162   :  { %v593_v8 = vcombine.low %v578_v4, %v585_v6  ;;  %v828_v2 = vld [vmem:[#allocation3 + $0x48] sm:$0x1]  ;;  %v111_v6 = vshra.s32 %v5814_v17, 4 }
 0x163   :  { %v301_v12 = vpop.permute.xlu0 %300  ;;  %v642_v15 = vpop.permute.xlu1 %641 }
 0x164   :  { %v600_v16 = vrot.slane %v593_v8, %v5860_v46  ;;  %v302_v22 = vrot.slane %v301_v12, 1  ;;  %v649_v25 = vsel %vm8252_vm2, %v640_v52, %v642_v15  ;;  %v650_v29 = vsel %vm8252_vm2, %v642_v15, %v644_v0 }
 0x165   :  { %v658_v26 = vsel %vm5873_vm15, 0.0, %v649_v25  ;;  %v659_v38 = vsel %vm5896_vm4, 0.0, %v650_v29  ;;  %v112_v8 = vshra.s32 %v5817_v18, 4  ;;  %v114_v15 = vshra.s32 %v5828_v24, 4 }
 0x166   :  { %v608_v27 = vcombine.low %v600_v16, %v607_v10  ;;  %v304_v28 = vsel %vm8251_vm7, %v301_v12, %v302_v22  ;;  %v667_v35 = vcombine.low %v657_v32, %v658_v26  ;;  %vm8255_vm7 = vcmask 785408  }
 0x167   :  { %307 = vst.msk [vmem:[#allocation3 + $0x1] ss:$8 sm:$0xf] %vm5886_vm1, %v304_v28  ;;  %308 = vst.msk [vmem:[#allocation3 + $0x1] ss:$8 sm:$0x10] %vm5886_vm1, %v304_v28  ;;  %v715_v33 = vpop.permute.xlu0 %714  ;;  %v646_v34 = vpop.permute.xlu1 %645 }
 0x168   :  { %611 = vst.msk [vmem:[#allocation3 + $0x5] ss:$8 sm:$0xf] %vm5886_vm1, %v608_v27  ;;  %612 = vst.msk [vmem:[#allocation3 + $0x5] ss:$8 sm:$0x10] %vm5886_vm1, %v608_v27  ;;  %v651_v37 = vsel %vm8252_vm2, %v644_v0, %v646_v34  ;;  %v675_v48 = vrot.slane %v667_v35, %v5860_v46 }
 0x169   :  { %v716_v36 = vrot.slane %v715_v33, 1  ;;  %v660_v39 = vsel %vm5901_vm5, 0.0, %v651_v37  ;;  %v661_v40 = vsel %vm5892_vm3, 0.0, %v646_v34  ;;  %vm843_vm2 = vcmask 72704  }
 0x16a   :  { %v668_v45 = vcombine.low %v659_v38, %v660_v39  ;;  %v689_v50 = vrot.slane %v661_v40, %v5860_v46  ;;  %vm132_vm4 = vcmp.eq.s32.totalorder %v112_v8, 17  ;;  %v113_v10 = vshra.s32 %v5825_v23, 4 }
 0x16b   :  { %v717_v44 = vsel %vm8253_vm6, %v715_v33, %v716_v36  ;;  %v508_v47 = vpop.permute.xlu1 %507  ;;  %vm131_vm6 = vcmp.eq.s32.totalorder %v111_v6, 17  ;;  %vm151_vm3 = vcmp.eq.s32.totalorder %v111_v6, 35  ;;  %vm142_vm13 = vcmp.eq.s32.totalorder %v112_v8, 18 }
 0x16c   :  { %720 = vst.msk [vmem:[#allocation3 + $0x7] ss:$8 sm:$0xf] %vm5886_vm1, %v717_v44  ;;  %721 = vst.msk [vmem:[#allocation3 + $0x7] ss:$8 sm:$0x10] %vm5886_vm1, %v717_v44  ;;  %v682_v49 = vrot.slane %v668_v45, %v5860_v46  ;;  %v704_v55 = vrot.slane %v689_v50, %v5860_v46 }
 0x16d   :  { %v509_v51 = vrot.slane %v508_v47, 1  ;;  %vm152_vm0 = vcmp.eq.s32.totalorder %v112_v8, 35  ;;  %v8363_v29 = vmov 0  ;;  %v8366_v39 = vmov 0 }
 0x16e   :  { %v690_v52 = vcombine.low %v675_v48, %v682_v49  ;;  %v115_v40 = vshra.s32 %v5820_v19, 4  ;;  %v8369_v49 = vmov 0 }
 0x16f   :  { %v511_v53 = vsel %vm8255_vm7, %v508_v47, %v509_v51  ;;  %vm141_vm7 = vcmp.eq.s32.totalorder %v111_v6, 18 }
 0x170   :  { %514 = vst.msk [vmem:[#allocation3 + $0x4] ss:$8 sm:$0xf] %vm5886_vm1, %v511_v53  ;;  %515 = vst.msk [vmem:[#allocation3 + $0x4] ss:$8 sm:$0x10] %vm5886_vm1, %v511_v53  ;;  %v697_v54 = vrot.slane %v690_v52, %v5860_v46 }
 0x172   :  { %v705_v11 = vcombine.low %v697_v54, %v704_v55 }
 0x174   :  { %708 = vst.msk [vmem:[#allocation3 + $0x6] ss:$8 sm:$0xf] %vm5886_vm1, %v705_v11  ;;  %709 = vst.msk [vmem:[#allocation3 + $0x6] ss:$8 sm:$0x10] %vm5886_vm1, %v705_v11  ;;  %v841_v32 = vpop.permute.xlu0 %840 }
 0x175   :  { %vm126_vm1 = vcmp.eq.s32.totalorder %v111_v6, 0 }
 0x176   :  { %vm136_vm8 = vmor %vm126_vm1, %vm131_vm6  ;;  %vm128_vm6 = vcmp.eq.s32.totalorder %v113_v10, 0  ;;  %vm133_vm1 = vcmp.eq.s32.totalorder %v113_v10, 17 }
 0x177   :  { %vm146_vm5 = vmor %vm136_vm8, %vm141_vm7  ;;  %vm129_vm8 = vcmp.eq.s32.totalorder %v114_v15, 0 }
 0x178   :  { %v6058_v12 = vpop.permute.xlu1 %835  ;;  %vm138_vm7 = vmor %vm128_vm6, %vm133_vm1  ;;  %vm153_vm6 = vcmp.eq.s32.totalorder %v113_v10, 35 }
 0x17b   :  { %v820_v56 = vld [vmem:[#allocation3 + $0x8] sm:$0xff]  ;;  %v819_v57 = vld [vmem:[#allocation3] sm:$0xff]  ;;  %v822_v63 = vld [vmem:[#allocation3 + $0x18] sm:$0xff] }
 0x17c   :  { %896 = vmatprep.subr.mxu1 %v820_v56  ;;  %v821_v0 = vld [vmem:[#allocation3 + $0x10] sm:$0xff]  ;;  %v823_v4 = vld [vmem:[#allocation3 + $0x20] sm:$0xff] }
 0x17d   :  { %897 = vmatpush1.msra.mxu1 %v819_v57 }
 0x17e   :  { %5073 = vmatmul.mubr.msk.f32.vlgmr.msra.gmra.mxu1 %vm843_vm2, %v829_v58  ;;  %5075 = vmatprep.subr.msk.mxu1 %vm850_vm14, %v827_v61 }
 0x17f   :  { %5076 = vmatpush1.msk.msra.mxu1 %vm850_vm14, %v826_v62  ;;  %936 = vmatprep.mubr.f32.mxu1 %v5556_v1 }
 0x180   :  { %973 = vmatprep.subr.mxu1 %v822_v63 }
 0x181   :  { %974 = vmatpush1.msra.mxu1 %v821_v0 }
 0x182   :  { %5074 = vmatmul.mubr.msk.f32.gmra.mxu1 %vm843_vm2, %v830_v5  ;;  %5137 = vmatprep.subr.msk.mxu1 %vm850_vm14, %v828_v2 }
 0x183   :  { %1007 = vmatprep.mubr.f32.mxu1 %v5556_v1 }
 0x186   :  { %5077 = vmatmul.mubr.msk.f32.vlgmr.msra.gmra.mxu1 %vm843_vm2, %v829_v58 }
 0x187   :  { %5138 = vmatpush3.msk.msra.mxu1 %vm850_vm14, %v828_v2  ;;  %1013 = vmatprep.mubr.f32.mxu1 %v5556_v1  ;;  %vm127_vm14 = vcmp.eq.s32.totalorder %v112_v8, 0 }
 0x188   :  { %5139 = vmatprep.subr.mxu1 %v823_v4  ;;  %vm137_vm12 = vmor %vm127_vm14, %vm132_vm4  ;;  %vm134_vm4 = vcmp.eq.s32.totalorder %v114_v15, 17  ;;  %vm143_vm14 = vcmp.eq.s32.totalorder %v113_v10, 18  ;;  %v8372_v10 = vmov 0 }
 0x189   :  { %5140 = vmatpush3.msra.mxu1 %v823_v4  ;;  %vm147_vm11 = vmor %vm137_vm12, %vm142_vm13  ;;  %vm144_vm13 = vcmp.eq.s32.totalorder %v114_v15, 18 }
 0x18a   :  { %5078 = vmatmul.mubr.msk.f32.gmra.mxu1 %vm843_vm2, %v830_v5  ;;  %vm139_vm12 = vmor %vm129_vm8, %vm134_vm4  ;;  %vm130_vm4 = vcmp.eq.s32.totalorder %v115_v40, 0 }
 0x18b   :  { %5141 = vmatprep.mubr.msk.f32.mxu1 %vm843_vm2, %v829_v58 }
 0x18e   :  { %5142 = vmatmul.mubr.msk.f32.vlgmr.msra.gmra.mxu1 %vm843_vm2, %v830_v5  ;;  %vm6061_vm2 = vmor %vm146_vm5, %vm151_vm3 }
 0x18f   :  { %v8361_v21 = vsel %vm6061_vm2, 4294967295, %v8360_v21  ;;  %vm6071_vm3 = vmor %vm147_vm11, %vm152_vm0  ;;  %vm154_vm0 = vcmp.eq.s32.totalorder %v114_v15, 35 }
 0x190   :  { %8362 = vst [vmem:[#allocation13_spill] sm:$0xff] %v8361_v21  ;;  %v8364_v29 = vsel %vm6071_vm3, 4294967295, %v8363_v29  ;;  %vm148_vm5 = vmor %vm138_vm7, %vm143_vm14  ;;  %vm135_vm7 = vcmp.eq.s32.totalorder %v115_v40, 17 }
 0x191   :  { %8365 = vst [vmem:[#allocation14_spill] sm:$0xff] %v8364_v29  ;;  %vm149_vm11 = vmor %vm139_vm12, %vm144_vm13  ;;  %vm145_vm12 = vcmp.eq.s32.totalorder %v115_v40, 18 }
 0x192   :  { %vm6084_vm1 = vmor %vm148_vm5, %vm153_vm6  ;;  %vm155_vm5 = vcmp.eq.s32.totalorder %v115_v40, 35 }
 0x193   :  { %v8367_v39 = vsel %vm6084_vm1, 4294967295, %v8366_v39  ;;  %vm6090_vm8 = vmor %vm149_vm11, %vm154_vm0  ;;  %vm8273_vm11 = vcmask 1047808   ;;  %vm8282_vm0 = vcmask 261120  }
 0x194   :  { %8368 = vst [vmem:[#allocation15_spill] sm:$0xff] %v8367_v39  ;;  %v8370_v49 = vsel %vm6090_vm8, 4294967295, %v8369_v49  ;;  %vm140_vm14 = vmor %vm130_vm4, %vm135_vm7  ;;  %vm8375_vm4 = vcmask 785408  }
 0x195   :  { %8371 = vst [vmem:[#allocation16_spill] sm:$0xff] %v8370_v49  ;;  %vm150_vm13 = vmor %vm140_vm14, %vm145_vm12  ;;  %vm8271_vm14 = vcmask 1039360   ;;  %vm8377_vm12 = vcmask 777216  }
 0x196   :  { %vm6131_vm6 = vmor %vm150_vm13, %vm155_vm5  ;;  %vm8378_vm13 = vcmask 654336  }
 0x197   :  { %v8373_v10 = vsel %vm6131_vm6, 4294967295, %v8372_v10  ;;  %vm8376_vm7 = vmmov %vm8375_vm4 }
 0x198   :  { %8374 = vst [vmem:[#allocation17_spill] sm:$0xff] %v8373_v10  ;;  %vm8379_vm5 = vmmov %vm8377_vm12 }
 0x23e   :  { %v932_v16 = vpop.f32.mrf.mxu1 }
 0x23f   :  { %v933_v22 = vadd.f32 %v932_v16, %v6058_v12 }
 0x240   :  { %v934_v25 = vpop.f32.mrf.mxu1 }
 0x241   :  { %v935_v23 = vadd.f32 %v934_v25, %v6058_v12  ;;  %v1095_v26 = vmax.f32 %v933_v22, 0.0 }
 0x242   :  { %v938_v27 = vpop.f32.mrf.mxu1 }
 0x243   :  { %v1096_v24 = vmax.f32 %v935_v23, 0.0  ;;  %v6069_v28 = vsel %vm6061_vm2, 0.0, %v1095_v26  ;;  %v939_v37 = vadd.f32 %v938_v27, %v841_v32 }
 0x244   :  { %v940_v33 = vpop.f32.mrf.mxu1  ;;  %1145 = vrot.lane.b32.xlu1 %v6069_v28, %s5569_s0 }
 0x245   :  { %v6080_v36 = vsel %vm6071_vm3, 0.0, %v1096_v24  ;;  %v941_v44 = vadd.f32 %v940_v33, %v841_v32  ;;  %v1100_v53 = vmax.f32 %v939_v37, 0.0 }
 0x246   :  { %v1009_v34 = vpop.f32.mrf.mxu1 }
 0x247   :  { %v1010_v35 = vadd.f32 %v1009_v34, %v6058_v12  ;;  %v1101_v19 = vmax.f32 %v941_v44, 0.0  ;;  %v6108_v58 = vsel %vm6061_vm2, 0.0, %v1100_v53 }
 0x248   :  { %v1011_v38 = vpop.f32.mrf.mxu1  ;;  %1147 = vrot.lane.b32.xlu1 %v6080_v36, %s5569_s0 }
 0x249   :  { %v1097_v45 = vmax.f32 %v1010_v35, 0.0  ;;  %v1012_v47 = vadd.f32 %v1011_v38, %v6058_v12  ;;  %v6115_v0 = vsel %vm6071_vm3, 0.0, %v1101_v19 }
 0x24a   :  { %v1015_v48 = vpop.f32.mrf.mxu1 }
 0x24b   :  { %v1098_v50 = vmax.f32 %v1012_v47, 0.0  ;;  %v1016_v51 = vadd.f32 %v1015_v48, %v841_v32  ;;  %v6096_v52 = vsel %vm6084_vm1, 0.0, %v1097_v45 }
 0x24c   :  { %v1017_v54 = vpop.f32.mrf.mxu1  ;;  %1149 = vrot.lane.b32.xlu0 %v6096_v52, %s5569_s0 }
 0x24d   :  { %v1018_v55 = vadd.f32 %v1017_v54, %v841_v32  ;;  %v6102_v11 = vsel %vm6090_vm8, 0.0, %v1098_v50  ;;  %v1102_v57 = vmax.f32 %v1016_v51, 0.0 }
 0x24e   :  { %v5143_v56 = vpop.f32.mrf.mxu1  ;;  %1151 = vrot.lane.b32.xlu1 %v6102_v11, %s5569_s0 }
 0x24f   :  { %v1103_v62 = vmax.f32 %v1018_v55, 0.0  ;;  %v1092_v63 = vadd.f32 %v5143_v56, %v841_v32  ;;  %v6121_v4 = vsel %vm6084_vm1, 0.0, %v1102_v57  ;;  %v1401_v57 = vld [vmem:[%s8240_s13 + $0xf8] sm:$0xff] }
 0x250   :  { %v1086_v61 = vpop.f32.mrf.mxu1  ;;  %1155 = vrot.lane.b32.xlu0 %v6108_v58, %s5569_s0  ;;  %1521 = vmatprep.subr.mxu1 %v1401_v57  ;;  %v1457_v57 = vld [vmem:[%s8240_s13 + $0x2b8] sm:$0xff] }
 0x251   :  { %v1087_v5 = vadd.f32 %v1086_v61, %v6058_v12  ;;  %v1104_v6 = vmax.f32 %v1092_v63, 0.0  ;;  %v6127_v8 = vsel %vm6090_vm8, 0.0, %v1103_v62  ;;  %v1400_v61 = vld [vmem:[%s8240_s13 + $0xf0] sm:$0xff]  ;;  %v1399_v62 = vld [vmem:[%s8240_s13 + $0xe8] sm:$0xff] }
 0x252   :  { %1157 = vrot.lane.b32.xlu1 %v6115_v0, %s5569_s0  ;;  %1522 = vmatpush1.msra.mxu1 %v1400_v61  ;;  %v1387_v61 = vld [vmem:[%s8240_s13 + $0x88] sm:$0xff] }
 0x253   :  { %v1099_v2 = vmax.f32 %v1087_v5, 0.0  ;;  %v6143_v15 = vsel %vm6131_vm6, 0.0, %v1104_v6  ;;  %v1398_v5 = vld [vmem:[%s8240_s13 + $0xe0] sm:$0xff]  ;;  %1523 = vmatprep.subr.mxu1 %v1399_v62  ;;  %v1396_v6 = vld [vmem:[%s8240_s13 + $0xd0] sm:$0xff] }
 0x254   :  { %1159 = vrot.lane.b32.xlu0 %v6121_v4, %s5569_s0  ;;  %1524 = vmatpush1.msra.mxu1 %v1398_v5  ;;  %v1456_v62 = vld [vmem:[%s8240_s13 + $0x2b0] sm:$0xff]  ;;  %v1386_v5 = vld [vmem:[%s8240_s13 + $0x80] sm:$0xff] }
 0x255   :  { %v6137_v12 = vsel %vm6131_vm6, 0.0, %v1099_v2  ;;  %v1397_v2 = vld [vmem:[%s8240_s13 + $0xd8] sm:$0xff] }
 0x256   :  { %1161 = vrot.lane.b32.xlu1 %v6127_v8, %s5569_s0  ;;  %1525 = vmatprep.subr.mxu1 %v1397_v2  ;;  %v1455_v2 = vld [vmem:[%s8240_s13 + $0x2a8] sm:$0xff] }
 0x257   :  { %1526 = vmatpush1.msra.mxu1 %v1396_v6  ;;  %v1385_v6 = vld [vmem:[%s8240_s13 + $0x78] sm:$0xff] }
 0x258   :  { %1153 = vrot.lane.b32.xlu0 %v6137_v12, %s5569_s0 }
 0x25a   :  { %1163 = vrot.lane.b32.xlu1 %v6143_v15, %s5569_s0 }
 0x2b6   :  { %v1146_v16 = vpop.permute.xlu1 %1145 }
 0x2b7   :  { %1185 = vst.msk [vmem:[#allocation2] sm:$0xff] %vm8273_vm11, %v1146_v16 }
 0x2ba   :  { %v1148_v22 = vpop.permute.xlu1 %1147 }
 0x2bb   :  { %v6151_v26 = vsel %vm8282_vm0, %v1146_v16, %v1148_v22 }
 0x2be   :  { %v1150_v25 = vpop.permute.xlu0 %1149  ;;  %v6148_v23 = vld [vmem:[#allocation2] sm:$0xff] }
 0x2bf   :  { %v6154_v27 = vsel %vm8282_vm0, %v1148_v22, %v1150_v25  ;;  %1774 = vst [vmem:[#allocation2] sm:$0xff] %v5556_v1  ;;  %v1465_v22 = vld [vmem:[%s8240_s13 + $0x2f8] sm:$0xff] }
 0x2c0   :  { %v1152_v24 = vpop.permute.xlu1 %1151  ;;  %v5225_v32 = vpack.i.bf16 %v6154_v27, %v6151_v26  ;;  %1598 = vmatprep.subr.mxu0 %v1465_v22  ;;  %v1453_v22 = vld [vmem:[%s8240_s13 + $0x298] sm:$0xff] }
 0x2c1   :  { %v6160_v33 = vsel %vm8282_vm0, %v1150_v25, %v1152_v24  ;;  %v1394_v25 = vld [vmem:[%s8240_s13 + $0xc0] sm:$0xff] }
 0x2c2   :  { %v1156_v34 = vpop.permute.xlu0 %1155  ;;  %5226 = vrot.lane.b32.xlu0 %v5225_v32, %s5570_s30  ;;  %v5230_v35 = vpack.i.bf16 %v6148_v23, %v6160_v33 }
 0x2c3   :  { %1190 = vst.msk [vmem:[#allocation2 + $0x28] sm:$0xff] %vm8273_vm11, %v1156_v34 }
 0x2c4   :  { %v1158_v37 = vpop.permute.xlu1 %1157  ;;  %5231 = vrot.lane.b32.xlu1 %v5230_v35, %s5570_s30  ;;  %v1462_v35 = vld [vmem:[%s8240_s13 + $0x2e0] sm:$0xff] }
 0x2c5   :  { %v6168_v40 = vsel %vm8282_vm0, %v1156_v34, %v1158_v37  ;;  %v1463_v34 = vld [vmem:[%s8240_s13 + $0x2e8] sm:$0xff] }
 0x2c6   :  { %v1160_v38 = vpop.permute.xlu0 %1159  ;;  %v5250_v16 = vpack.i.bf16 %v6168_v40, %v6148_v23 }
 0x2c7   :  { %v6171_v44 = vsel %vm8282_vm0, %v1158_v37, %v1160_v38  ;;  %v1392_v37 = vld [vmem:[%s8240_s13 + $0xb0] sm:$0xff] }
 0x2c8   :  { %v1162_v45 = vpop.permute.xlu1 %1161  ;;  %v5235_v47 = vpack.i.bf16 %v6171_v44, %v6168_v40 }
 0x2c9   :  { %v6176_v48 = vsel %vm8282_vm0, %v1160_v38, %v1162_v45  ;;  %v1461_v38 = vld [vmem:[%s8240_s13 + $0x2d8] sm:$0xff] }
 0x2ca   :  { %v1154_v50 = vpop.permute.xlu0 %1153  ;;  %5236 = vrot.lane.b32.xlu0 %v5235_v47, %s5570_s30  ;;  %v6179_v51 = vld [vmem:[#allocation2 + $0x28] sm:$0xff]  ;;  %v1460_v47 = vld [vmem:[%s8240_s13 + $0x2d0] sm:$0xff] }
 0x2cb   :  { %v1169_v53 = vsel %vm8282_vm0, %v1152_v24, %v1154_v50  ;;  %v5240_v54 = vpack.i.bf16 %v6179_v51, %v6176_v48  ;;  %1779 = vst [vmem:[#allocation2 + $0x28] sm:$0xff] %v5556_v1  ;;  %v1464_v24 = vld [vmem:[%s8240_s13 + $0x2f0] sm:$0xff]  ;;  %v1390_v50 = vld [vmem:[%s8240_s13 + $0xa0] sm:$0xff] }
 0x2cc   :  { %1189 = vst.msk [vmem:[#allocation2 + $0x20] sm:$0xff] %vm8375_vm4, %v1169_v53  ;;  %v1164_v19 = vpop.permute.xlu1 %1163  ;;  %1599 = vmatpush1.msra.mxu0 %v1464_v24  ;;  %v1459_v53 = vld [vmem:[%s8240_s13 + $0x2c8] sm:$0xff]  ;;  %v1452_v24 = vld [vmem:[%s8240_s13 + $0x290] sm:$0xff]  ;;  %vm8380_vm4 = vmmov %vm8378_vm13 }
 0x2cd   :  { %v1173_v55 = vsel %vm8282_vm0, %v1162_v45, %v1164_v19  ;;  %5241 = vrot.lane.b32.xlu1 %v5240_v54, %s5570_s30  ;;  %v1391_v45 = vld [vmem:[%s8240_s13 + $0xa8] sm:$0xff]  ;;  %1600 = vmatprep.subr.mxu0 %v1463_v34  ;;  %v1389_v54 = vld [vmem:[%s8240_s13 + $0x98] sm:$0xff]  ;;  %v1458_v19 = vld [vmem:[%s8240_s13 + $0x2c0] sm:$0xff] }
 0x2ce   :  { %1194 = vst.msk [vmem:[#allocation2 + $0x48] sm:$0xff] %vm8376_vm7, %v1173_v55  ;;  %1601 = vmatpush1.msra.mxu0 %v1462_v35  ;;  %v1388_v55 = vld [vmem:[%s8240_s13 + $0x90] sm:$0xff]  ;;  %v1451_v34 = vld [vmem:[%s8240_s13 + $0x288] sm:$0xff]  ;;  %v1381_v35 = vld [vmem:[%s8240_s13 + $0x58] sm:$0xff] }
 0x2cf   :  { %1602 = vmatprep.subr.mxu0 %v1461_v38  ;;  %v1380_v38 = vld [vmem:[%s8240_s13 + $0x50] sm:$0xff]  ;;  %vm8381_vm7 = vmmov %vm8379_vm5 }
 0x2d0   :  { %1603 = vmatpush1.msra.mxu0 %v1460_v47  ;;  %v1379_v47 = vld [vmem:[%s8240_s13 + $0x48] sm:$0xff] }
 0x2d1   :  { %1604 = vmatprep.subr.mxu0 %v1459_v53  ;;  %v1378_v53 = vld [vmem:[%s8240_s13 + $0x40] sm:$0xff] }
 0x2d2   :  { %1605 = vmatpush1.msra.mxu0 %v1458_v19  ;;  %v1377_v19 = vld [vmem:[%s8240_s13 + $0x38] sm:$0xff] }
 0x2d3   :  { %v6189_v56 = vld [vmem:[#allocation2 + $0x20] sm:$0xff]  ;;  %1606 = vmatprep.subr.mxu0 %v1457_v57  ;;  %v1376_v57 = vld [vmem:[%s8240_s13 + $0x30] sm:$0xff] }
 0x2d4   :  { %1271 = vrot.lane.b32.xlu0 %v6189_v56, %s5570_s30  ;;  %3195 = vst [vmem:[#allocation2 + $0x20] sm:$0xff] %v5556_v1  ;;  %1607 = vmatpush1.msra.mxu0 %v1456_v62  ;;  %v1375_v62 = vld [vmem:[%s8240_s13 + $0x28] sm:$0xff] }
 0x2d5   :  { %v6203_v63 = vld [vmem:[#allocation2 + $0x48] sm:$0xff]  ;;  %1608 = vmatprep.subr.mxu0 %v1455_v2  ;;  %v1374_v2 = vld [vmem:[%s8240_s13 + $0x20] sm:$0xff] }
 0x2d6   :  { %1281 = vrot.lane.b32.xlu1 %v6203_v63, %s5570_s30  ;;  %3909 = vst [vmem:[#allocation2 + $0x48] sm:$0xff] %v5556_v1  ;;  %v1395_v1 = vld [vmem:[%s8240_s13 + $0xc8] sm:$0xff] }
 0x2d7   :  { %1527 = vmatprep.subr.mxu1 %v1395_v1  ;;  %v1384_v1 = vld [vmem:[%s8240_s13 + $0x70] sm:$0xff] }
 0x2d8   :  { %5246 = vrot.lane.b32.xlu0 %v5225_v32, %s5563_s21  ;;  %v1393_v32 = vld [vmem:[%s8240_s13 + $0xb8] sm:$0xff]  ;;  %1528 = vmatpush1.msra.mxu1 %v1394_v25  ;;  %v1383_v25 = vld [vmem:[%s8240_s13 + $0x68] sm:$0xff] }
 0x2d9   :  { %1529 = vmatprep.subr.mxu1 %v1393_v32  ;;  %v1382_v32 = vld [vmem:[%s8240_s13 + $0x60] sm:$0xff] }
 0x2da   :  { %5251 = vrot.lane.b32.xlu1 %v5250_v16, %s5563_s21  ;;  %1530 = vmatpush1.msra.mxu1 %v1392_v37  ;;  %v1454_v16 = vld [vmem:[%s8240_s13 + $0x2a0] sm:$0xff] }
 0x2db   :  { %1531 = vmatprep.subr.mxu1 %v1391_v45  ;;  %1609 = vmatpush1.msra.mxu0 %v1454_v16  ;;  %v1450_v37 = vld [vmem:[%s8240_s13 + $0x280] sm:$0xff]  ;;  %v1449_v45 = vld [vmem:[%s8240_s13 + $0x278] sm:$0xff] }
 0x2dc   :  { %1532 = vmatpush1.msra.mxu1 %v1390_v50  ;;  %1610 = vmatprep.subr.mxu0 %v1453_v22  ;;  %v1448_v50 = vld [vmem:[%s8240_s13 + $0x270] sm:$0xff]  ;;  %v1373_v16 = vld [vmem:[%s8240_s13 + $0x18] sm:$0xff] }
 0x2dd   :  { %1533 = vmatprep.subr.mxu1 %v1389_v54  ;;  %1611 = vmatpush1.msra.mxu0 %v1452_v24  ;;  %v1447_v54 = vld [vmem:[%s8240_s13 + $0x268] sm:$0xff]  ;;  %v1372_v22 = vld [vmem:[%s8240_s13 + $0x10] sm:$0xff] }
 0x2de   :  { %1534 = vmatpush1.msra.mxu1 %v1388_v55  ;;  %1612 = vmatprep.subr.mxu0 %v1451_v34  ;;  %v1446_v55 = vld [vmem:[%s8240_s13 + $0x260] sm:$0xff]  ;;  %v1371_v24 = vld [vmem:[%s8240_s13 + $0x8] sm:$0xff] }
 0x2df   :  { %1535 = vmatprep.subr.mxu1 %v1387_v61  ;;  %1613 = vmatpush1.msra.mxu0 %v1450_v37  ;;  %v1445_v61 = vld [vmem:[%s8240_s13 + $0x258] sm:$0xff]  ;;  %v1370_v34 = vld [vmem:[%s8240_s13] sm:$0xff] }
 0x2e0   :  { %1536 = vmatpush1.msra.mxu1 %v1386_v5  ;;  %1614 = vmatprep.subr.mxu0 %v1449_v45  ;;  %v1444_v5 = vld [vmem:[%s8240_s13 + $0x250] sm:$0xff]  ;;  %v1433_v37 = vld [vmem:[%s8240_s13 + $0x1f8] sm:$0xff] }
 0x2e1   :  { %1537 = vmatprep.subr.mxu1 %v1385_v6  ;;  %1615 = vmatpush1.msra.mxu0 %v1448_v50  ;;  %v1443_v6 = vld [vmem:[%s8240_s13 + $0x248] sm:$0xff]  ;;  %v1432_v45 = vld [vmem:[%s8240_s13 + $0x1f0] sm:$0xff] }
 0x2e2   :  { %1538 = vmatpush1.msra.mxu1 %v1384_v1  ;;  %1616 = vmatprep.subr.mxu0 %v1447_v54  ;;  %v1442_v1 = vld [vmem:[%s8240_s13 + $0x240] sm:$0xff]  ;;  %v1431_v50 = vld [vmem:[%s8240_s13 + $0x1e8] sm:$0xff] }
 0x2e3   :  { %1539 = vmatprep.subr.mxu1 %v1383_v25  ;;  %1617 = vmatpush1.msra.mxu0 %v1446_v55  ;;  %v1441_v25 = vld [vmem:[%s8240_s13 + $0x238] sm:$0xff]  ;;  %v1430_v54 = vld [vmem:[%s8240_s13 + $0x1e0] sm:$0xff] }
 0x2e4   :  { %1540 = vmatpush1.msra.mxu1 %v1382_v32  ;;  %1618 = vmatprep.subr.mxu0 %v1445_v61  ;;  %v1440_v32 = vld [vmem:[%s8240_s13 + $0x230] sm:$0xff]  ;;  %v1429_v55 = vld [vmem:[%s8240_s13 + $0x1d8] sm:$0xff] }
 0x2e5   :  { %1541 = vmatprep.subr.mxu1 %v1381_v35  ;;  %1619 = vmatpush1.msra.mxu0 %v1444_v5  ;;  %v1439_v35 = vld [vmem:[%s8240_s13 + $0x228] sm:$0xff]  ;;  %v1428_v61 = vld [vmem:[%s8240_s13 + $0x1d0] sm:$0xff] }
 0x2e6   :  { %1542 = vmatpush1.msra.mxu1 %v1380_v38  ;;  %1620 = vmatprep.subr.mxu0 %v1443_v6  ;;  %v1438_v38 = vld [vmem:[%s8240_s13 + $0x220] sm:$0xff]  ;;  %v1427_v5 = vld [vmem:[%s8240_s13 + $0x1c8] sm:$0xff] }
 0x2e7   :  { %1543 = vmatprep.subr.mxu1 %v1379_v47  ;;  %1621 = vmatpush1.msra.mxu0 %v1442_v1  ;;  %v1437_v47 = vld [vmem:[%s8240_s13 + $0x218] sm:$0xff]  ;;  %v1426_v6 = vld [vmem:[%s8240_s13 + $0x1c0] sm:$0xff] }
 0x2e8   :  { %1544 = vmatpush1.msra.mxu1 %v1378_v53  ;;  %1622 = vmatprep.subr.mxu0 %v1441_v25  ;;  %v1436_v53 = vld [vmem:[%s8240_s13 + $0x210] sm:$0xff]  ;;  %v1425_v1 = vld [vmem:[%s8240_s13 + $0x1b8] sm:$0xff] }
 0x2e9   :  { %1545 = vmatprep.subr.mxu1 %v1377_v19  ;;  %1623 = vmatpush1.msra.mxu0 %v1440_v32  ;;  %v1435_v19 = vld [vmem:[%s8240_s13 + $0x208] sm:$0xff]  ;;  %v1424_v25 = vld [vmem:[%s8240_s13 + $0x1b0] sm:$0xff] }
 0x2ea   :  { %1546 = vmatpush1.msra.mxu1 %v1376_v57  ;;  %1624 = vmatprep.subr.mxu0 %v1439_v35  ;;  %v1434_v57 = vld [vmem:[%s8240_s13 + $0x200] sm:$0xff]  ;;  %v1423_v32 = vld [vmem:[%s8240_s13 + $0x1a8] sm:$0xff] }
 0x2eb   :  { %1547 = vmatprep.subr.mxu1 %v1375_v62  ;;  %1625 = vmatpush1.msra.mxu0 %v1438_v38  ;;  %v1497_v62 = vld [vmem:[%s8240_s13 + $0x3f8] sm:$0xff]  ;;  %v1422_v35 = vld [vmem:[%s8240_s13 + $0x1a0] sm:$0xff] }
 0x2ec   :  { %1548 = vmatpush1.msra.mxu1 %v1374_v2  ;;  %1626 = vmatprep.subr.mxu0 %v1437_v47  ;;  %v1496_v2 = vld [vmem:[%s8240_s13 + $0x3f0] sm:$0xff]  ;;  %v1421_v38 = vld [vmem:[%s8240_s13 + $0x198] sm:$0xff] }
 0x2ed   :  { %1549 = vmatprep.subr.mxu1 %v1373_v16  ;;  %1627 = vmatpush1.msra.mxu0 %v1436_v53  ;;  %v1495_v16 = vld [vmem:[%s8240_s13 + $0x3e8] sm:$0xff]  ;;  %v1420_v47 = vld [vmem:[%s8240_s13 + $0x190] sm:$0xff] }
 0x2ee   :  { %1550 = vmatpush1.msra.mxu1 %v1372_v22  ;;  %1628 = vmatprep.subr.mxu0 %v1435_v19  ;;  %v1494_v22 = vld [vmem:[%s8240_s13 + $0x3e0] sm:$0xff]  ;;  %v1419_v53 = vld [vmem:[%s8240_s13 + $0x188] sm:$0xff] }
 0x2ef   :  { %1551 = vmatprep.subr.mxu1 %v1371_v24  ;;  %1629 = vmatpush1.msra.mxu0 %v1434_v57  ;;  %v1493_v24 = vld [vmem:[%s8240_s13 + $0x3d8] sm:$0xff]  ;;  %v1418_v19 = vld [vmem:[%s8240_s13 + $0x180] sm:$0xff]  ;;  %v1416_v57 = vld [vmem:[%s8240_s13 + $0x170] sm:$0xff] }
 0x2f0   :  { %1552 = vmatpush1.msra.mxu1 %v1370_v34  ;;  %1630 = vmatprep.subr.mxu0 %v1497_v62  ;;  %v1492_v34 = vld [vmem:[%s8240_s13 + $0x3d0] sm:$0xff]  ;;  %v1414_v62 = vld [vmem:[%s8240_s13 + $0x160] sm:$0xff] }
 0x2f1   :  { %1553 = vmatprep.subr.mxu1 %v1433_v37  ;;  %1631 = vmatpush2.msra.mxu0 %v1496_v2  ;;  %v1491_v37 = vld [vmem:[%s8240_s13 + $0x3c8] sm:$0xff]  ;;  %v1412_v2 = vld [vmem:[%s8240_s13 + $0x150] sm:$0xff] }
 0x2f2   :  { %1554 = vmatpush2.msra.mxu1 %v1432_v45  ;;  %1632 = vmatprep.subr.mxu0 %v1495_v16  ;;  %v1490_v45 = vld [vmem:[%s8240_s13 + $0x3c0] sm:$0xff]  ;;  %v1487_v16 = vld [vmem:[%s8240_s13 + $0x3a8] sm:$0xff] }
 0x2f3   :  { %1555 = vmatprep.subr.mxu1 %v1431_v50  ;;  %1633 = vmatpush2.msra.mxu0 %v1494_v22  ;;  %v1489_v50 = vld [vmem:[%s8240_s13 + $0x3b8] sm:$0xff]  ;;  %v1486_v22 = vld [vmem:[%s8240_s13 + $0x3a0] sm:$0xff] }
 0x2f4   :  { %1556 = vmatpush2.msra.mxu1 %v1430_v54  ;;  %1634 = vmatprep.subr.mxu0 %v1493_v24  ;;  %v1488_v54 = vld [vmem:[%s8240_s13 + $0x3b0] sm:$0xff]  ;;  %v1485_v24 = vld [vmem:[%s8240_s13 + $0x398] sm:$0xff] }
 0x2f5   :  { %1557 = vmatprep.subr.mxu1 %v1429_v55  ;;  %1635 = vmatpush2.msra.mxu0 %v1492_v34  ;;  %v1417_v55 = vld [vmem:[%s8240_s13 + $0x178] sm:$0xff]  ;;  %v1484_v34 = vld [vmem:[%s8240_s13 + $0x390] sm:$0xff] }
 0x2f6   :  { %1558 = vmatpush2.msra.mxu1 %v1428_v61  ;;  %1636 = vmatprep.subr.mxu0 %v1491_v37  ;;  %v1415_v61 = vld [vmem:[%s8240_s13 + $0x168] sm:$0xff] }
 0x2f7   :  { %1559 = vmatprep.subr.mxu1 %v1427_v5  ;;  %1637 = vmatpush2.msra.mxu0 %v1490_v45  ;;  %v1413_v5 = vld [vmem:[%s8240_s13 + $0x158] sm:$0xff]  ;;  %v1407_v45 = vld [vmem:[%s8240_s13 + $0x128] sm:$0xff] }
 0x2f8   :  { %1560 = vmatpush2.msra.mxu1 %v1426_v6  ;;  %1638 = vmatprep.subr.mxu0 %v1489_v50  ;;  %v1411_v6 = vld [vmem:[%s8240_s13 + $0x148] sm:$0xff]  ;;  %v1406_v50 = vld [vmem:[%s8240_s13 + $0x120] sm:$0xff] }
 0x2f9   :  { %1561 = vmatprep.subr.mxu1 %v1425_v1  ;;  %1639 = vmatpush2.msra.mxu0 %v1488_v54  ;;  %v1410_v1 = vld [vmem:[%s8240_s13 + $0x140] sm:$0xff] }
 0x2fa   :  { %1562 = vmatpush2.msra.mxu1 %v1424_v25  ;;  %1640 = vmatprep.subr.mxu0 %v1487_v16  ;;  %v1409_v25 = vld [vmem:[%s8240_s13 + $0x138] sm:$0xff]  ;;  %v1482_v54 = vld [vmem:[%s8240_s13 + $0x380] sm:$0xff] }
 0x2fb   :  { %1563 = vmatprep.subr.mxu1 %v1423_v32  ;;  %1641 = vmatpush2.msra.mxu0 %v1486_v22  ;;  %v1408_v32 = vld [vmem:[%s8240_s13 + $0x130] sm:$0xff]  ;;  %v1403_v22 = vld [vmem:[%s8240_s13 + $0x108] sm:$0xff] }
 0x2fc   :  { %1564 = vmatpush2.msra.mxu1 %v1422_v35  ;;  %1642 = vmatprep.subr.mxu0 %v1485_v24  ;;  %v1477_v24 = vld [vmem:[%s8240_s13 + $0x358] sm:$0xff] }
 0x2fd   :  { %1565 = vmatprep.subr.mxu1 %v1421_v38  ;;  %1643 = vmatpush2.msra.mxu0 %v1484_v34 }
 0x2fe   :  { %1566 = vmatpush2.msra.mxu1 %v1420_v47  ;;  %v1483_v47 = vld [vmem:[%s8240_s13 + $0x388] sm:$0xff] }
 0x2ff   :  { %1567 = vmatprep.subr.mxu1 %v1419_v53  ;;  %1644 = vmatprep.subr.mxu0 %v1483_v47 }
 0x300   :  { %1568 = vmatpush2.msra.mxu1 %v1418_v19  ;;  %1645 = vmatpush2.msra.mxu0 %v1482_v54  ;;  %v1475_v54 = vld [vmem:[%s8240_s13 + $0x348] sm:$0xff] }
 0x301   :  { %1569 = vmatprep.subr.mxu1 %v1417_v55 }
 0x302   :  { %1570 = vmatpush2.msra.mxu1 %v1416_v57 }
 0x303   :  { %1571 = vmatprep.subr.mxu1 %v1415_v61 }
 0x304   :  { %1572 = vmatpush2.msra.mxu1 %v1414_v62  ;;  %v1405_v62 = vld [vmem:[%s8240_s13 + $0x118] sm:$0xff] }
 0x305   :  { %1573 = vmatprep.subr.mxu1 %v1413_v5  ;;  %v1481_v5 = vld [vmem:[%s8240_s13 + $0x378] sm:$0xff] }
 0x306   :  { %1574 = vmatpush2.msra.mxu1 %v1412_v2  ;;  %v1404_v2 = vld [vmem:[%s8240_s13 + $0x110] sm:$0xff]  ;;  %1646 = vmatprep.subr.mxu0 %v1481_v5 }
 0x307   :  { %1575 = vmatprep.subr.mxu1 %v1411_v6 }
 0x308   :  { %1576 = vmatpush2.msra.mxu1 %v1410_v1  ;;  %v1480_v1 = vld [vmem:[%s8240_s13 + $0x370] sm:$0xff] }
 0x309   :  { %1577 = vmatprep.subr.mxu1 %v1409_v25  ;;  %v1479_v25 = vld [vmem:[%s8240_s13 + $0x368] sm:$0xff]  ;;  %1647 = vmatpush2.msra.mxu0 %v1480_v1  ;;  %v1472_v1 = vld [vmem:[%s8240_s13 + $0x330] sm:$0xff] }
 0x30a   :  { %1578 = vmatpush2.msra.mxu1 %v1408_v32  ;;  %1648 = vmatprep.subr.mxu0 %v1479_v25 }
 0x30b   :  { %1579 = vmatprep.subr.mxu1 %v1407_v45 }
 0x30c   :  { %1580 = vmatpush2.msra.mxu1 %v1406_v50 }
 0x30d   :  { %1581 = vmatprep.subr.mxu1 %v1405_v62 }
 0x30e   :  { %1582 = vmatpush2.msra.mxu1 %v1404_v2 }
 0x30f   :  { %1583 = vmatprep.subr.mxu1 %v1403_v22  ;;  %v1471_v22 = vld [vmem:[%s8240_s13 + $0x328] sm:$0xff] }
 0x334   :  { %v5227_v35 = vpop.permute.xlu0 %5226 }
 0x335   :  { %v5229_v37 = vunpack.i.h.bf16 %v5227_v35  ;;  %v5228_v38 = vunpack.i.l.bf16 %v5227_v35  ;;  %v1513_v35 = vld [vmem:[%s8240_s13 + $0x478] sm:$0xff] }
 0x336   :  { %v6524_v53 = vpop.permute.xlu1 %5231 }
 0x337   :  { %v5233_v19 = vunpack.i.l.bf16 %v6524_v53  ;;  %v1285_v55 = vsel %vm8271_vm14, %v5228_v38, %v5229_v37  ;;  %v5234_v57 = vunpack.i.h.bf16 %v6524_v53 }
 0x338   :  { %v1303_v6 = vmax.f32 %v6151_v26, %v1285_v55  ;;  %v1402_v26 = vld [vmem:[%s8240_s13 + $0x100] sm:$0xff] }
 0x339   :  { %v1286_v61 = vsel %vm8271_vm14, %v5229_v37, %v5233_v19  ;;  %v1476_v37 = vld [vmem:[%s8240_s13 + $0x350] sm:$0xff]  ;;  %v1284_v50 = vsel %vm8271_vm14, %v5234_v57, %v5228_v38  ;;  %1584 = vmatpush2.msra.mxu1 %v1402_v26  ;;  %v1474_v38 = vld [vmem:[%s8240_s13 + $0x340] sm:$0xff]  ;;  %v1473_v57 = vld [vmem:[%s8240_s13 + $0x338] sm:$0xff] }
 0x33a   :  { %v1304_v16 = vmax.f32 %v6154_v27, %v1286_v61  ;;  %v1478_v27 = vld [vmem:[%s8240_s13 + $0x360] sm:$0xff]  ;;  %v5260_v61 = vpack.i.bf16 %v6179_v51, %v6171_v44  ;;  %1691 = vmatprep.subr.mxu1 %v1513_v35 }
 0x33b   :  { %1649 = vmatpush2.msra.mxu0 %v1478_v27  ;;  %v1469_v27 = vld [vmem:[%s8240_s13 + $0x318] sm:$0xff] }
 0x33c   :  { %v5237_v32 = vpop.permute.xlu0 %5236  ;;  %v5255_v34 = vpack.i.bf16 %v1304_v16, %v1303_v6  ;;  %1650 = vmatprep.subr.mxu0 %v1477_v24  ;;  %v1302_v6 = vmax.f32 %v6148_v23, %v1284_v50  ;;  %v1470_v23 = vld [vmem:[%s8240_s13 + $0x320] sm:$0xff]  ;;  %v1468_v24 = vld [vmem:[%s8240_s13 + $0x310] sm:$0xff] }
 0x33d   :  { %v5239_v45 = vunpack.i.h.bf16 %v5237_v32  ;;  %v5238_v47 = vunpack.i.l.bf16 %v5237_v32  ;;  %1651 = vmatpush2.msra.mxu0 %v1476_v37 }
 0x33e   :  { %5256 = vrot.lane.b32.xlu0 %v5255_v34, %s5558_s18  ;;  %1652 = vmatprep.subr.mxu0 %v1475_v54  ;;  %v5270_v34 = vpack.i.bf16 %v6176_v48, %v6160_v33 }
 0x33f   :  { %v5242_v55 = vpop.permute.xlu1 %5241  ;;  %v1289_v62 = vsel %vm8271_vm14, %v5238_v47, %v5239_v45  ;;  %1653 = vmatpush2.msra.mxu0 %v1474_v38 }
 0x340   :  { %v5244_v5 = vunpack.i.h.bf16 %v5242_v55  ;;  %v5243_v2 = vunpack.i.l.bf16 %v5242_v55  ;;  %v1308_v16 = vmax.f32 %v6168_v40, %v1289_v62  ;;  %1654 = vmatprep.subr.mxu0 %v1473_v57 }
 0x341   :  { %1655 = vmatpush2.msra.mxu0 %v1472_v1 }
 0x342   :  { %5261 = vrot.lane.b32.xlu0 %v5260_v61, %s5563_s21  ;;  %v5265_v25 = vpack.i.bf16 %v1308_v16, %v1302_v6  ;;  %v1288_v40 = vsel %vm8271_vm14, %v5244_v5, %v5238_v47  ;;  %v1290_v26 = vsel %vm8271_vm14, %v5239_v45, %v5243_v2  ;;  %1656 = vmatprep.subr.mxu0 %v1471_v22  ;;  %v1467_v45 = vld [vmem:[%s8240_s13 + $0x308] sm:$0xff]  ;;  %v1466_v47 = vld [vmem:[%s8240_s13 + $0x300] sm:$0xff] }
 0x343   :  { %1657 = vmatpush2.msra.mxu0 %v1470_v23  ;;  %v1307_v35 = vmax.f32 %v6179_v51, %v1288_v40  ;;  %v1309_v37 = vmax.f32 %v6171_v44, %v1290_v26 }
 0x344   :  { %5266 = vrot.lane.b32.xlu1 %v5265_v25, %s5558_s18  ;;  %1658 = vmatprep.subr.mxu0 %v1469_v27 }
 0x345   :  { %1659 = vmatpush2.msra.mxu0 %v1468_v24  ;;  %v5275_v44 = vpack.i.bf16 %v1307_v35, %v1309_v37 }
 0x346   :  { %v1272_v32 = vpop.permute.xlu0 %1271  ;;  %1223 = vrot.lane.b32.xlu0 %v6189_v56, %s5563_s21  ;;  %1660 = vmatprep.subr.mxu0 %v1467_v45 }
 0x347   :  { %v1287_v50 = vsel %vm8271_vm14, %v5233_v19, %v1272_v32  ;;  %1661 = vmatpush2.msra.mxu0 %v1466_v47  ;;  %v1306_v55 = vmax.f32 %v6189_v56, %v1272_v32 }
 0x348   :  { %5271 = vrot.lane.b32.xlu1 %v5270_v34, %s5563_s21  ;;  %v1282_v51 = vpop.permute.xlu1 %1281  ;;  %v1305_v54 = vmax.f32 %v6160_v33, %v1287_v50  ;;  %v1511_v50 = vld [vmem:[%s8240_s13 + $0x468] sm:$0xff] }
 0x349   :  { %v1291_v61 = vsel %vm8271_vm14, %v5243_v2, %v1282_v51  ;;  %v1311_v53 = vmax.f32 %v6203_v63, %v1282_v51  ;;  %v1509_v51 = vld [vmem:[%s8240_s13 + $0x458] sm:$0xff]  ;;  %vm8398_vm14 = vcmask 793600  }
 0x34a   :  { %1233 = vrot.lane.b32.xlu0 %v6203_v63, %s5563_s21  ;;  %v1310_v19 = vmax.f32 %v6176_v48, %v1291_v61  ;;  %v5247_v62 = vpop.permute.xlu0 %5246 }
 0x34b   :  { %v5249_v38 = vunpack.i.h.bf16 %v5247_v62  ;;  %v5248_v57 = vunpack.i.l.bf16 %v5247_v62 }
 0x34c   :  { %5276 = vrot.lane.b32.xlu1 %v5275_v44, %s5558_s18  ;;  %v5252_v33 = vpop.permute.xlu1 %5251 }
 0x34d   :  { %v1236_v56 = vsel %vm8377_vm12, %v5248_v57, %v5249_v38  ;;  %v5253_v6 = vunpack.i.l.bf16 %v5252_v33  ;;  %v5254_v45 = vunpack.i.h.bf16 %v5252_v33  ;;  %vm8382_vm12 = vmmov %vm8379_vm5 }
 0x34e   :  { %1328 = vrot.lane.b32.xlu0 %v1305_v54, %s5558_s18  ;;  %v1254_v63 = vmax.f32 %v6080_v36, %v1236_v56  ;;  %v1512_v36 = vld [vmem:[%s8240_s13 + $0x470] sm:$0xff]  ;;  %v1507_v56 = vld [vmem:[%s8240_s13 + $0x448] sm:$0xff] }
 0x34f   :  { %v1235_v48 = vsel %vm8379_vm5, %v5253_v6, %v5248_v57 }
 0x350   :  { %1330 = vrot.lane.b32.xlu1 %v1306_v55, %s5558_s18  ;;  %v1253_v26 = vmax.f32 %v6069_v28, %v1235_v48  ;;  %v1510_v28 = vld [vmem:[%s8240_s13 + $0x460] sm:$0xff] }
 0x352   :  { %1340 = vrot.lane.b32.xlu0 %v1311_v53, %s5558_s18 }
 0x354   :  { %1338 = vrot.lane.b32.xlu1 %v1310_v19, %s5558_s18  ;;  %v1508_v19 = vld [vmem:[%s8240_s13 + $0x450] sm:$0xff] }
 0x3b0   :  { %v5257_v5 = vpop.permute.xlu0 %5256 }
 0x3b1   :  { %v5259_v16 = vunpack.i.h.bf16 %v5257_v5  ;;  %v5258_v2 = vunpack.i.l.bf16 %v5257_v5 }
 0x3b3   :  { %v1343_v1 = vsel %vm8378_vm13, %v5258_v2, %v5259_v16  ;;  %vm8383_vm13 = vmmov %vm8379_vm5 }
 0x3b4   :  { %v5262_v22 = vpop.permute.xlu0 %5261  ;;  %v1361_v25 = vmax.f32 %v1254_v63, %v1343_v1  ;;  %vm8384_vm5 = vmmov %vm8380_vm4 }
 0x3b5   :  { %v5264_v24 = vunpack.i.h.bf16 %v5262_v22  ;;  %v5263_v32 = vunpack.i.l.bf16 %v5262_v22  ;;  %v1505_v22 = vld [vmem:[%s8240_s13 + $0x438] sm:$0xff] }
 0x3b6   :  { %v5267_v23 = vpop.permute.xlu1 %5266  ;;  %1585 = vmatprep.mubr.f32.mxu1 %v1361_v25 }
 0x3b7   :  { %v5268_v40 = vunpack.i.l.bf16 %v5267_v23  ;;  %v1240_v54 = vsel %vm8381_vm7, %v5254_v45, %v5263_v32  ;;  %v1239_v55 = vsel %vm8382_vm12, %v5264_v24, %v5254_v45  ;;  %v5269_v61 = vunpack.i.h.bf16 %v5267_v23  ;;  %vm8385_vm12 = vmmov %vm8381_vm7 }
 0x3b8   :  { %v6638_v27 = vpop.permute.xlu0 %1223  ;;  %v1259_v63 = vmax.f32 %v6115_v0, %v1240_v54  ;;  %v1258_v1 = vmax.f32 %v6108_v58, %v1239_v55  ;;  %v1504_v0 = vld [vmem:[%s8240_s13 + $0x430] sm:$0xff] }
 0x3b9   :  { %v1342_v34 = vsel %vm8380_vm4, %v5268_v40, %v5258_v2  ;;  %v1506_v2 = vld [vmem:[%s8240_s13 + $0x440] sm:$0xff]  ;;  %v1500_v54 = vld [vmem:[%s8240_s13 + $0x410] sm:$0xff] }
 0x3ba   :  { %v5272_v35 = vpop.permute.xlu1 %5271  ;;  %v1360_v37 = vmax.f32 %v1253_v26, %v1342_v34 }
 0x3bb   :  { %v5273_v47 = vunpack.i.l.bf16 %v5272_v35  ;;  %v5274_v62 = vunpack.i.h.bf16 %v5272_v35 }
 0x3bc   :  { %v6647_v44 = vpop.permute.xlu0 %1233  ;;  %1586 = vmatmul.mubr.f32.vlgmr.msra.gmra.mxu1 %v1360_v37 }
 0x3bd   :  { %1692 = vmatpush1.msra.mxu1 %v1512_v36  ;;  %v1238_v5 = vsel %vm8383_vm13, %v5273_v47, %v6638_v27  ;;  %v1237_v23 = vsel %vm8381_vm7, %v5249_v38, %v5273_v47  ;;  %v1242_v34 = vsel %vm8385_vm12, %v5274_v62, %v6647_v44  ;;  %vm8386_vm13 = vmmov %vm8380_vm4  ;;  %v1503_v38 = vld [vmem:[%s8240_s13 + $0x428] sm:$0xff] }
 0x3be   :  { %1693 = vmatprep.subr.mxu1 %v1511_v50  ;;  %v5277_v53 = vpop.permute.xlu1 %5276  ;;  %v1256_v58 = vmax.f32 %v6102_v11, %v1238_v5  ;;  %v1502_v11 = vld [vmem:[%s8240_s13 + $0x420] sm:$0xff]  ;;  %v1255_v47 = vmax.f32 %v6096_v52, %v1237_v23  ;;  %v1261_v50 = vmax.f32 %v6127_v8, %v1242_v34  ;;  %v1499_v8 = vld [vmem:[%s8240_s13 + $0x408] sm:$0xff] }
 0x3bf   :  { %v5279_v57 = vunpack.i.h.bf16 %v5277_v53  ;;  %v5278_v33 = vunpack.i.l.bf16 %v5277_v53  ;;  %1694 = vmatpush1.msra.mxu1 %v1510_v28  ;;  %v1257_v53 = vmax.f32 %v6137_v12, %v6638_v27  ;;  %v1262_v12 = vmax.f32 %v6143_v15, %v6647_v44 }
 0x3c0   :  { %1695 = vmatprep.subr.mxu1 %v1509_v51  ;;  %v1329_v6 = vpop.permute.xlu0 %1328 }
 0x3c1   :  { %1696 = vmatpush1.msra.mxu1 %v1508_v19  ;;  %v1347_v25 = vsel %vm8384_vm5, %v5269_v61, %v5278_v33  ;;  %v1346_v48 = vsel %vm8380_vm4, %v5279_v57, %v5269_v61  ;;  %v1344_v35 = vsel %vm8386_vm13, %v5259_v16, %v1329_v6  ;;  %vm8387_vm5 = vmmov %vm8380_vm4  ;;  %v1501_v16 = vld [vmem:[%s8240_s13 + $0x418] sm:$0xff]  ;;  %v6710_v57 = vld [vmem:[#allocation2 + $0x30] sm:$0xff]  ;;  %vm8272_vm13 = vcmask 523264  }
 0x3c2   :  { %1697 = vmatprep.subr.mxu1 %v1507_v56  ;;  %v1331_v40 = vpop.permute.xlu1 %1330  ;;  %v1366_v26 = vmax.f32 %v1259_v63, %v1347_v25  ;;  %v1365_v24 = vmax.f32 %v1258_v1, %v1346_v48  ;;  %vm8388_vm4 = vmmov %vm8381_vm7  ;;  %v1362_v51 = vmax.f32 %v1255_v47, %v1344_v35 }
 0x3c3   :  { %1698 = vmatpush1.msra.mxu1 %v1506_v2  ;;  %v1345_v37 = vsel %vm8387_vm5, %v1329_v6, %v1331_v40  ;;  %v1241_v36 = vsel %vm8388_vm4, %v5263_v32, %v5274_v62  ;;  %vm8389_vm7 = vmmov %vm8387_vm5 }
 0x3c4   :  { %1699 = vmatprep.subr.mxu1 %v1505_v22  ;;  %1591 = vmatprep.mubr.f32.mxu1 %v1366_v26  ;;  %v1363_v45 = vmax.f32 %v1256_v58, %v1345_v37  ;;  %v1341_v28 = vpop.permute.xlu0 %1340  ;;  %v1260_v55 = vmax.f32 %v6121_v4, %v1241_v36  ;;  %vm8390_vm12 = vmmov %vm8387_vm5  ;;  %v1498_v4 = vld [vmem:[%s8240_s13 + $0x400] sm:$0xff]  ;;  %s5571_s13 = smov 88   ;;  %vm8270_vm5 = vcmask 130048  }
 0x3c5   :  { %1700 = vmatpush1.msra.mxu1 %v1504_v0  ;;  %v1369_v27 = vmax.f32 %v1262_v12, %v1341_v28 }
 0x3c6   :  { %1592 = vmatmul.mubr.f32.gmra.mxu1 %v1365_v24  ;;  %1701 = vmatprep.subr.mxu1 %v1503_v38  ;;  %v1339_v32 = vpop.permute.xlu1 %1338 }
 0x3c7   :  { %v1348_v52 = vsel %vm8389_vm7, %v5278_v33, %v1339_v32  ;;  %v1349_v61 = vsel %vm8390_vm12, %v1339_v32, %v1341_v28  ;;  %1662 = vmatprep.mubr.f32.mxu0 %v1363_v45  ;;  %1702 = vmatpush1.msra.mxu1 %v1502_v11  ;;  %v1364_v33 = vmax.f32 %v1257_v53, %v1331_v40  ;;  %vm8395_vm12 = vcmask 785408  }
 0x3c8   :  { %1663 = vmatmul.mubr.f32.vlgmr.msra.gmra.mxu0 %v1362_v51  ;;  %1703 = vmatprep.subr.mxu1 %v1501_v16  ;;  %v1368_v19 = vmax.f32 %v1261_v50, %v1349_v61  ;;  %v1367_v62 = vmax.f32 %v1260_v55, %v1348_v52  ;;  %v2116_v55 = vld [vmem:[%s8231_s4] sm:$0xff]  ;;  %v1753_v61 = vand.u32 7, %v5817_v18 }
 0x3c9   :  { %1704 = vmatpush1.msra.mxu1 %v1500_v54  ;;  %1739 = vmatprep.mubr.f32.mxu1 %v6710_v57  ;;  %v2115_v54 = vld [vmem:[%s8230_s3 + $0x8] sm:$0xff] }
 0x3ca   :  { %1705 = vmatprep.subr.mxu1 %v1499_v8  ;;  %1668 = vmatprep.mubr.f32.mxu0 %v1368_v19  ;;  %vm6784_vm4 = vcmp.eq.s32.totalorder %v1753_v61, 0  ;;  %vm6796_vm7 = vcmp.eq.s32.totalorder %v1753_v61, 7  ;;  %v2791_v19 = vld [vmem:[%s8234_s7] sm:$0xff]  ;;  %s8465_s7 = smov 113  }
 0x3cb   :  { %1706 = vmatpush1.msra.mxu1 %v1498_v4 }
 0x3cc   :  { %1669 = vmatmul.mubr.f32.gmra.mxu0 %v1367_v62  ;;  %5082 = vmatmul.mubr.msk.f32.vlgmr.msra.gmra.mxu1 %vm8272_vm13, %v1364_v33 }
 0x3cd   :  { %1745 = vmatprep.mubr.f32.mxu1 %v6710_v57  ;;  %2282 = vmatprep.subr.mxu1 %v6710_v57 }
 0x3ce   :  { %5084 = vmatprep.mubr.msk.f32.mxu0 %vm8270_vm5, %v2115_v54 }
 0x3d0   :  { %5083 = vmatmul.mubr.msk.f32.gmra.mxu1 %vm8272_vm13, %v1369_v27 }
 0x47c   :  { %v1587_v56 = vpop.f32.mrf.mxu1 }
 0x47e   :  { %v1589_v5 = vpop.f32.mrf.mxu1 }
 0x486   :  { %v1593_v6 = vpop.f32.mrf.mxu1 }
 0x488   :  { %v1664_v2 = vpop.f32.mrf.mxu0  ;;  %v1595_v63 = vpop.f32.mrf.mxu1 }
 0x489   :  { %v1665_v24 = vadd.f32 %v1664_v2, %v1587_v56  ;;  %v1752_v2 = vand.u32 7, %v5814_v17 }
 0x48a   :  { %v1666_v1 = vpop.f32.mrf.mxu0 }
 0x48b   :  { %v1667_v34 = vadd.f32 %v1666_v1, %v1589_v5  ;;  %vm6812_vm5 = vcmp.eq.s32.totalorder %v1752_v2, 0 }
 0x48c   :  { %v1670_v22 = vpop.f32.mrf.mxu0  ;;  %v1741_v25 = vpop.f32.mrf.mxu1  ;;  %vm6871_vm6 = vmneg %vm6812_vm5 }
 0x48d   :  { %v1671_v44 = vadd.f32 %v1670_v22, %v1593_v6  ;;  %v1742_v35 = vadd.f32 %v1741_v25, %v1665_v24 }
 0x48e   :  { %v1672_v48 = vpop.f32.mrf.mxu0  ;;  %v1743_v15 = vpop.f32.mrf.mxu1 }
 0x48f   :  { %v1673_v40 = vadd.f32 %v1672_v48, %v1595_v63  ;;  %v1744_v38 = vadd.f32 %v1743_v15, %v1667_v34 }
 0x490   :  { %v1747_v23 = vpop.f32.mrf.mxu1 }
 0x491   :  { %v1748_v26 = vadd.f32 %v1747_v23, %v1671_v44 }
 0x492   :  { %v1749_v0 = vpop.f32.mrf.mxu1 }
 0x493   :  { %v1750_v58 = vadd.f32 %v1749_v0, %v1673_v40  ;;  %1792 = vrot.lane.b32.xlu1 %v1748_v26, %s5569_s0 }
 0x495   :  { %1794 = vrot.lane.b32.xlu0 %v1750_v58, %s5569_s0 }
 0x497   :  { %1788 = vrot.lane.b32.xlu1 %v1742_v35, %s5569_s0 }
 0x499   :  { %1790 = vrot.lane.b32.xlu0 %v1744_v38, %s5569_s0 }
 0x505   :  { %v1793_v37 = vpop.permute.xlu1 %1792 }
 0x506   :  { %1804 = vst.msk [vmem:[#allocation2 + $0x28] sm:$0xff] %vm8273_vm11, %v1793_v37 }
 0x507   :  { %v1795_v36 = vpop.permute.xlu0 %1794 }
 0x508   :  { %v1797_v45 = vsel %vm8282_vm0, %v1793_v37, %v1795_v36 }
 0x509   :  { %1805 = vst.msk [vmem:[#allocation2 + $0x30] sm:$0xff] %vm8272_vm13, %v1797_v45  ;;  %v1789_v11 = vpop.permute.xlu1 %1788 }
 0x50a   :  { %1802 = vst.msk [vmem:[#allocation2] sm:$0xff] %vm8273_vm11, %v1789_v11  ;;  %vm8274_vm11 = vcmask 859136  }
 0x50b   :  { %v1791_v47 = vpop.permute.xlu0 %1790 }
 0x50c   :  { %v1796_v16 = vsel %vm8282_vm0, %v1789_v11, %v1791_v47 }
 0x50d   :  { %1803 = vst.msk [vmem:[#allocation2 + $0x8] sm:$0xff] %vm8272_vm13, %v1796_v16  ;;  %v2022_v50 = vld [vmem:[#allocation2 + $0x28] sm:$0xff]  ;;  %vm6825_vm13 = vcmp.eq.s32.totalorder %v1752_v2, 7 }
 0x50e   :  { %3905 = vst [vmem:[#allocation2 + $0x28] sm:$0xff] %v6710_v57 }
 0x510   :  { %v2023_v51 = vld [vmem:[#allocation2 + $0x30] sm:$0xff] }
 0x511   :  { %v2020_v28 = vld [vmem:[#allocation2] sm:$0xff] }
 0x512   :  { %2028 = vrot.lane.b32.xlu1 %v2020_v28, %s5571_s13  ;;  %2205 = vst [vmem:[#allocation2] sm:$0xff] %v6710_v57 }
 0x514   :  { %v2021_v32 = vld [vmem:[#allocation2 + $0x8] sm:$0xff] }
 0x515   :  { %2030 = vrot.lane.b32.xlu0 %v2021_v32, %s5571_s13  ;;  %2206 = vst [vmem:[#allocation2 + $0x8] sm:$0xff] %v6710_v57 }
 0x516   :  { %1997 = vrot.lane.b32.xlu1 %v2020_v28, %s5572_s25 }
 0x519   :  { %1999 = vrot.lane.b32.xlu0 %v2021_v32, %s5572_s25 }
 0x51a   :  { %1967 = vrot.lane.b32.xlu1 %v2020_v28, %s5563_s21 }
 0x51d   :  { %1969 = vrot.lane.b32.xlu0 %v2021_v32, %s5563_s21 }
 0x51e   :  { %1941 = vrot.lane.b32.xlu1 %v2020_v28, %s5566_s24 }
 0x521   :  { %1943 = vrot.lane.b32.xlu0 %v2021_v32, %s5566_s24 }
 0x522   :  { %1911 = vrot.lane.b32.xlu1 %v2020_v28, %s5562_s20 }
 0x525   :  { %1913 = vrot.lane.b32.xlu0 %v2021_v32, %s5562_s20 }
 0x526   :  { %1880 = vrot.lane.b32.xlu1 %v2020_v28, %s5573_s15 }
 0x529   :  { %1882 = vrot.lane.b32.xlu0 %v2021_v32, %s5573_s15 }
 0x52a   :  { %1849 = vrot.lane.b32.xlu1 %v2020_v28, %s5574_s26 }
 0x52d   :  { %1851 = vrot.lane.b32.xlu0 %v2021_v32, %s5574_s26 }
 0x52e   :  { %1818 = vrot.lane.b32.xlu1 %v2020_v28, %s5575_s27 }
 0x531   :  { %1820 = vrot.lane.b32.xlu0 %v2021_v32, %s5575_s27 }
 0x532   :  { %2032 = vrot.lane.b32.xlu1 %v2022_v50, %s5571_s13 }
 0x535   :  { %2034 = vrot.lane.b32.xlu0 %v2023_v51, %s5571_s13 }
 0x536   :  { %2001 = vrot.lane.b32.xlu1 %v2022_v50, %s5572_s25 }
 0x539   :  { %2003 = vrot.lane.b32.xlu0 %v2023_v51, %s5572_s25 }
 0x53a   :  { %1971 = vrot.lane.b32.xlu1 %v2022_v50, %s5563_s21 }
 0x53d   :  { %1973 = vrot.lane.b32.xlu0 %v2023_v51, %s5563_s21 }
 0x53e   :  { %1945 = vrot.lane.b32.xlu1 %v2022_v50, %s5566_s24 }
 0x541   :  { %1947 = vrot.lane.b32.xlu0 %v2023_v51, %s5566_s24 }
 0x542   :  { %1915 = vrot.lane.b32.xlu1 %v2022_v50, %s5562_s20 }
 0x545   :  { %1917 = vrot.lane.b32.xlu0 %v2023_v51, %s5562_s20 }
 0x546   :  { %1884 = vrot.lane.b32.xlu1 %v2022_v50, %s5573_s15 }
 0x549   :  { %1886 = vrot.lane.b32.xlu0 %v2023_v51, %s5573_s15 }
 0x54a   :  { %1853 = vrot.lane.b32.xlu1 %v2022_v50, %s5574_s26 }
 0x54d   :  { %1855 = vrot.lane.b32.xlu0 %v2023_v51, %s5574_s26 }
 0x54e   :  { %1822 = vrot.lane.b32.xlu1 %v2022_v50, %s5575_s27 }
 0x551   :  { %1824 = vrot.lane.b32.xlu0 %v2023_v51, %s5575_s27 }
 0x552   :  { %2059 = vrot.lane.b32.xlu1 %v2022_v50, %s5576_s2 }
 0x555   :  { %2061 = vrot.lane.b32.xlu0 %v2023_v51, %s5576_s2 }
 0x556   :  { %2055 = vrot.lane.b32.xlu1 %v2020_v28, %s5576_s2 }
 0x559   :  { %2057 = vrot.lane.b32.xlu0 %v2021_v32, %s5576_s2 }
 0x55a   :  { %2119 = vperm.xlu1 %5223, %v2116_v55  }
 0x584   :  { %v6775_v52 = vpop.permute.xlu1 %2028 }
 0x587   :  { %v6778_v8 = vpop.permute.xlu0 %2030 }
 0x588   :  { %2044 = vst.msk [vmem:[#allocation3 + $0x238] sm:$0xff] %vm8282_vm0, %v6778_v8  ;;  %v6782_v53 = vpop.permute.xlu1 %1997 }
 0x58b   :  { %v6788_v4 = vpop.permute.xlu0 %1999 }
 0x58c   :  { %v2013_v62 = vsel %vm6784_vm4, 0.0, %v6788_v4  ;;  %v6793_v33 = vpop.permute.xlu1 %1967 }
 0x58d   :  { %2017 = vst.msk [vmem:[#allocation3 + $0x1e8] sm:$0xff] %vm8282_vm0, %v2013_v62 }
 0x58f   :  { %v6800_v27 = vpop.permute.xlu0 %1969 }
 0x590   :  { %v1982_v56 = vsel %vm6796_vm7, 0.0, %v6800_v27  ;;  %v1942_v5 = vpop.permute.xlu1 %1941 }
 0x591   :  { %1986 = vst.msk [vmem:[#allocation3 + $0x198] sm:$0xff] %vm8282_vm0, %v1982_v56 }
 0x593   :  { %v1944_v6 = vpop.permute.xlu0 %1943 }
 0x594   :  { %v6808_v63 = vsel %vm8395_vm12, %v1942_v5, %v1944_v6  ;;  %1956 = vst.msk [vmem:[#allocation3 + $0x148] sm:$0xff] %vm8282_vm0, %v1944_v6  ;;  %v1912_v1 = vpop.permute.xlu1 %1911  ;;  %vm8276_vm12 = vcmask 842752   ;;  %v2107_v6 = vld [vmem:[#allocation3 + $0x238] sm:$0xff] }
 0x595   :  { %1955 = vst [vmem:[#allocation3 + $0x140] sm:$0xff] %v6808_v63 }
 0x597   :  { %v1914_v22 = vpop.permute.xlu0 %1913 }
 0x598   :  { %v6817_v48 = vsel %vm8398_vm14, %v1912_v1, %v1914_v22  ;;  %v1926_v15 = vsel %vm6784_vm4, 0.0, %v1914_v22  ;;  %v1881_v44 = vpop.permute.xlu1 %1880  ;;  %vm8275_vm14 = vcmask 850944  }
 0x599   :  { %v1925_v23 = vsel %vm6812_vm5, 0.0, %v6817_v48  ;;  %1930 = vst.msk [vmem:[#allocation3 + $0xf8] sm:$0xff] %vm8282_vm0, %v1926_v15 }
 0x59a   :  { %1929 = vst [vmem:[#allocation3 + $0xf0] sm:$0xff] %v1925_v23 }
 0x59b   :  { %v1883_v40 = vpop.permute.xlu0 %1882 }
 0x59c   :  { %v6830_v0 = vsel %vm8276_vm12, %v1881_v44, %v1883_v40  ;;  %v1896_v24 = vsel %vm6796_vm7, 0.0, %v1883_v40  ;;  %v1850_v58 = vpop.permute.xlu1 %1849  ;;  %vm8401_vm12 = vcmask 777216  }
 0x59d   :  { %v1895_v34 = vsel %vm6825_vm13, 0.0, %v6830_v0  ;;  %1900 = vst.msk [vmem:[#allocation3 + $0xa8] sm:$0xff] %vm8282_vm0, %v1896_v24 }
 0x59e   :  { %1899 = vst [vmem:[#allocation3 + $0xa0] sm:$0xff] %v1895_v34 }
 0x59f   :  { %v1852_v35 = vpop.permute.xlu0 %1851 }
 0x5a0   :  { %v6839_v38 = vsel %vm8275_vm14, %v1850_v58, %v1852_v35  ;;  %1865 = vst.msk [vmem:[#allocation3 + $0x58] sm:$0xff] %vm8282_vm0, %v1852_v35  ;;  %v1819_v37 = vpop.permute.xlu1 %1818  ;;  %vm8279_vm14 = vcmask 728064   ;;  %v2091_v26 = vld [vmem:[#allocation3 + $0xf8] sm:$0xff] }
 0x5a1   :  { %1864 = vst [vmem:[#allocation3 + $0x50] sm:$0xff] %v6839_v38  ;;  %v2006_v15 = vsel %vm8279_vm14, %v6782_v53, %v6788_v4 }
 0x5a3   :  { %v1821_v36 = vpop.permute.xlu0 %1820 }
 0x5a4   :  { %v6844_v45 = vsel %vm8274_vm11, %v1819_v37, %v1821_v36  ;;  %v1834_v11 = vsel %vm6784_vm4, 0.0, %v1821_v36  ;;  %v2033_v47 = vpop.permute.xlu1 %2032  ;;  %vm8280_vm11 = vcmask 719872  }
 0x5a5   :  { %v1833_v16 = vsel %vm6812_vm5, 0.0, %v6844_v45  ;;  %1838 = vst.msk [vmem:[#allocation3 + $0x8] sm:$0xff] %vm8282_vm0, %v1834_v11  ;;  %v2037_v2 = vsel %vm8280_vm11, %v6775_v52, %v6778_v8  ;;  %v8402_v52 = vmov 0  ;;  %v2103_v8 = vld [vmem:[#allocation3 + $0x1e8] sm:$0xff] }
 0x5a6   :  { %1837 = vst [vmem:[#allocation3] sm:$0xff] %v1833_v16  ;;  %v8403_v52 = vsel %vm6871_vm6, 4294967295, %v8402_v52 }
 0x5a7   :  { %v2035_v50 = vpop.permute.xlu0 %2034  ;;  %v2083_v25 = vld [vmem:[#allocation3 + $0x58] sm:$0xff] }
 0x5a8   :  { %2046 = vst.msk [vmem:[#allocation3 + $0x260] sm:$0xff] %vm8282_vm0, %v2035_v50  ;;  %v2002_v28 = vpop.permute.xlu1 %2001  ;;  %v2038_v62 = vsel %vm8280_vm11, %v2033_v47, %v2035_v50  ;;  %vm8405_vm11 = vcmask 793600  }
 0x5ab   :  { %v2004_v32 = vpop.permute.xlu0 %2003 }
 0x5ac   :  { %v2015_v51 = vsel %vm6784_vm4, 0.0, %v2004_v32  ;;  %v1972_v54 = vpop.permute.xlu1 %1971  ;;  %v2007_v1 = vsel %vm8279_vm14, %v2002_v28, %v2004_v32  ;;  %vm8404_vm14 = vmmov %vm8401_vm12 }
 0x5ad   :  { %2019 = vst.msk [vmem:[#allocation3 + $0x210] sm:$0xff] %vm8282_vm0, %v2015_v51  ;;  %v1975_v53 = vsel %vm8404_vm14, %v6793_v33, %v6800_v27  ;;  %v8406_v33 = vmov 0  ;;  %v2099_v27 = vld [vmem:[#allocation3 + $0x198] sm:$0xff]  ;;  %vm8409_vm14 = vcmask 785408   ;;  %v2095_v51 = vld [vmem:[#allocation3 + $0x148] sm:$0xff] }
 0x5af   :  { %v1974_v55 = vpop.permute.xlu0 %1973  ;;  %v2109_v61 = vld [vmem:[#allocation3 + $0x260] sm:$0xff] }
 0x5b0   :  { %v1984_v56 = vsel %vm6796_vm7, 0.0, %v1974_v55  ;;  %v1946_v5 = vpop.permute.xlu1 %1945  ;;  %2126 = vmatprep.subr.mxu0 %v2109_v61  ;;  %v1976_v40 = vsel %vm8401_vm12, %v1972_v54, %v1974_v55  ;;  %vm6890_vm12 = vmneg %vm6825_vm13 }
 0x5b1   :  { %1988 = vst.msk [vmem:[#allocation3 + $0x1c0] sm:$0xff] %vm8282_vm0, %v1984_v56  ;;  %2127 = vmatpush1.msra.mxu0 %v2038_v62  ;;  %v8407_v33 = vsel %vm6890_vm12, 4294967295, %v8406_v33 }
 0x5b2   :  { %2128 = vmatprep.subr.mxu0 %v2107_v6 }
 0x5b3   :  { %2129 = vmatpush1.msra.mxu0 %v2037_v2  ;;  %v1948_v22 = vpop.permute.xlu0 %1947 }
 0x5b4   :  { %1958 = vst.msk [vmem:[#allocation3 + $0x170] sm:$0xff] %vm8282_vm0, %v1948_v22  ;;  %v1916_v44 = vpop.permute.xlu1 %1915  ;;  %v2105_v23 = vld [vmem:[#allocation3 + $0x210] sm:$0xff]  ;;  %v1950_v50 = vsel %vm8409_vm14, %v1946_v5, %v1948_v22 }
 0x5b5   :  { %2130 = vmatprep.subr.mxu0 %v2105_v23 }
 0x5b6   :  { %5304 = vmatpush1.msk.msra.mxu0 %vm6871_vm6, %v2007_v1  ;;  %v2087_v1 = vld [vmem:[#allocation3 + $0xa8] sm:$0xff] }
 0x5b7   :  { %2132 = vmatprep.subr.mxu0 %v2103_v8  ;;  %v1918_v24 = vpop.permute.xlu0 %1917 }
 0x5b8   :  { %v1920_v4 = vsel %vm8405_vm11, %v1916_v44, %v1918_v24  ;;  %v1928_v58 = vsel %vm6784_vm4, 0.0, %v1918_v24  ;;  %v1885_v34 = vpop.permute.xlu1 %1884  ;;  %5306 = vmatpush1.msk.msra.mxu0 %vm6871_vm6, %v2006_v15  ;;  %v2101_v35 = vld [vmem:[#allocation3 + $0x1c0] sm:$0xff]  ;;  %vm8408_vm11 = vcmask 842752   ;;  %v2079_v24 = vld [vmem:[#allocation3 + $0x8] sm:$0xff] }
 0x5b9   :  { %v1927_v37 = vsel %vm6812_vm5, 0.0, %v1920_v4  ;;  %1932 = vst.msk [vmem:[#allocation3 + $0x120] sm:$0xff] %vm8282_vm0, %v1928_v58  ;;  %2134 = vmatprep.subr.mxu0 %v2101_v35  ;;  %v1755_v35 = vshra.s32 %v5817_v18, 3 }
 0x5ba   :  { %1931 = vst [vmem:[#allocation3 + $0x118] sm:$0xff] %v1927_v37  ;;  %5308 = vmatpush1.msk.msra.mxu0 %vm6890_vm12, %v1976_v40 }
 0x5bb   :  { %2136 = vmatprep.subr.mxu0 %v2099_v27  ;;  %v1887_v36 = vpop.permute.xlu0 %1886  ;;  %v2097_v11 = vld [vmem:[#allocation3 + $0x170] sm:$0xff]  ;;  %vm1767_vm3 = vcmp.eq.s32.totalorder %v1755_v35, 10  ;;  %vm1771_vm10 = vcmp.eq.s32.totalorder %v1755_v35, 19 }
 0x5bc   :  { %v1890_v47 = vsel %vm8408_vm11, %v1885_v34, %v1887_v36  ;;  %v1898_v16 = vsel %vm6796_vm7, 0.0, %v1887_v36  ;;  %5310 = vmatpush1.msk.msra.mxu0 %vm6890_vm12, %v1975_v53  ;;  %v1854_v32 = vpop.permute.xlu1 %1853  ;;  %vm8410_vm11 = vcmask 850944   ;;  %v2114_v34 = vld [vmem:[%s8230_s3] sm:$0xff]  ;;  %s5577_s3 = smov 91  }
 0x5bd   :  { %v1897_v28 = vsel %vm6825_vm13, 0.0, %v1890_v47  ;;  %1902 = vst.msk [vmem:[#allocation3 + $0xd0] sm:$0xff] %vm8282_vm0, %v1898_v16  ;;  %2138 = vmatprep.subr.mxu0 %v2097_v11  ;;  %vm8411_vm13 = vcmask 859136  }
 0x5be   :  { %1901 = vst [vmem:[#allocation3 + $0xc8] sm:$0xff] %v1897_v28  ;;  %2139 = vmatpush1.msra.mxu0 %v1950_v50  ;;  %v2945_v50 = vld [vmem:[#allocation9 + $0x228] sm:$0xff] }
 0x5bf   :  { %2140 = vmatprep.subr.mxu0 %v2095_v51  ;;  %v1856_v54 = vpop.permute.xlu0 %1855 }
 0x5c0   :  { %v1859_v55 = vsel %vm8410_vm11, %v1854_v32, %v1856_v54  ;;  %1867 = vst.msk [vmem:[#allocation3 + $0x80] sm:$0xff] %vm8282_vm0, %v1856_v54  ;;  %2141 = vmatpush1.msra.mxu0 %v6808_v63  ;;  %v2093_v61 = vld [vmem:[#allocation3 + $0x120] sm:$0xff]  ;;  %v1823_v62 = vpop.permute.xlu1 %1822 }
 0x5c1   :  { %1866 = vst [vmem:[#allocation3 + $0x78] sm:$0xff] %v1859_v55  ;;  %2142 = vmatprep.subr.mxu0 %v2093_v61 }
 0x5c2   :  { %5312 = vmatpush1.msk.msra.mxu0 %vm6871_vm6, %v1920_v4 }
 0x5c3   :  { %2144 = vmatprep.subr.mxu0 %v2091_v26  ;;  %v1825_v56 = vpop.permute.xlu0 %1824  ;;  %v2274_v26 = vld [vmem:[#allocation5 + $0x78] sm:$0xff] }
 0x5c4   :  { %v1828_v5 = vsel %vm8411_vm13, %v1823_v62, %v1825_v56  ;;  %v1836_v6 = vsel %vm6784_vm4, 0.0, %v1825_v56  ;;  %5314 = vmatpush1.msk.msra.mxu0 %vm6871_vm6, %v6817_v48  ;;  %v2089_v63 = vld [vmem:[#allocation3 + $0xd0] sm:$0xff]  ;;  %v2060_v48 = vpop.permute.xlu1 %2059  ;;  %vm1761_vm13 = vcmp.eq.s32.totalorder %v1755_v35, 0  ;;  %v2273_v62 = vld [vmem:[#allocation5 + $0x70] sm:$0xff]  ;;  %2283 = vmatpush1.msra.mxu1 %v2274_v26  ;;  %v2272_v56 = vld [vmem:[#allocation5 + $0x68] sm:$0xff] }
 0x5c5   :  { %v1835_v2 = vsel %vm6812_vm5, 0.0, %v1828_v5  ;;  %1840 = vst.msk [vmem:[#allocation3 + $0x30] sm:$0xff] %vm8282_vm0, %v1836_v6  ;;  %2146 = vmatprep.subr.mxu0 %v2089_v63  ;;  %vm8281_vm5 = vcmask 711680   ;;  %2284 = vmatprep.subr.mxu1 %v6710_v57  ;;  %v2271_v6 = vld [vmem:[#allocation5 + $0x60] sm:$0xff]  ;;  %v2270_v63 = vld [vmem:[#allocation5 + $0x58] sm:$0xff] }
 0x5c6   :  { %1839 = vst [vmem:[#allocation3 + $0x28] sm:$0xff] %v1835_v2  ;;  %5316 = vmatpush1.msk.msra.mxu0 %vm6890_vm12, %v1890_v47  ;;  %2285 = vmatpush1.msra.mxu1 %v2273_v62 }
 0x5c7   :  { %2148 = vmatprep.subr.mxu0 %v2087_v1  ;;  %v2062_v22 = vpop.permute.xlu0 %2061  ;;  %v2085_v15 = vld [vmem:[#allocation3 + $0x80] sm:$0xff]  ;;  %2286 = vmatprep.subr.mxu1 %v6710_v57 }
 0x5c8   :  { %v2073_v44 = vsel %vm6796_vm7, 0.0, %v2062_v22  ;;  %5318 = vmatpush1.msk.msra.mxu0 %vm6890_vm12, %v6830_v0  ;;  %v2065_v0 = vsel %vm8281_vm5, %v2060_v48, %v2062_v22  ;;  %v2056_v4 = vpop.permute.xlu1 %2055  ;;  %2287 = vmatpush1.msra.mxu1 %v2272_v56  ;;  %v2269_v1 = vld [vmem:[#allocation5 + $0x50] sm:$0xff]  ;;  %v2268_v22 = vld [vmem:[#allocation5 + $0x48] sm:$0xff] }
 0x5c9   :  { %2077 = vst.msk [vmem:[#allocation3 + $0x2b0] sm:$0xff] %vm8282_vm0, %v2073_v44  ;;  %2150 = vmatprep.subr.mxu0 %v2085_v15  ;;  %2288 = vmatprep.subr.mxu1 %v6710_v57  ;;  %v2267_v15 = vld [vmem:[#allocation5 + $0x40] sm:$0xff]  ;;  %v2266_v44 = vld [vmem:[#allocation5 + $0x38] sm:$0xff]  ;;  %v2264_v48 = vld [vmem:[#allocation5 + $0x28] sm:$0xff] }
 0x5ca   :  { %2151 = vmatpush1.msra.mxu0 %v1859_v55  ;;  %2289 = vmatpush1.msra.mxu1 %v2271_v6 }
 0x5cb   :  { %2152 = vmatprep.subr.mxu0 %v2083_v25  ;;  %v2058_v23 = vpop.permute.xlu0 %2057  ;;  %2290 = vmatprep.subr.mxu1 %v6710_v57  ;;  %v2265_v25 = vld [vmem:[#allocation5 + $0x30] sm:$0xff] }
 0x5cc   :  { %v2071_v40 = vsel %vm6796_vm7, 0.0, %v2058_v23  ;;  %2153 = vmatpush1.msra.mxu0 %v6839_v38  ;;  %v2081_v8 = vld [vmem:[#allocation3 + $0x30] sm:$0xff]  ;;  %v2064_v38 = vsel %vm8281_vm5, %v2056_v4, %v2058_v23  ;;  %vm1763_vm5 = vcmp.eq.s32.totalorder %v1755_v35, 9  ;;  %2291 = vmatpush1.msra.mxu1 %v2270_v63  ;;  %v2277_v4 = vld [vmem:[#allocation5 + $0x90] sm:$0xff] }
 0x5cd   :  { %2075 = vst.msk [vmem:[#allocation3 + $0x288] sm:$0xff] %vm8282_vm0, %v2071_v40  ;;  %2154 = vmatprep.subr.mxu0 %v2081_v8  ;;  %vm1765_vm8 = vmor %vm1761_vm13, %vm1763_vm5  ;;  %2292 = vmatprep.subr.mxu1 %v6710_v57  ;;  %v2263_v23 = vld [vmem:[#allocation5 + $0x20] sm:$0xff]  ;;  %v2262_v40 = vld [vmem:[#allocation5 + $0x18] sm:$0xff]  ;;  %vm5582_vm5 = vmmov 0  }
 0x5ce   :  { %5320 = vmatpush1.msk.msra.mxu0 %vm6871_vm6, %v1828_v5  ;;  %vm1769_vm9 = vmor %vm1765_vm8, %vm1767_vm3  ;;  %2293 = vmatpush1.msra.mxu1 %v2269_v1  ;;  %v2261_v8 = vld [vmem:[#allocation5 + $0x10] sm:$0xff]  ;;  %vm8420_vm3 = vcmask 777216   ;;  %v2548_v63 = vld [vmem:[#allocation7 + $0x58] sm:$0xff] }
 0x5cf   :  { %2156 = vmatprep.subr.mxu0 %v2079_v24  ;;  %2294 = vmatprep.subr.mxu1 %v6710_v57  ;;  %v2259_v24 = vld [vmem:[#allocation5] sm:$0xff]  ;;  %v2546_v1 = vld [vmem:[#allocation7 + $0x48] sm:$0xff] }
 0x5d0   :  { %5322 = vmatpush1.msk.msra.mxu0 %vm6871_vm6, %v6844_v45  ;;  %v2113_v53 = vld [vmem:[#allocation3 + $0x2b0] sm:$0xff]  ;;  %v1754_v45 = vshra.s32 %v5814_v17, 3  ;;  %2295 = vmatpush1.msra.mxu1 %v2268_v22 }
 0x5d1   :  { %2186 = vmatprep.subr.mxu0 %v2113_v53  ;;  %2296 = vmatprep.subr.mxu1 %v6710_v57  ;;  %v2278_v53 = vld [vmem:[#allocation5 + $0x98] sm:$0xff]  ;;  %v2545_v22 = vld [vmem:[#allocation7 + $0x40] sm:$0xff] }
 0x5d2   :  { %5324 = vmatpush2.msk.msra.mxu0 %vm6890_vm12, %v2065_v0  ;;  %vm1760_vm14 = vcmp.eq.s32.totalorder %v1754_v45, 0  ;;  %vm1762_vm11 = vcmp.eq.s32.totalorder %v1754_v45, 9  ;;  %vm1766_vm1 = vcmp.eq.s32.totalorder %v1754_v45, 10  ;;  %vm1770_vm15 = vcmp.eq.s32.totalorder %v1754_v45, 19  ;;  %2297 = vmatpush1.msra.mxu1 %v2267_v15  ;;  %v2260_v0 = vld [vmem:[#allocation5 + $0x8] sm:$0xff]  ;;  %v2544_v15 = vld [vmem:[#allocation7 + $0x38] sm:$0xff] }
 0x5d3   :  { %vm1764_vm0 = vmor %vm1760_vm14, %vm1762_vm11  ;;  %2298 = vmatprep.subr.mxu1 %v6710_v57  ;;  %vm8425_vm11 = vcmask 392192  }
 0x5d4   :  { %v2111_v58 = vld [vmem:[#allocation3 + $0x288] sm:$0xff]  ;;  %vm1768_vm2 = vmor %vm1764_vm0, %vm1766_vm1  ;;  %2299 = vmatpush1.msra.mxu1 %v2266_v44  ;;  %vm8421_vm1 = vcmask 719872   ;;  %vm2377_vm0 = vcmask 654592  }
 0x5d5   :  { %2188 = vmatprep.subr.mxu0 %v2111_v58  ;;  %v2120_v37 = vpop.permute.xlu1 %2119  ;;  %vm6948_vm6 = vmor %vm1768_vm2, %vm1770_vm15  ;;  %vm8418_vm15 = vcmask 523264   ;;  %2300 = vmatprep.subr.mxu1 %v6710_v57  ;;  %v2275_v58 = vld [vmem:[#allocation5 + $0x80] sm:$0xff]  ;;  %vm8419_vm2 = vcmask 1039360   ;;  %v2543_v44 = vld [vmem:[#allocation7 + $0x30] sm:$0xff] }
 0x5d6   :  { %5326 = vmatpush2.msk.msra.mxu0 %vm6890_vm12, %v2064_v38  ;;  %vm6952_vm12 = vmor %vm1769_vm9, %vm1771_vm10  ;;  %vm8416_vm9 = vcmask 1047808   ;;  %vm8417_vm10 = vcmask 261120   ;;  %2301 = vmatpush1.msra.mxu1 %v2265_v25  ;;  %v2276_v38 = vld [vmem:[#allocation5 + $0x88] sm:$0xff]  ;;  %v2352_v25 = vand.u32 3, %v5814_v17 }
 0x5d7   :  { %2191 = vmatmul.mubr.f32.vlgmr.msra.gmra.mxu0 %v2114_v34  ;;  %5144 = vmatprep.subr.mxu0 %v6710_v57  ;;  %vm8422_vm8 = vmmov %vm8417_vm10 }
 0x5d8   :  { %2302 = vmatprep.subr.mxu1 %v6710_v57  ;;  %5162 = vmatprep.mubr.msk.f32.mxu0 %vm5582_vm5, %v6710_v57  ;;  %vm7020_vm14 = vcmp.eq.s32.totalorder %v2352_v25, 3  ;;  %vm8426_vm13 = vmmov %vm8425_vm11  ;;  %vm8303_vm5 = vcmask 588800  }
 0x5d9   :  { %2303 = vmatpush1.msra.mxu1 %v2264_v48 }
 0x5da   :  { %2304 = vmatprep.subr.mxu1 %v6710_v57 }
 0x5db   :  { %2305 = vmatpush1.msra.mxu1 %v2263_v23 }
 0x5dc   :  { %2306 = vmatprep.subr.mxu1 %v6710_v57 }
 0x5dd   :  { %2307 = vmatpush1.msra.mxu1 %v2262_v40 }
 0x5de   :  { %2308 = vmatprep.subr.mxu1 %v6710_v57 }
 0x5df   :  { %2309 = vmatpush1.msra.mxu1 %v2261_v8 }
 0x5e0   :  { %2310 = vmatprep.subr.mxu1 %v6710_v57 }
 0x5e1   :  { %2311 = vmatpush1.msra.mxu1 %v2260_v0 }
 0x5e2   :  { %2312 = vmatprep.subr.mxu1 %v6710_v57 }
 0x5e3   :  { %2313 = vmatpush1.msra.mxu1 %v2259_v24 }
 0x5e4   :  { %2338 = vmatprep.subr.mxu1 %v6710_v57 }
 0x5e5   :  { %2339 = vmatpush2.msra.mxu1 %v2278_v53 }
 0x5e6   :  { %2340 = vmatprep.subr.mxu1 %v6710_v57 }
 0x5e7   :  { %2341 = vmatpush2.msra.mxu1 %v2277_v4 }
 0x5e8   :  { %2342 = vmatprep.subr.mxu1 %v6710_v57 }
 0x5e9   :  { %2343 = vmatpush2.msra.mxu1 %v2276_v38 }
 0x5ea   :  { %2344 = vmatprep.subr.mxu1 %v6710_v57 }
 0x5eb   :  { %2345 = vmatpush2.msra.mxu1 %v2275_v58 }
 0x5ec   :  { %2572 = vmatprep.subr.mxu1 %v2548_v63  ;;  %v2539_v63 = vld [vmem:[#allocation7 + $0x10] sm:$0xff] }
 0x697   :  { %v2192_v27 = vpop.f32.mrf.mxu0 }
 0x698   :  { %v2193_v36 = vadd.f32 %v2192_v27, %v2120_v37 }
 0x699   :  { %v2194_v18 = vpop.f32.mrf.mxu0 }
 0x69a   :  { %v2197_v47 = vmax.f32 %v2193_v36, 0.0  ;;  %v2195_v16 = vadd.f32 %v2194_v18, %v2120_v37 }
 0x69c   :  { %v6958_v28 = vsel %vm6948_vm6, 0.0, %v2197_v47  ;;  %v2198_v32 = vmax.f32 %v2195_v16, 0.0 }
 0x69d   :  { %2217 = vrot.lane.b32.xlu0 %v6958_v28, %s5569_s0 }
 0x69e   :  { %v6964_v51 = vsel %vm6952_vm12, 0.0, %v2198_v32 }
 0x69f   :  { %2219 = vrot.lane.b32.xlu1 %v6964_v51, %s5569_s0 }
 0x70f   :  { %v2218_v54 = vpop.permute.xlu0 %2217 }
 0x710   :  { %2224 = vst.msk [vmem:[#allocation2] sm:$0xff] %vm8416_vm9, %v2218_v54  ;;  %vm7028_vm9 = vcmp.eq.s32.totalorder %v2352_v25, 0 }
 0x711   :  { %v2220_v55 = vpop.permute.xlu1 %2219 }
 0x712   :  { %v2221_v61 = vsel %vm8417_vm10, %v2218_v54, %v2220_v55  ;;  %vm8429_vm10 = vmmov %vm8425_vm11 }
 0x713   :  { %2225 = vst.msk [vmem:[#allocation2 + $0x8] sm:$0xff] %vm8418_vm15, %v2221_v61  ;;  %vm8430_vm15 = vmmov %vm8429_vm10 }
 0x717   :  { %v6972_v5 = vld [vmem:[#allocation2] sm:$0xff] }
 0x718   :  { %2239 = vrot.lane.b32.xlu0 %v6972_v5, %s5570_s30  ;;  %2363 = vst [vmem:[#allocation2] sm:$0xff] %v6710_v57 }
 0x71a   :  { %v2227_v2 = vld [vmem:[#allocation2 + $0x8] sm:$0xff] }
 0x71b   :  { %2241 = vrot.lane.b32.xlu1 %v2227_v2, %s5570_s30  ;;  %2624 = vst [vmem:[#allocation2 + $0x8] sm:$0xff] %v6710_v57  ;;  %s5578_s30 = smov 92  }
 0x71c   :  { %2230 = vrot.lane.b32.xlu0 %v6972_v5, %s5563_s21 }
 0x71f   :  { %2232 = vrot.lane.b32.xlu1 %v2227_v2, %s5563_s21 }
 0x78a   :  { %v2240_v34 = vpop.permute.xlu0 %2239 }
 0x78d   :  { %v2242_v45 = vpop.permute.xlu1 %2241 }
 0x78e   :  { %v2243_v35 = vsel %vm8419_vm2, %v2240_v34, %v2242_v45  ;;  %v2247_v37 = vmax.f32 %v2227_v2, %v2242_v45  ;;  %v2231_v18 = vpop.permute.xlu0 %2230  ;;  %v2547_v2 = vld [vmem:[#allocation7 + $0x50] sm:$0xff]  ;;  %vm8431_vm2 = vmmov %vm8429_vm10 }
 0x78f   :  { %v2246_v27 = vmax.f32 %v6972_v5, %v2243_v35 }
 0x790   :  { %2252 = vrot.lane.b32.xlu1 %v2247_v37, %s5571_s13 }
 0x791   :  { %2250 = vrot.lane.b32.xlu0 %v2246_v27, %s5571_s13  ;;  %v2233_v36 = vpop.permute.xlu1 %2232 }
 0x792   :  { %v2234_v47 = vsel %vm8420_vm3, %v2231_v18, %v2233_v36  ;;  %v2238_v16 = vmax.f32 %v6964_v51, %v2233_v36  ;;  %vm8432_vm3 = vmmov %vm8431_vm2 }
 0x793   :  { %v2237_v54 = vmax.f32 %v6958_v28, %v2234_v47  ;;  %v2453_v28 = vld [vmem:[%s8233_s6] sm:$0xff] }
 0x802   :  { %v2253_v32 = vpop.permute.xlu1 %2252 }
 0x803   :  { %v2258_v55 = vmax.f32 %v2238_v16, %v2253_v32  ;;  %v2251_v61 = vpop.permute.xlu0 %2250 }
 0x804   :  { %v2254_v26 = vsel %vm8421_vm1, %v2251_v61, %v2253_v32  ;;  %vm8433_vm1 = vmmov %vm8431_vm2 }
 0x805   :  { %v2257_v62 = vmax.f32 %v2237_v54, %v2254_v26  ;;  %5085 = vmatprep.mubr.msk.f32.mxu1 %vm8422_vm8, %v2258_v55  ;;  %vm8434_vm8 = vmmov %vm8433_vm1 }
 0x807   :  { %2347 = vmatmul.mubr.f32.vlgmr.msra.gmra.mxu1 %v2257_v62 }
 0x808   :  { %2616 = vmatprep.mubr.f32.mxu1 %v6710_v57  ;;  %2573 = vmatpush1.msra.mxu1 %v2547_v2  ;;  %v2538_v2 = vld [vmem:[#allocation7 + $0x8] sm:$0xff] }
 0x809   :  { %2574 = vmatprep.subr.mxu1 %v2546_v1  ;;  %v2537_v1 = vld [vmem:[#allocation7] sm:$0xff] }
 0x80a   :  { %2575 = vmatpush1.msra.mxu1 %v2545_v22  ;;  %v2353_v22 = vshra.s32 %v5814_v17, 2 }
 0x80b   :  { %2576 = vmatprep.subr.mxu1 %v2544_v15 }
 0x80c   :  { %2577 = vmatpush1.msra.mxu1 %v2543_v44 }
 0x8c7   :  { %v2348_v56 = vpop.f32.mrf.mxu1 }
 0x8c8   :  { %2374 = vrot.lane.b32.xlu0 %v2348_v56, %s5569_s0  ;;  %v2452_v56 = vld [vmem:[%s8232_s5] sm:$0xff] }
 0x8c9   :  { %v2350_v5 = vpop.f32.mrf.mxu1 }
 0x93a   :  { %v2375_v6 = vpop.permute.xlu0 %2374 }
 0x93b   :  { %2378 = vst.msk [vmem:[#allocation2] sm:$0xff] %vm2377_vm0, %v2375_v6  ;;  %vm8435_vm0 = vmmov %vm8433_vm1  ;;  %v2542_v6 = vld [vmem:[#allocation7 + $0x28] sm:$0xff] }
 0x93c   :  { %2578 = vmatprep.subr.mxu1 %v2542_v6  ;;  %v2911_v6 = vld [vmem:[#allocation9 + $0x118] sm:$0xff] }
 0x942   :  { %v2436_v51 = vld [vmem:[#allocation2] sm:$0xff] }
 0x943   :  { %2438 = vrot.lane.b32.xlu1 %v2436_v51, %s5577_s3  ;;  %2432 = vrot.lane.b32.xlu0 %v2436_v51, %s5578_s30  ;;  %2623 = vst [vmem:[#allocation2] sm:$0xff] %v6710_v57 }
 0x947   :  { %2425 = vrot.lane.b32.xlu1 %v2436_v51, %s5579_s28  ;;  %2418 = vrot.lane.b32.xlu0 %v2436_v51, %s5563_s21 }
 0x94b   :  { %2412 = vrot.lane.b32.xlu1 %v2436_v51, %s5566_s24  ;;  %2405 = vrot.lane.b32.xlu0 %v2436_v51, %s5562_s20 }
 0x94f   :  { %2398 = vrot.lane.b32.xlu1 %v2436_v51, %s5580_s19  ;;  %2390 = vrot.lane.b32.xlu0 %v2436_v51, %s5581_s29 }
 0x953   :  { %2456 = vperm.xlu0 %5224, %v2453_v28   ;;  %2383 = vrot.lane.b32.xlu1 %v2436_v51, %s5583_s16  ;;  %v2541_v51 = vld [vmem:[#allocation7 + $0x20] sm:$0xff]  ;;  %v2540_v28 = vld [vmem:[#allocation7 + $0x18] sm:$0xff] }
 0x954   :  { %2579 = vmatpush1.msra.mxu1 %v2541_v51  ;;  %v2907_v51 = vld [vmem:[#allocation9 + $0xf8] sm:$0xff] }
 0x955   :  { %2580 = vmatprep.subr.mxu1 %v2540_v28  ;;  %v2906_v28 = vld [vmem:[#allocation9 + $0xf0] sm:$0xff] }
 0x956   :  { %2581 = vmatpush1.msra.mxu1 %v2539_v63  ;;  %v2902_v63 = vld [vmem:[#allocation9 + $0xd0] sm:$0xff] }
 0x957   :  { %2582 = vmatprep.subr.mxu1 %v2538_v2  ;;  %v2901_v2 = vld [vmem:[#allocation9 + $0xc8] sm:$0xff] }
 0x958   :  { %2583 = vmatpush1.msra.mxu1 %v2537_v1  ;;  %v2897_v1 = vld [vmem:[#allocation9 + $0xa8] sm:$0xff] }
 0x9b5   :  { %v2439_v23 = vpop.permute.xlu1 %2438  ;;  %v2433_v40 = vpop.permute.xlu0 %2432 }
 0x9b6   :  { %v2441_v8 = vsel %vm7020_vm14, 0.0, %v2439_v23  ;;  %2435 = vst.msk [vmem:[#allocation3 + $0x118] sm:$0xff] %vm8425_vm11, %v2433_v40  ;;  %vm2357_vm11 = vcmp.eq.s32.totalorder %v2353_v22, 5 }
 0x9b7   :  { %2442 = vst.msk [vmem:[#allocation3 + $0x140] sm:$0xff] %vm8426_vm13, %v2441_v8 }
 0x9b9   :  { %v2426_v24 = vpop.permute.xlu1 %2425  ;;  %v2419_v53 = vpop.permute.xlu0 %2418 }
 0x9ba   :  { %v2428_v4 = vsel %vm7028_vm9, 0.0, %v2426_v24  ;;  %v2421_v38 = vsel %vm7020_vm14, 0.0, %v2419_v53 }
 0x9bb   :  { %2429 = vst.msk [vmem:[#allocation3 + $0xf0] sm:$0xff] %vm8429_vm10, %v2428_v4  ;;  %v7070_v4 = vld [vmem:[#allocation2 + $0x20] sm:$0xff] }
 0x9bc   :  { %2422 = vst.msk [vmem:[#allocation3 + $0xc8] sm:$0xff] %vm8430_vm15, %v2421_v38  ;;  %vm2361_vm15 = vcmp.eq.s32.totalorder %v2353_v22, 11 }
 0x9bd   :  { %v2413_v58 = vpop.permute.xlu1 %2412  ;;  %v2406_v34 = vpop.permute.xlu0 %2405  ;;  %v2450_v37 = vld [vmem:[#allocation3 + $0x118] sm:$0xff] }
 0x9be   :  { %2415 = vst.msk [vmem:[#allocation3 + $0xa0] sm:$0xff] %vm8431_vm2, %v2413_v58  ;;  %v2408_v45 = vsel %vm7028_vm9, 0.0, %v2406_v34  ;;  %v2451_v35 = vld [vmem:[#allocation3 + $0x140] sm:$0xff]  ;;  %v2792_v58 = vld [vmem:[%s8235_s8] sm:$0xff] }
 0x9bf   :  { %2409 = vst.msk [vmem:[#allocation3 + $0x78] sm:$0xff] %vm8432_vm3, %v2408_v45  ;;  %5145 = vmatpush3.msra.mxu0 %v2451_v35  ;;  %vm8436_vm3 = vmmov %vm8435_vm0  ;;  %v2952_v34 = vld [vmem:[#allocation9 + $0x260] sm:$0xff]  ;;  %v2951_v45 = vld [vmem:[#allocation9 + $0x258] sm:$0xff] }
 0x9c0   :  { %5146 = vmatprep.subr.mxu0 %v6710_v57  ;;  %2979 = vmatprep.subr.mxu1 %v2952_v34  ;;  %v2947_v35 = vld [vmem:[#allocation9 + $0x238] sm:$0xff] }
 0x9c1   :  { %5147 = vmatpush3.msra.mxu0 %v2450_v37  ;;  %v2399_v27 = vpop.permute.xlu1 %2398  ;;  %v2391_v36 = vpop.permute.xlu0 %2390  ;;  %v2946_v37 = vld [vmem:[#allocation9 + $0x230] sm:$0xff] }
 0x9c2   :  { %v2401_v18 = vsel %vm7020_vm14, 0.0, %v2399_v27  ;;  %2393 = vst.msk [vmem:[#allocation3 + $0x28] sm:$0xff] %vm8433_vm1, %v2391_v36  ;;  %5148 = vmatprep.subr.mxu0 %v6710_v57  ;;  %v2449_v47 = vld [vmem:[#allocation3 + $0xf0] sm:$0xff]  ;;  %vm2356_vm14 = vcmp.eq.s32.totalorder %v2353_v22, 0  ;;  %vm8437_vm1 = vcmask 1047808   ;;  %v2942_v27 = vld [vmem:[#allocation9 + $0x210] sm:$0xff] }
 0x9c3   :  { %2402 = vst.msk [vmem:[#allocation3 + $0x50] sm:$0xff] %vm8434_vm8, %v2401_v18  ;;  %5149 = vmatpush3.msra.mxu0 %v2449_v47  ;;  %v2448_v16 = vld [vmem:[#allocation3 + $0xc8] sm:$0xff]  ;;  %vm2358_vm13 = vmor %vm2356_vm14, %vm2357_vm11  ;;  %vm8438_vm8 = vcmask 261120   ;;  %v2941_v36 = vld [vmem:[#allocation9 + $0x208] sm:$0xff] }
 0x9c4   :  { %5150 = vmatprep.subr.mxu0 %v6710_v57  ;;  %v2937_v18 = vld [vmem:[#allocation9 + $0x1e8] sm:$0xff]  ;;  %v2936_v47 = vld [vmem:[#allocation9 + $0x1e0] sm:$0xff]  ;;  %vm8440_vm14 = vmmov %vm8438_vm8 }
 0x9c5   :  { %5151 = vmatpush3.msra.mxu0 %v2448_v16  ;;  %v2384_v32 = vpop.permute.xlu1 %2383  ;;  %v2447_v54 = vld [vmem:[#allocation3 + $0xa0] sm:$0xff]  ;;  %v2932_v16 = vld [vmem:[#allocation9 + $0x1c0] sm:$0xff]  ;;  %vm8441_vm11 = vmmov %vm8438_vm8 }
 0x9c6   :  { %v2386_v55 = vsel %vm7028_vm9, 0.0, %v2384_v32  ;;  %5152 = vmatprep.subr.mxu0 %v6710_v57  ;;  %v2446_v61 = vld [vmem:[#allocation3 + $0x78] sm:$0xff]  ;;  %vm2359_vm9 = vcmp.eq.s32.totalorder %v2353_v22, 6  ;;  %v2931_v32 = vld [vmem:[#allocation9 + $0x1b8] sm:$0xff] }
 0x9c7   :  { %2387 = vst.msk [vmem:[#allocation3] sm:$0xff] %vm8435_vm0, %v2386_v55  ;;  %5153 = vmatpush3.msra.mxu0 %v2447_v54  ;;  %vm2360_vm10 = vmor %vm2358_vm13, %vm2359_vm9  ;;  %vm8439_vm0 = vcmask 523264   ;;  %v2927_v54 = vld [vmem:[#allocation9 + $0x198] sm:$0xff]  ;;  %v2926_v55 = vld [vmem:[#allocation9 + $0x190] sm:$0xff]  ;;  %vm8442_vm13 = vcmask 711680  }
 0x9c8   :  { %5154 = vmatprep.subr.mxu0 %v6710_v57  ;;  %vm2362_vm2 = vmor %vm2360_vm10, %vm2361_vm15  ;;  %v2896_v22 = vld [vmem:[#allocation9 + $0xa0] sm:$0xff]  ;;  %vm8444_vm10 = vnez %v8407_v33  ;;  %vm8445_vm15 = vcmask 719872   ;;  %v2949_v33 = vld [vmem:[#allocation9 + $0x248] sm:$0xff] }
 0x9c9   :  { %5155 = vmatpush3.msra.mxu0 %v2446_v61  ;;  %v2444_v62 = vld [vmem:[#allocation3 + $0x28] sm:$0xff]  ;;  %vm8443_vm9 = vmmov %vm8438_vm8 }
 0x9ca   :  { %5156 = vmatprep.subr.mxu0 %v6710_v57  ;;  %v2445_v26 = vld [vmem:[#allocation3 + $0x50] sm:$0xff]  ;;  %v2922_v61 = vld [vmem:[#allocation9 + $0x170] sm:$0xff] }
 0x9cb   :  { %5157 = vmatpush3.msra.mxu0 %v2445_v26  ;;  %v2921_v26 = vld [vmem:[#allocation9 + $0x168] sm:$0xff] }
 0x9cc   :  { %5158 = vmatprep.subr.mxu0 %v6710_v57 }
 0x9cd   :  { %5159 = vmatpush3.msra.mxu0 %v2444_v62  ;;  %v2917_v62 = vld [vmem:[#allocation9 + $0x148] sm:$0xff] }
 0x9ce   :  { %5160 = vmatprep.subr.mxu0 %v6710_v57  ;;  %v2443_v5 = vld [vmem:[#allocation3] sm:$0xff] }
 0x9cf   :  { %5161 = vmatpush3.msra.mxu0 %v2443_v5  ;;  %v2912_v5 = vld [vmem:[#allocation9 + $0x120] sm:$0xff] }
 0x9d0   :  { %5163 = vmatmul.mubr.msk.f32.vlgmr.msra.gmra.mxu0 %vm8303_vm5, %v2452_v56  ;;  %v2916_v56 = vld [vmem:[#allocation9 + $0x140] sm:$0xff] }
 0x9d1   :  { %2865 = vmatprep.mubr.f32.mxu0 %v6710_v57  ;;  %v2457_v57 = vpop.permute.xlu0 %2456 }
 0xa90   :  { %v2529_v15 = vpop.f32.mrf.mxu0 }
 0xa91   :  { %v2530_v44 = vadd.f32 %v2529_v15, %v2457_v57  ;;  %v2892_v57 = vld [vmem:[#allocation9 + $0x80] sm:$0xff]  ;;  %v2891_v15 = vld [vmem:[#allocation9 + $0x78] sm:$0xff] }
 0xa92   :  { %v5164_v25 = vpop.f32.mrf.mxu0 }
 0xa93   :  { %v2533_v48 = vmax.f32 %v2530_v44, 0.0  ;;  %v2887_v44 = vld [vmem:[#allocation9 + $0x58] sm:$0xff]  ;;  %v2886_v25 = vld [vmem:[#allocation9 + $0x50] sm:$0xff] }
 0xa95   :  { %v2536_v23 = vsel %vm2362_vm2, 0.0, %v2533_v48  ;;  %v2882_v48 = vld [vmem:[#allocation9 + $0x30] sm:$0xff]  ;;  %vm8446_vm2 = vmmov %vm8438_vm8 }
 0xa96   :  { %5087 = vmatmul.mubr.msk.f32.vlgmr.msra.gmra.mxu1 %vm8436_vm3, %v2536_v23  ;;  %v2881_v23 = vld [vmem:[#allocation9 + $0x28] sm:$0xff]  ;;  %vm8447_vm3 = vcmask 728064  }
 0xa97   :  { %2980 = vmatpush1.msra.mxu1 %v2951_v45 }
 0xa98   :  { %2981 = vmatprep.subr.mxu1 %v2947_v35 }
 0xa99   :  { %2982 = vmatpush1.msra.mxu1 %v2946_v37 }
 0xa9a   :  { %2983 = vmatprep.subr.mxu1 %v2942_v27 }
 0xa9b   :  { %2984 = vmatpush1.msra.mxu1 %v2941_v36 }
 0xa9c   :  { %2985 = vmatprep.subr.mxu1 %v2937_v18 }
 0xa9d   :  { %2986 = vmatpush1.msra.mxu1 %v2936_v47 }
 0xa9e   :  { %2987 = vmatprep.subr.mxu1 %v2932_v16 }
 0xa9f   :  { %2988 = vmatpush1.msra.mxu1 %v2931_v32 }
 0xaa0   :  { %2989 = vmatprep.subr.mxu1 %v2927_v54 }
 0xaa1   :  { %2990 = vmatpush1.msra.mxu1 %v2926_v55 }
 0xaa2   :  { %2991 = vmatprep.subr.mxu1 %v2922_v61 }
 0xaa3   :  { %2992 = vmatpush1.msra.mxu1 %v2921_v26 }
 0xaa4   :  { %2993 = vmatprep.subr.mxu1 %v2917_v62 }
 0xaa5   :  { %2994 = vmatpush1.msra.mxu1 %v2916_v56 }
 0xaa6   :  { %2995 = vmatprep.subr.mxu1 %v2912_v5 }
 0xaa7   :  { %2996 = vmatpush1.msra.mxu1 %v2911_v6 }
 0xaa8   :  { %2997 = vmatprep.subr.mxu1 %v2907_v51 }
 0xaa9   :  { %2998 = vmatpush1.msra.mxu1 %v2906_v28 }
 0xaaa   :  { %2999 = vmatprep.subr.mxu1 %v2902_v63 }
 0xaab   :  { %3000 = vmatpush1.msra.mxu1 %v2901_v2 }
 0xaac   :  { %3001 = vmatprep.subr.mxu1 %v2897_v1 }
 0xaad   :  { %3002 = vmatpush1.msra.mxu1 %v2896_v22 }
 0xaae   :  { %3003 = vmatprep.subr.mxu1 %v2892_v57 }
 0xaaf   :  { %3004 = vmatpush1.msra.mxu1 %v2891_v15 }
 0xab0   :  { %3005 = vmatprep.subr.mxu1 %v2887_v44 }
 0xab1   :  { %3006 = vmatpush1.msra.mxu1 %v2886_v25 }
 0xab2   :  { %3007 = vmatprep.subr.mxu1 %v2882_v48 }
 0xab3   :  { %3008 = vmatpush1.msra.mxu1 %v2881_v23 }
 0xb56   :  { %v2618_v40 = vpop.f32.mrf.mxu1 }
 0xb57   :  { %2635 = vrot.lane.b32.xlu1 %v2618_v40, %s5569_s0  ;;  %v2877_v40 = vld [vmem:[#allocation9 + $0x8] sm:$0xff] }
 0xb58   :  { %v2620_v8 = vpop.f32.mrf.mxu1  ;;  %3009 = vmatprep.subr.mxu1 %v2877_v40 }
 0xb59   :  { %2637 = vrot.lane.b32.xlu0 %v2620_v8, %s5569_s0  ;;  %v2876_v8 = vld [vmem:[#allocation9] sm:$0xff] }
 0xb5a   :  { %3010 = vmatpush1.msra.mxu1 %v2876_v8 }
 0xbc9   :  { %v2636_v17 = vpop.permute.xlu1 %2635 }
 0xbca   :  { %2642 = vst.msk [vmem:[#allocation2] sm:$0xff] %vm8437_vm1, %v2636_v17  ;;  %vm8448_vm1 = vmmov %vm8446_vm2 }
 0xbcb   :  { %v2638_v0 = vpop.permute.xlu0 %2637 }
 0xbcc   :  { %v2639_v24 = vsel %vm8438_vm8, %v2636_v17, %v2638_v0  ;;  %vm8449_vm8 = vcmask 777216  }
 0xbcd   :  { %2643 = vst.msk [vmem:[#allocation2 + $0x8] sm:$0xff] %vm8439_vm0, %v2639_v24  ;;  %vm8450_vm0 = vnez %v8403_v52  ;;  %v2929_v52 = vld [vmem:[#allocation9 + $0x1a8] sm:$0xff] }
 0xbd1   :  { %v2758_v53 = vld [vmem:[#allocation2] sm:$0xff] }
 0xbd2   :  { %2762 = vrot.lane.b32.xlu1 %v2758_v53, %s5576_s2  ;;  %3191 = vst [vmem:[#allocation2] sm:$0xff] %v7070_v4 }
 0xbd4   :  { %v2759_v38 = vld [vmem:[#allocation2 + $0x8] sm:$0xff] }
 0xbd5   :  { %2764 = vrot.lane.b32.xlu0 %v2759_v38, %s5576_s2 }
 0xbd6   :  { %2749 = vrot.lane.b32.xlu1 %v2758_v53, %s5571_s13 }
 0xbd9   :  { %2751 = vrot.lane.b32.xlu0 %v2759_v38, %s5571_s13 }
 0xbda   :  { %2734 = vrot.lane.b32.xlu1 %v2758_v53, %s5572_s25 }
 0xbdd   :  { %2736 = vrot.lane.b32.xlu0 %v2759_v38, %s5572_s25 }
 0xbde   :  { %2719 = vrot.lane.b32.xlu1 %v2758_v53, %s5563_s21 }
 0xbe1   :  { %2721 = vrot.lane.b32.xlu0 %v2759_v38, %s5563_s21 }
 0xbe2   :  { %2706 = vrot.lane.b32.xlu1 %v2758_v53, %s5566_s24 }
 0xbe5   :  { %2708 = vrot.lane.b32.xlu0 %v2759_v38, %s5566_s24 }
 0xbe6   :  { %2691 = vrot.lane.b32.xlu1 %v2758_v53, %s5562_s20 }
 0xbe9   :  { %2693 = vrot.lane.b32.xlu0 %v2759_v38, %s5562_s20 }
 0xbea   :  { %2676 = vrot.lane.b32.xlu1 %v2758_v53, %s5573_s15 }
 0xbed   :  { %2678 = vrot.lane.b32.xlu0 %v2759_v38, %s5573_s15 }
 0xbee   :  { %2663 = vrot.lane.b32.xlu1 %v2758_v53, %s5574_s26 }
 0xbf1   :  { %2665 = vrot.lane.b32.xlu0 %v2759_v38, %s5574_s26 }
 0xbf2   :  { %2648 = vrot.lane.b32.xlu1 %v2758_v53, %s5575_s27 }
 0xbf5   :  { %2650 = vrot.lane.b32.xlu0 %v2759_v38, %s5575_s27 }
 0xbf6   :  { %2795 = vperm.xlu1 %5223, %v2792_v58  }
 0xc44   :  { %v2763_v17 = vpop.permute.xlu1 %2762 }
 0xc47   :  { %v2765_v0 = vpop.permute.xlu0 %2764 }
 0xc48   :  { %v2770_v24 = vsel %vm6796_vm7, 0.0, %v2765_v0  ;;  %v2750_v53 = vpop.permute.xlu1 %2749  ;;  %v2766_v34 = vsel %vm8442_vm13, %v2763_v17, %v2765_v0  ;;  %vm8453_vm13 = vmmov %vm8448_vm1 }
 0xc49   :  { %2772 = vst.msk [vmem:[#allocation3 + $0x148] sm:$0xff] %vm8440_vm14, %v2770_v24  ;;  %vm8451_vm14 = vmmov %vm8448_vm1 }
 0xc4b   :  { %v2752_v38 = vpop.permute.xlu0 %2751 }
 0xc4c   :  { %2757 = vst.msk [vmem:[#allocation3 + $0x120] sm:$0xff] %vm8441_vm11, %v2752_v38  ;;  %v2735_v58 = vpop.permute.xlu1 %2734  ;;  %v2753_v47 = vsel %vm8445_vm15, %v2750_v53, %v2752_v38  ;;  %vm8452_vm11 = vcmask 785408   ;;  %vm8455_vm15 = vmmov %vm8448_vm1  ;;  %v2954_v53 = vld [vmem:[#allocation9 + $0x270] sm:$0xff]  ;;  %v2953_v38 = vld [vmem:[#allocation9 + $0x268] sm:$0xff] }
 0xc4f   :  { %v2737_v45 = vpop.permute.xlu0 %2736 }
 0xc50   :  { %v2742_v35 = vsel %vm6784_vm4, 0.0, %v2737_v45  ;;  %v2720_v37 = vpop.permute.xlu1 %2719  ;;  %v2790_v27 = vld [vmem:[#allocation3 + $0x148] sm:$0xff]  ;;  %v2738_v54 = vsel %vm8447_vm3, %v2735_v58, %v2737_v45  ;;  %vm8458_vm3 = vcmask 850944   ;;  %v2948_v58 = vld [vmem:[#allocation9 + $0x240] sm:$0xff] }
 0xc51   :  { %2744 = vst.msk [vmem:[#allocation3 + $0xf8] sm:$0xff] %vm8443_vm9, %v2742_v35  ;;  %2815 = vmatprep.subr.mxu0 %v2790_v27  ;;  %vm8454_vm9 = vcmask 793600   ;;  %v2943_v45 = vld [vmem:[#allocation9 + $0x218] sm:$0xff]  ;;  %v2934_v27 = vld [vmem:[#allocation9 + $0x1d0] sm:$0xff] }
 0xc52   :  { %5328 = vmatpush1.msk.msra.mxu0 %vm8444_vm10, %v2766_v34  ;;  %v2944_v34 = vld [vmem:[#allocation9 + $0x220] sm:$0xff]  ;;  %v2939_v35 = vld [vmem:[#allocation9 + $0x1f8] sm:$0xff] }
 0xc53   :  { %v2722_v36 = vpop.permute.xlu0 %2721  ;;  %v2788_v18 = vld [vmem:[#allocation3 + $0x120] sm:$0xff] }
 0xc54   :  { %v2727_v16 = vsel %vm6796_vm7, 0.0, %v2722_v36  ;;  %2817 = vmatprep.subr.mxu0 %v2788_v18  ;;  %v2707_v32 = vpop.permute.xlu1 %2706  ;;  %v2723_v26 = vsel %vm8449_vm8, %v2720_v37, %v2722_v36  ;;  %v2938_v37 = vld [vmem:[#allocation9 + $0x1f0] sm:$0xff]  ;;  %v2933_v36 = vld [vmem:[#allocation9 + $0x1c8] sm:$0xff]  ;;  %v2928_v18 = vld [vmem:[#allocation9 + $0x1a0] sm:$0xff] }
 0xc55   :  { %2729 = vst.msk [vmem:[#allocation3 + $0xd0] sm:$0xff] %vm8446_vm2, %v2727_v16  ;;  %2818 = vmatpush1.msra.mxu0 %v2753_v47  ;;  %vm8456_vm2 = vcmask 842752   ;;  %v2924_v47 = vld [vmem:[#allocation9 + $0x180] sm:$0xff]  ;;  %v2923_v16 = vld [vmem:[#allocation9 + $0x178] sm:$0xff] }
 0xc57   :  { %v2709_v55 = vpop.permute.xlu0 %2708 }
 0xc58   :  { %2714 = vst.msk [vmem:[#allocation3 + $0xa8] sm:$0xff] %vm8448_vm1, %v2709_v55  ;;  %v2786_v61 = vld [vmem:[#allocation3 + $0xf8] sm:$0xff]  ;;  %v2692_v62 = vpop.permute.xlu1 %2691  ;;  %v2710_v63 = vsel %vm8452_vm11, %v2707_v32, %v2709_v55  ;;  %v2919_v32 = vld [vmem:[#allocation9 + $0x158] sm:$0xff]  ;;  %v2914_v55 = vld [vmem:[#allocation9 + $0x130] sm:$0xff] }
 0xc59   :  { %2819 = vmatprep.subr.mxu0 %v2786_v61  ;;  %v2913_v61 = vld [vmem:[#allocation9 + $0x128] sm:$0xff] }
 0xc5a   :  { %5330 = vmatpush1.msk.msra.mxu0 %vm8450_vm0, %v2738_v54  ;;  %v2918_v54 = vld [vmem:[#allocation9 + $0x150] sm:$0xff] }
 0xc5b   :  { %v2694_v56 = vpop.permute.xlu0 %2693 }
 0xc5c   :  { %v2699_v5 = vsel %vm6784_vm4, 0.0, %v2694_v56  ;;  %v2784_v6 = vld [vmem:[#allocation3 + $0xd0] sm:$0xff]  ;;  %v2677_v1 = vpop.permute.xlu1 %2676  ;;  %v2695_v22 = vsel %vm8454_vm9, %v2692_v62, %v2694_v56 }
 0xc5d   :  { %2701 = vst.msk [vmem:[#allocation3 + $0x80] sm:$0xff] %vm8451_vm14, %v2699_v5  ;;  %2821 = vmatprep.subr.mxu0 %v2784_v6  ;;  %v2908_v62 = vld [vmem:[#allocation9 + $0x100] sm:$0xff]  ;;  %v2903_v5 = vld [vmem:[#allocation9 + $0xd8] sm:$0xff] }
 0xc5e   :  { %5332 = vmatpush1.msk.msra.mxu0 %vm8444_vm10, %v2723_v26  ;;  %v2909_v26 = vld [vmem:[#allocation9 + $0x108] sm:$0xff]  ;;  %v2904_v56 = vld [vmem:[#allocation9 + $0xe0] sm:$0xff]  ;;  %v2899_v6 = vld [vmem:[#allocation9 + $0xb8] sm:$0xff] }
 0xc5f   :  { %v2679_v51 = vpop.permute.xlu0 %2678  ;;  %v2782_v28 = vld [vmem:[#allocation3 + $0xa8] sm:$0xff] }
 0xc60   :  { %v2684_v2 = vsel %vm6796_vm7, 0.0, %v2679_v51  ;;  %2823 = vmatprep.subr.mxu0 %v2782_v28  ;;  %v2680_v44 = vsel %vm8456_vm2, %v2677_v1, %v2679_v51  ;;  %v2664_v25 = vpop.permute.xlu1 %2663  ;;  %vm8457_vm7 = vmmov %vm8448_vm1  ;;  %vm8459_vm1 = vcmask 859136   ;;  %v2898_v51 = vld [vmem:[#allocation9 + $0xb0] sm:$0xff]  ;;  %v2888_v1 = vld [vmem:[#allocation9 + $0x60] sm:$0xff] }
 0xc61   :  { %2686 = vst.msk [vmem:[#allocation3 + $0x58] sm:$0xff] %vm8453_vm13, %v2684_v2  ;;  %2824 = vmatpush1.msra.mxu0 %v2710_v63  ;;  %v2894_v28 = vld [vmem:[#allocation9 + $0x90] sm:$0xff]  ;;  %v2893_v63 = vld [vmem:[#allocation9 + $0x88] sm:$0xff]  ;;  %vm8461_vm8 = vmmov %vm8457_vm7  ;;  %vm8468_vm13 = vcmask 785408  }
 0xc62   :  { %v2889_v2 = vld [vmem:[#allocation9 + $0x68] sm:$0xff] }
 0xc63   :  { %v2666_v57 = vpop.permute.xlu0 %2665 }
 0xc64   :  { %2671 = vst.msk [vmem:[#allocation3 + $0x30] sm:$0xff] %vm8455_vm15, %v2666_v57  ;;  %v2780_v15 = vld [vmem:[#allocation3 + $0x80] sm:$0xff]  ;;  %v2667_v8 = vsel %vm8458_vm3, %v2664_v25, %v2666_v57  ;;  %v2649_v17 = vpop.permute.xlu1 %2648  ;;  %v2883_v57 = vld [vmem:[#allocation9 + $0x38] sm:$0xff]  ;;  %vm8470_vm15 = vcmask 646144  }
 0xc65   :  { %2825 = vmatprep.subr.mxu0 %v2780_v15  ;;  %v2879_v15 = vld [vmem:[#allocation9 + $0x18] sm:$0xff]  ;;  %v2878_v25 = vld [vmem:[#allocation9 + $0x10] sm:$0xff]  ;;  %vm8471_vm2 = vmmov %vm8470_vm15 }
 0xc66   :  { %5334 = vmatpush1.msk.msra.mxu0 %vm8450_vm0, %v2695_v22  ;;  %v2884_v22 = vld [vmem:[#allocation9 + $0x40] sm:$0xff] }
 0xc67   :  { %v2651_v12 = vpop.permute.xlu0 %2650 }
 0xc68   :  { %v2656_v48 = vsel %vm6784_vm4, 0.0, %v2651_v12  ;;  %v2778_v23 = vld [vmem:[#allocation3 + $0x58] sm:$0xff]  ;;  %v2652_v0 = vsel %vm8459_vm1, %v2649_v17, %v2651_v12  ;;  %v2971_v12 = vld [vmem:[#allocation9 + $0x2f8] sm:$0xff]  ;;  %vm5090_vm4 = vmneg %vm6948_vm6  ;;  %vm8475_vm1 = vnez %v8337_v30 }
 0xc69   :  { %2658 = vst.msk [vmem:[#allocation3 + $0x8] sm:$0xff] %vm8457_vm7, %v2656_v48  ;;  %2827 = vmatprep.subr.mxu0 %v2778_v23  ;;  %v2974_v48 = vld [vmem:[#allocation9 + $0x310] sm:$0xff]  ;;  %v2967_v23 = vld [vmem:[#allocation9 + $0x2d8] sm:$0xff]  ;;  %v2969_v17 = vld [vmem:[#allocation9 + $0x2e8] sm:$0xff] }
 0xc6a   :  { %5336 = vmatpush1.msk.msra.mxu0 %vm8444_vm10, %v2680_v44  ;;  %v2972_v44 = vld [vmem:[#allocation9 + $0x300] sm:$0xff]  ;;  %vm8460_vm10 = vmmov %vm8457_vm7 }
 0xc6b   :  { %v2776_v40 = vld [vmem:[#allocation3 + $0x30] sm:$0xff]  ;;  %3035 = vmatprep.subr.mxu1 %v2972_v44  ;;  %v2965_v44 = vld [vmem:[#allocation9 + $0x2c8] sm:$0xff] }
 0xc6c   :  { %2829 = vmatprep.subr.mxu0 %v2776_v40  ;;  %3036 = vmatpush2.msra.mxu1 %v2971_v12  ;;  %v2973_v40 = vld [vmem:[#allocation9 + $0x308] sm:$0xff] }
 0xc6d   :  { %2830 = vmatpush1.msra.mxu0 %v2667_v8  ;;  %v2966_v8 = vld [vmem:[#allocation9 + $0x2d0] sm:$0xff]  ;;  %3037 = vmatprep.subr.mxu1 %v2967_v23 }
 0xc6e   :  { %3038 = vmatpush2.msra.mxu1 %v2966_v8 }
 0xc70   :  { %v2774_v24 = vld [vmem:[#allocation3 + $0x8] sm:$0xff] }
 0xc71   :  { %2831 = vmatprep.subr.mxu0 %v2774_v24  ;;  %v2968_v24 = vld [vmem:[#allocation9 + $0x2e0] sm:$0xff] }
 0xc72   :  { %5338 = vmatpush1.msk.msra.mxu0 %vm8450_vm0, %v2652_v0  ;;  %v2962_v0 = vld [vmem:[#allocation9 + $0x2b0] sm:$0xff]  ;;  %vm8462_vm0 = vmmov %vm8457_vm7  ;;  %vm8472_vm7 = vnez %v8339_v31 }
 0xc73   :  { %5088 = vmatmul.mubr.msk.f32.vlgmr.msra.gmra.mxu0 %vm8303_vm5, %v2791_v19  ;;  %3050 = vmatprep.subr.mxu0 %v2954_v53  ;;  %v2961_v19 = vld [vmem:[#allocation9 + $0x2a8] sm:$0xff]  ;;  %v2964_v53 = vld [vmem:[#allocation9 + $0x2c0] sm:$0xff]  ;;  %vm8464_vm6 = vmmov %vm8462_vm0 }
 0xc74   :  { %3051 = vmatpush1.msra.mxu0 %v2953_v38  ;;  %v2957_v38 = vld [vmem:[#allocation9 + $0x288] sm:$0xff]  ;;  %3039 = vmatprep.subr.mxu1 %v2962_v0  ;;  %vm8466_vm14 = vmmov %vm8462_vm0 }
 0xc75   :  { %3052 = vmatprep.subr.mxu0 %v2949_v33  ;;  %v2963_v33 = vld [vmem:[#allocation9 + $0x2b8] sm:$0xff]  ;;  %3040 = vmatpush2.msra.mxu1 %v2961_v19  ;;  %vm8467_vm11 = vmmov %vm8462_vm0 }
 0xc76   :  { %3053 = vmatpush1.msra.mxu0 %v2948_v58  ;;  %v2956_v58 = vld [vmem:[#allocation9 + $0x280] sm:$0xff]  ;;  %3041 = vmatprep.subr.mxu1 %v2957_v38  ;;  %vm8469_vm9 = vmmov %vm8462_vm0 }
 0xc77   :  { %3054 = vmatprep.subr.mxu0 %v2944_v34  ;;  %v2959_v34 = vld [vmem:[#allocation9 + $0x298] sm:$0xff]  ;;  %3042 = vmatpush2.msra.mxu1 %v2956_v58  ;;  %vm7256_vm3 = vmneg %vm8472_vm7 }
 0xc78   :  { %3055 = vmatpush1.msra.mxu0 %v2943_v45  ;;  %v2958_v45 = vld [vmem:[#allocation9 + $0x290] sm:$0xff]  ;;  %3121 = vmatprep.subr.mxu1 %v7070_v4 }
 0xc79   :  { %3056 = vmatprep.subr.mxu0 %v2939_v35 }
 0xc7a   :  { %3057 = vmatpush1.msra.mxu0 %v2938_v37  ;;  %v2796_v37 = vpop.permute.xlu1 %2795 }
 0xc7b   :  { %3058 = vmatprep.subr.mxu0 %v2934_v27 }
 0xc7c   :  { %3059 = vmatpush1.msra.mxu0 %v2933_v36 }
 0xc7d   :  { %3060 = vmatprep.subr.mxu0 %v2929_v52 }
 0xc7e   :  { %3061 = vmatpush1.msra.mxu0 %v2928_v18 }
 0xc7f   :  { %3062 = vmatprep.subr.mxu0 %v2924_v47 }
 0xc80   :  { %3063 = vmatpush1.msra.mxu0 %v2923_v16 }
 0xc81   :  { %3064 = vmatprep.subr.mxu0 %v2919_v32  ;;  %v2955_v32 = vld [vmem:[#allocation9 + $0x278] sm:$0xff] }
 0xc82   :  { %3065 = vmatpush1.msra.mxu0 %v2918_v54  ;;  %v2950_v54 = vld [vmem:[#allocation9 + $0x250] sm:$0xff] }
 0xc83   :  { %3066 = vmatprep.subr.mxu0 %v2914_v55  ;;  %v2940_v55 = vld [vmem:[#allocation9 + $0x200] sm:$0xff] }
 0xc84   :  { %3067 = vmatpush1.msra.mxu0 %v2913_v61  ;;  %v2935_v61 = vld [vmem:[#allocation9 + $0x1d8] sm:$0xff] }
 0xc85   :  { %3068 = vmatprep.subr.mxu0 %v2909_v26  ;;  %v2930_v26 = vld [vmem:[#allocation9 + $0x1b0] sm:$0xff] }
 0xc86   :  { %3069 = vmatpush1.msra.mxu0 %v2908_v62  ;;  %v2925_v62 = vld [vmem:[#allocation9 + $0x188] sm:$0xff] }
 0xc87   :  { %3070 = vmatprep.subr.mxu0 %v2904_v56  ;;  %v2920_v56 = vld [vmem:[#allocation9 + $0x160] sm:$0xff] }
 0xc88   :  { %3071 = vmatpush1.msra.mxu0 %v2903_v5  ;;  %v2915_v5 = vld [vmem:[#allocation9 + $0x138] sm:$0xff] }
 0xc89   :  { %3072 = vmatprep.subr.mxu0 %v2899_v6  ;;  %v2910_v6 = vld [vmem:[#allocation9 + $0x110] sm:$0xff] }
 0xc8a   :  { %3073 = vmatpush1.msra.mxu0 %v2898_v51  ;;  %v2905_v51 = vld [vmem:[#allocation9 + $0xe8] sm:$0xff] }
 0xc8b   :  { %3074 = vmatprep.subr.mxu0 %v2894_v28  ;;  %v2900_v28 = vld [vmem:[#allocation9 + $0xc0] sm:$0xff] }
 0xc8c   :  { %3075 = vmatpush1.msra.mxu0 %v2893_v63  ;;  %v2895_v63 = vld [vmem:[#allocation9 + $0x98] sm:$0xff] }
 0xc8d   :  { %3076 = vmatprep.subr.mxu0 %v2889_v2  ;;  %v2890_v2 = vld [vmem:[#allocation9 + $0x70] sm:$0xff] }
 0xc8e   :  { %3077 = vmatpush1.msra.mxu0 %v2888_v1  ;;  %v2885_v1 = vld [vmem:[#allocation9 + $0x48] sm:$0xff] }
 0xc8f   :  { %3078 = vmatprep.subr.mxu0 %v2884_v22  ;;  %v2880_v22 = vld [vmem:[#allocation9 + $0x20] sm:$0xff] }
 0xc90   :  { %3079 = vmatpush1.msra.mxu0 %v2883_v57  ;;  %v2975_v57 = vld [vmem:[#allocation9 + $0x318] sm:$0xff] }
 0xc91   :  { %3080 = vmatprep.subr.mxu0 %v2879_v15  ;;  %v2970_v15 = vld [vmem:[#allocation9 + $0x2f0] sm:$0xff] }
 0xc92   :  { %3081 = vmatpush1.msra.mxu0 %v2878_v25  ;;  %v2960_v25 = vld [vmem:[#allocation9 + $0x2a0] sm:$0xff] }
 0xc93   :  { %3106 = vmatprep.subr.mxu0 %v2974_v48 }
 0xc94   :  { %3107 = vmatpush2.msra.mxu0 %v2973_v40 }
 0xc95   :  { %3108 = vmatprep.subr.mxu0 %v2969_v17 }
 0xc96   :  { %3109 = vmatpush2.msra.mxu0 %v2968_v24 }
 0xc97   :  { %3110 = vmatprep.subr.mxu0 %v2964_v53 }
 0xc98   :  { %3111 = vmatpush2.msra.mxu0 %v2963_v33 }
 0xc99   :  { %3112 = vmatprep.subr.mxu0 %v2959_v34 }
 0xc9a   :  { %3113 = vmatpush2.msra.mxu0 %v2958_v45 }
 0xd33   :  { %v2867_v35 = vpop.f32.mrf.mxu0 }
 0xd34   :  { %v2868_v36 = vadd.f32 %v2867_v35, %v2796_v37 }
 0xd35   :  { %v2869_v27 = vpop.f32.mrf.mxu0 }
 0xd36   :  { %v2870_v52 = vadd.f32 %v2869_v27, %v2796_v37  ;;  %v7142_v47 = vmax.f32 %v2868_v36, 0.0  ;;  %v7225_v37 = vld [vmem:[%s8236_s9] sm:$0xff]  ;;  %v3634_v27 = vld [vmem:[%s8237_s10 + $0x8] sm:$0xff] }
 0xd37   :  { %v3633_v36 = vld [vmem:[%s8237_s10] sm:$0xff] }
 0xd38   :  { %v2873_v18 = vmax.f32 %v2870_v52, 0.0 }
 0xd3a   :  { %v2875_v16 = vsel %vm6952_vm12, 0.0, %v2873_v18  ;;  %vm8463_vm12 = vcmask 1047808  }
 0xd3b   :  { %5089 = vmatprep.mubr.msk.f32.mxu1 %vm8460_vm10, %v2875_v16  ;;  %5092 = vmatprep.mubr.msk.f32.mxu0 %vm8461_vm8, %v2875_v16  ;;  %vm8478_vm10 = vcmask 654336  }
 0xd3c   :  { %5091 = vmatmul.mubr.msk.f32.vlgmr.msra.gmra.mxu1 %vm5090_vm4, %v7142_v47  ;;  %5094 = vmatmul.mubr.msk.f32.vlgmr.msra.gmra.mxu0 %vm5090_vm4, %v7142_v47  ;;  %vm8479_vm8 = vmmov %vm8478_vm10 }
 0xd3d   :  { %3122 = vmatpush1.msra.mxu1 %v2955_v32  ;;  %5095 = vmatprep.mubr.msk.f32.mxu1 %vm8462_vm0, %v2875_v16  ;;  %vm8480_vm0 = vcmask 662528  }
 0xd3e   :  { %3123 = vmatprep.subr.mxu1 %v7070_v4  ;;  %3715 = vmatprep.mubr.f32.mxu0 %v7070_v4 }
 0xd3f   :  { %3124 = vmatpush1.msra.mxu1 %v2950_v54 }
 0xd40   :  { %3125 = vmatprep.subr.mxu1 %v7070_v4 }
 0xd41   :  { %3126 = vmatpush1.msra.mxu1 %v2945_v50 }
 0xd42   :  { %3127 = vmatprep.subr.mxu1 %v7070_v4 }
 0xd43   :  { %3128 = vmatpush1.msra.mxu1 %v2940_v55 }
 0xd44   :  { %3129 = vmatprep.subr.mxu1 %v7070_v4 }
 0xd45   :  { %3130 = vmatpush1.msra.mxu1 %v2935_v61 }
 0xd46   :  { %3131 = vmatprep.subr.mxu1 %v7070_v4 }
 0xd47   :  { %3132 = vmatpush1.msra.mxu1 %v2930_v26 }
 0xd48   :  { %3133 = vmatprep.subr.mxu1 %v7070_v4 }
 0xd49   :  { %3134 = vmatpush1.msra.mxu1 %v2925_v62 }
 0xd4a   :  { %3135 = vmatprep.subr.mxu1 %v7070_v4 }
 0xd4b   :  { %3136 = vmatpush1.msra.mxu1 %v2920_v56 }
 0xd4c   :  { %3137 = vmatprep.subr.mxu1 %v7070_v4 }
 0xd4d   :  { %3138 = vmatpush1.msra.mxu1 %v2915_v5 }
 0xd4e   :  { %3139 = vmatprep.subr.mxu1 %v7070_v4 }
 0xd4f   :  { %3140 = vmatpush1.msra.mxu1 %v2910_v6 }
 0xd50   :  { %3141 = vmatprep.subr.mxu1 %v7070_v4 }
 0xd51   :  { %3142 = vmatpush1.msra.mxu1 %v2905_v51  ;;  %v8473_v51 = vmov 0 }
 0xd52   :  { %3143 = vmatprep.subr.mxu1 %v7070_v4  ;;  %v8474_v51 = vsel %vm7256_vm3, 4294967295, %v8473_v51 }
 0xd53   :  { %3144 = vmatpush1.msra.mxu1 %v2900_v28 }
 0xd54   :  { %3145 = vmatprep.subr.mxu1 %v7070_v4 }
 0xd55   :  { %3146 = vmatpush1.msra.mxu1 %v2895_v63 }
 0xd56   :  { %3147 = vmatprep.subr.mxu1 %v7070_v4 }
 0xd57   :  { %3148 = vmatpush1.msra.mxu1 %v2890_v2  ;;  %v8476_v2 = vmov 0 }
 0xd58   :  { %3149 = vmatprep.subr.mxu1 %v7070_v4 }
 0xd59   :  { %3150 = vmatpush1.msra.mxu1 %v2885_v1 }
 0xd5a   :  { %3151 = vmatprep.subr.mxu1 %v7070_v4 }
 0xd5b   :  { %3152 = vmatpush1.msra.mxu1 %v2880_v22 }
 0xd5c   :  { %3177 = vmatprep.subr.mxu1 %v7070_v4 }
 0xd5d   :  { %3178 = vmatpush2.msra.mxu1 %v2975_v57 }
 0xd5e   :  { %3179 = vmatprep.subr.mxu1 %v7070_v4 }
 0xd5f   :  { %3180 = vmatpush2.msra.mxu1 %v2970_v15 }
 0xd60   :  { %3181 = vmatprep.subr.mxu1 %v7070_v4 }
 0xd61   :  { %3182 = vmatpush2.msra.mxu1 %v2965_v44 }
 0xd62   :  { %3183 = vmatprep.subr.mxu1 %v7070_v4 }
 0xd63   :  { %3184 = vmatpush2.msra.mxu1 %v2960_v25 }
 0xd64   :  { %5097 = vmatmul.mubr.msk.f32.vlgmr.msra.gmra.mxu1 %vm5090_vm4, %v7142_v47  ;;  %vm7266_vm4 = vmneg %vm8475_vm1 }
 0xd65   :  { %5183 = vmatprep.mubr.msk.f32.mxu1 %vm8303_vm5, %v7225_v37  ;;  %v8477_v2 = vsel %vm7266_vm4, 4294967295, %v8476_v2 }
 0xdfc   :  { %v3045_v12 = vpop.f32.mrf.mxu1  ;;  %v3116_v48 = vpop.f32.mrf.mxu0 }
 0xdfd   :  { %3206 = vrot.lane.b32.xlu0 %v3045_v12, %s5569_s0 }
 0xdfe   :  { %v3047_v23 = vpop.f32.mrf.mxu1  ;;  %v3118_v40 = vpop.f32.mrf.mxu0 }
 0xdff   :  { %3208 = vrot.lane.b32.xlu1 %v3047_v23, %s5569_s0 }
 0xe01   :  { %3210 = vrot.lane.b32.xlu0 %v3116_v48, %s5569_s0 }
 0xe03   :  { %3212 = vrot.lane.b32.xlu1 %v3118_v40, %s5569_s0 }
 0xe24   :  { %v3187_v8 = vpop.f32.mrf.mxu1 }
 0xe25   :  { %3214 = vrot.lane.b32.xlu0 %v3187_v8, %s5569_s0  ;;  %v8487_v8 = vmov 0 }
 0xe26   :  { %v3189_v17 = vpop.f32.mrf.mxu1 }
 0xe6f   :  { %v3207_v0 = vpop.permute.xlu0 %3206 }
 0xe70   :  { %3225 = vst.msk [vmem:[#allocation2] sm:$0xff] %vm8463_vm12, %v3207_v0  ;;  %vm8481_vm12 = vmmov %vm8480_vm0 }
 0xe71   :  { %v3209_v19 = vpop.permute.xlu1 %3208 }
 0xe72   :  { %v3216_v38 = vsel %vm8466_vm14, %v3207_v0, %v3209_v19 }
 0xe73   :  { %v3211_v24 = vpop.permute.xlu0 %3210 }
 0xe74   :  { %v3217_v53 = vsel %vm8464_vm6, %v3209_v19, %v3211_v24  ;;  %vm8482_vm6 = vnez %v8348_v59 }
 0xe75   :  { %v3213_v33 = vpop.permute.xlu1 %3212  ;;  %vm7282_vm14 = vmneg %vm8482_vm6 }
 0xe76   :  { %v3218_v35 = vsel %vm8469_vm9, %v3211_v24, %v3213_v33 }
 0xe77   :  { %v3547_v11 = vld [vmem:[#allocation2] sm:$0xff] }
 0xe78   :  { %3557 = vrot.lane.b32.xlu1 %v3547_v11, %s5559_s12  ;;  %3523 = vrot.lane.b32.xlu0 %v3547_v11, %s5558_s18  ;;  %3900 = vst [vmem:[#allocation2] sm:$0xff] %v7070_v4 }
 0xe7c   :  { %3484 = vrot.lane.b32.xlu1 %v3547_v11, %s5564_s22  ;;  %3445 = vrot.lane.b32.xlu0 %v3547_v11, %s5563_s21 }
 0xe80   :  { %3411 = vrot.lane.b32.xlu1 %v3547_v11, %s5566_s24  ;;  %3372 = vrot.lane.b32.xlu0 %v3547_v11, %s5562_s20 }
 0xe84   :  { %3333 = vrot.lane.b32.xlu1 %v3547_v11, %s5561_s1  ;;  %3289 = vrot.lane.b32.xlu0 %v3547_v11, %s5565_s23 }
 0xe88   :  { %3250 = vrot.lane.b32.xlu1 %v3547_v11, %s8465_s7  ;;  %3561 = vrot.lane.b32.xlu0 %v3217_v53, %s5559_s12 }
 0xe8c   :  { %3559 = vrot.lane.b32.xlu1 %v3216_v38, %s5559_s12  ;;  %3525 = vrot.lane.b32.xlu0 %v3216_v38, %s5558_s18 }
 0xe90   :  { %3527 = vrot.lane.b32.xlu1 %v3217_v53, %s5558_s18  ;;  %3486 = vrot.lane.b32.xlu0 %v3216_v38, %s5564_s22 }
 0xe94   :  { %3488 = vrot.lane.b32.xlu1 %v3217_v53, %s5564_s22  ;;  %3447 = vrot.lane.b32.xlu0 %v3216_v38, %s5563_s21 }
 0xe97   :  { %v3215_v58 = vpop.permute.xlu0 %3214 }
 0xe98   :  { %v3219_v34 = vsel %vm8467_vm11, %v3213_v33, %v3215_v58  ;;  %3449 = vrot.lane.b32.xlu1 %v3217_v53, %s5563_s21  ;;  %3415 = vrot.lane.b32.xlu0 %v3217_v53, %s5566_s24  ;;  %vm8485_vm11 = vcmask 777216  }
 0xe99   :  { %3229 = vst.msk [vmem:[#allocation2 + $0x20] sm:$0xff] %vm8468_vm13, %v3219_v34  ;;  %vm8486_vm13 = vnez %v8350_v60 }
 0xe9a   :  { %vm7295_vm9 = vmneg %vm8486_vm13 }
 0xe9b   :  { %v8488_v8 = vsel %vm7295_vm9, 4294967295, %v8487_v8 }
 0xe9c   :  { %3376 = vrot.lane.b32.xlu0 %v3217_v53, %s5562_s20  ;;  %3413 = vrot.lane.b32.xlu1 %v3216_v38, %s5566_s24 }
 0xea0   :  { %3337 = vrot.lane.b32.xlu0 %v3217_v53, %s5561_s1  ;;  %3374 = vrot.lane.b32.xlu1 %v3216_v38, %s5562_s20  ;;  %v3551_v45 = vld [vmem:[#allocation2 + $0x20] sm:$0xff] }
 0xea1   :  { %3904 = vst [vmem:[#allocation2 + $0x20] sm:$0xff] %v7070_v4 }
 0xea4   :  { %3335 = vrot.lane.b32.xlu1 %v3216_v38, %s5561_s1  ;;  %3291 = vrot.lane.b32.xlu0 %v3216_v38, %s5565_s23 }
 0xea8   :  { %3293 = vrot.lane.b32.xlu1 %v3217_v53, %s5565_s23  ;;  %3252 = vrot.lane.b32.xlu0 %v3216_v38, %s8465_s7 }
 0xeac   :  { %3254 = vrot.lane.b32.xlu1 %v3217_v53, %s8465_s7  ;;  %3563 = vrot.lane.b32.xlu0 %v3218_v35, %s5559_s12 }
 0xeb0   :  { %3565 = vrot.lane.b32.xlu1 %v3551_v45, %s5559_s12  ;;  %3529 = vrot.lane.b32.xlu0 %v3218_v35, %s5558_s18 }
 0xeb4   :  { %3531 = vrot.lane.b32.xlu1 %v3551_v45, %s5558_s18  ;;  %3490 = vrot.lane.b32.xlu0 %v3218_v35, %s5564_s22 }
 0xeb8   :  { %3492 = vrot.lane.b32.xlu1 %v3551_v45, %s5564_s22  ;;  %3451 = vrot.lane.b32.xlu0 %v3218_v35, %s5563_s21 }
 0xebc   :  { %3453 = vrot.lane.b32.xlu1 %v3551_v45, %s5563_s21  ;;  %3417 = vrot.lane.b32.xlu0 %v3218_v35, %s5566_s24 }
 0xec0   :  { %3419 = vrot.lane.b32.xlu1 %v3551_v45, %s5566_s24  ;;  %3378 = vrot.lane.b32.xlu0 %v3218_v35, %s5562_s20 }
 0xec4   :  { %3380 = vrot.lane.b32.xlu1 %v3551_v45, %s5562_s20  ;;  %3339 = vrot.lane.b32.xlu0 %v3218_v35, %s5561_s1 }
 0xec8   :  { %3341 = vrot.lane.b32.xlu1 %v3551_v45, %s5561_s1  ;;  %3295 = vrot.lane.b32.xlu0 %v3218_v35, %s5565_s23 }
 0xecc   :  { %3297 = vrot.lane.b32.xlu1 %v3551_v45, %s5565_s23  ;;  %3256 = vrot.lane.b32.xlu0 %v3218_v35, %s8465_s7 }
 0xed0   :  { %3258 = vrot.lane.b32.xlu1 %v3551_v45, %s8465_s7  ;;  %3642 = vperm.xlu0 %5224, %v3634_v27  }
 0xed4   :  { %3637 = vperm.xlu1 %5223, %v3633_v36  }
 0xeea   :  { %v3558_v52 = vpop.permute.xlu1 %3557  ;;  %v3524_v18 = vpop.permute.xlu0 %3523 }
 0xeee   :  { %v3485_v47 = vpop.permute.xlu1 %3484  ;;  %v3446_v16 = vpop.permute.xlu0 %3445 }
 0xef2   :  { %v3412_v32 = vpop.permute.xlu1 %3411  ;;  %v3373_v54 = vpop.permute.xlu0 %3372 }
 0xef6   :  { %v3334_v50 = vpop.permute.xlu1 %3333  ;;  %v3290_v55 = vpop.permute.xlu0 %3289 }
 0xefa   :  { %v3251_v61 = vpop.permute.xlu1 %3250  ;;  %v3562_v26 = vpop.permute.xlu0 %3561 }
 0xefe   :  { %v3560_v62 = vpop.permute.xlu1 %3559  ;;  %v3526_v56 = vpop.permute.xlu0 %3525 }
 0xeff   :  { %v3567_v5 = vsel %vm8470_vm15, %v3558_v52, %v3560_v62  ;;  %v3568_v6 = vsel %vm8471_vm2, %v3560_v62, %v3562_v26  ;;  %v3533_v22 = vsel %vm8479_vm8, %v3524_v18, %v3526_v56  ;;  %vm8489_vm15 = vmmov %vm8485_vm11  ;;  %vm8490_vm2 = vcmask 785408  }
 0xf00   :  { %5340 = vmatprep.subr.msk.mxu0 %vm7256_vm3, %v3568_v6  ;;  %vm8492_vm8 = vcmask 793600   ;;  %v8505_v6 = vmov 0 }
 0xf01   :  { %5342 = vmatpush1.msk.msra.mxu0 %vm7266_vm4, %v3567_v5 }
 0xf02   :  { %v7262_v28 = vpop.permute.xlu1 %3527  ;;  %v3487_v63 = vpop.permute.xlu0 %3486 }
 0xf03   :  { %v3534_v1 = vsel %vm8478_vm10, %v3526_v56, %v7262_v28  ;;  %v3494_v57 = vsel %vm8480_vm0, %v3485_v47, %v3487_v63  ;;  %vm8491_vm10 = vmmov %vm8490_vm2 }
 0xf04   :  { %3667 = vmatprep.subr.mxu0 %v3534_v1  ;;  %vm8493_vm0 = vmmov %vm8492_vm8 }
 0xf05   :  { %3668 = vmatpush1.msra.mxu0 %v3533_v22  ;;  %v8509_v22 = vmov 0 }
 0xf06   :  { %v7276_v15 = vpop.permute.xlu1 %3488  ;;  %v3448_v44 = vpop.permute.xlu0 %3447 }
 0xf07   :  { %v3495_v25 = vsel %vm8481_vm12, %v3487_v63, %v7276_v15  ;;  %v3455_v48 = vsel %vm8485_vm11, %v3446_v16, %v3448_v44  ;;  %vm8494_vm12 = vcmask 908288  }
 0xf08   :  { %5344 = vmatprep.subr.msk.mxu0 %vm7282_vm14, %v3495_v25  ;;  %vm8495_vm11 = vmmov %vm8494_vm12 }
 0xf09   :  { %5346 = vmatpush1.msk.msra.mxu0 %vm7295_vm9, %v3494_v57 }
 0xf0a   :  { %v7289_v23 = vpop.permute.xlu1 %3449  ;;  %v7291_v40 = vpop.permute.xlu0 %3415 }
 0xf0b   :  { %v3456_v17 = vsel %vm8489_vm15, %v3448_v44, %v7289_v23  ;;  %vm8496_vm15 = vcmask 916480  }
 0xf0c   :  { %5348 = vmatprep.subr.msk.mxu0 %vm7256_vm3, %v3456_v17 }
 0xf0d   :  { %5350 = vmatpush1.msk.msra.mxu0 %vm7266_vm4, %v3455_v48 }
 0xf0e   :  { %v7305_v0 = vpop.permute.xlu0 %3376  ;;  %v3414_v11 = vpop.permute.xlu1 %3413 }
 0xf0f   :  { %v3421_v24 = vsel %vm8490_vm2, %v3412_v32, %v3414_v11  ;;  %v3422_v19 = vsel %vm8491_vm10, %v3414_v11, %v7291_v40  ;;  %vm8497_vm2 = vmmov %vm8496_vm15  ;;  %vm8498_vm10 = vcmask 924672  }
 0xf10   :  { %3673 = vmatprep.subr.mxu0 %v3422_v19 }
 0xf11   :  { %3674 = vmatpush1.msra.mxu0 %v3421_v24 }
 0xf12   :  { %v7312_v53 = vpop.permute.xlu0 %3337  ;;  %v3375_v38 = vpop.permute.xlu1 %3374 }
 0xf13   :  { %v3382_v33 = vsel %vm8492_vm8, %v3373_v54, %v3375_v38  ;;  %v3383_v58 = vsel %vm8493_vm0, %v3375_v38, %v7305_v0  ;;  %vm8499_vm8 = vmmov %vm8498_vm10  ;;  %vm8500_vm0 = vcmask 646144   ;;  %v8523_v38 = vmov 0 }
 0xf14   :  { %5352 = vmatprep.subr.msk.mxu0 %vm7282_vm14, %v3383_v58 }
 0xf15   :  { %5354 = vmatpush1.msk.msra.mxu0 %vm7295_vm9, %v3382_v33 }
 0xf16   :  { %v3336_v34 = vpop.permute.xlu1 %3335  ;;  %v3292_v45 = vpop.permute.xlu0 %3291 }
 0xf17   :  { %v3343_v35 = vsel %vm8494_vm12, %v3334_v50, %v3336_v34  ;;  %v3344_v27 = vsel %vm8495_vm11, %v3336_v34, %v7312_v53  ;;  %v3299_v47 = vsel %vm8497_vm2, %v3290_v55, %v3292_v45  ;;  %vm8501_vm12 = vmmov %vm8500_vm0  ;;  %vm8502_vm11 = vnez %v8341_v41 }
 0xf18   :  { %5356 = vmatprep.subr.msk.mxu0 %vm7256_vm3, %v3344_v27  ;;  %vm8504_vm2 = vnez %v8345_v43  ;;  %vm8527_vm3 = vcmask 523264  }
 0xf19   :  { %5358 = vmatpush1.msk.msra.mxu0 %vm7266_vm4, %v3343_v35 }
 0xf1a   :  { %v7326_v36 = vpop.permute.xlu1 %3293  ;;  %v3253_v52 = vpop.permute.xlu0 %3252 }
 0xf1b   :  { %v3300_v18 = vsel %vm8496_vm15, %v3292_v45, %v7326_v36  ;;  %v3260_v16 = vsel %vm8498_vm10, %v3251_v61, %v3253_v52  ;;  %vm8503_vm15 = vcmask 523264   ;;  %vm7357_vm10 = vmneg %vm8504_vm2 }
 0xf1c   :  { %3679 = vmatprep.subr.mxu0 %v3300_v18  ;;  %v8506_v6 = vsel %vm7357_vm10, 4294967295, %v8505_v6 }
 0xf1d   :  { %3680 = vmatpush1.msra.mxu0 %v3299_v47  ;;  %8507 = vst [vmem:[#allocation18_spill] sm:$0xff] %v8506_v6 }
 0xf1e   :  { %v7334_v32 = vpop.permute.xlu1 %3254  ;;  %v3564_v54 = vpop.permute.xlu0 %3563 }
 0xf1f   :  { %v3261_v50 = vsel %vm8499_vm8, %v3253_v52, %v7334_v32  ;;  %v3569_v62 = vsel %vm8500_vm0, %v3562_v26, %v3564_v54  ;;  %v7353_v26 = vld [vmem:[%s8236_s9 + $0x8] sm:$0xff]  ;;  %vm8508_vm8 = vnez %v8343_v42 }
 0xf20   :  { %5360 = vmatprep.subr.msk.mxu0 %vm7282_vm14, %v3261_v50  ;;  %vm7365_vm0 = vmneg %vm8508_vm8  ;;  %vm8514_vm8 = vcmask 662528  }
 0xf21   :  { %5362 = vmatpush1.msk.msra.mxu0 %vm7295_vm9, %v3260_v16  ;;  %v8510_v22 = vsel %vm7365_vm0, 4294967295, %v8509_v22  ;;  %vm8515_vm4 = vmmov %vm8514_vm8 }
 0xf22   :  { %v3566_v56 = vpop.permute.xlu1 %3565  ;;  %v3530_v5 = vpop.permute.xlu0 %3529  ;;  %5098 = vmatmul.mubr.msk.f32.vlgmr.msra.gmra.mxu0 %vm8303_vm5, %v7225_v37  ;;  %8511 = vst [vmem:[#allocation19_spill] sm:$0xff] %v8510_v22 }
 0xf23   :  { %v3570_v55 = vsel %vm8501_vm12, %v3564_v54, %v3566_v56  ;;  %v3580_v61 = vsel %vm8502_vm11, 0.0, %v3566_v56  ;;  %3721 = vmatprep.mubr.f32.mxu0 %v7070_v4  ;;  %vm8512_vm12 = vcmask 654336  }
 0xf24   :  { %3585 = vst.msk [vmem:[#allocation3 + $0x160] sm:$0xff] %vm8503_vm15, %v3580_v61  ;;  %5364 = vmatprep.subr.msk.mxu0 %vm7357_vm10, %v3570_v55  ;;  %vm8513_vm2 = vmmov %vm8512_vm12 }
 0xf25   :  { %5366 = vmatpush1.msk.msra.mxu0 %vm7365_vm0, %v3569_v62  ;;  %v3535_v57 = vsel %vm8513_vm2, %v7262_v28, %v3530_v5  ;;  %vm8517_vm2 = vnez %v8358_v14 }
 0xf26   :  { %v3532_v63 = vpop.permute.xlu1 %3531  ;;  %v3491_v1 = vpop.permute.xlu0 %3490  ;;  %5099 = vmatmul.mubr.msk.f32.gmra.mxu0 %vm8303_vm5, %v7353_v26  ;;  %vm7386_vm5 = vmneg %vm8517_vm2 }
 0xf27   :  { %v3536_v43 = vsel %vm8512_vm12, %v3530_v5, %v3532_v63  ;;  %3546 = vst.msk [vmem:[#allocation3 + $0x138] sm:$0xff] %vm8503_vm15, %v3532_v63  ;;  %3792 = vmatprep.mubr.f32.mxu0 %v7070_v4  ;;  %v3496_v42 = vsel %vm8514_vm8, %v7276_v15, %v3491_v1  ;;  %vm8516_vm12 = vnez %v8354_v7  ;;  %v8518_v4 = vmov 0 }
 0xf28   :  { %3744 = vmatprep.subr.mxu0 %v3536_v43  ;;  %v8519_v4 = vsel %vm7386_vm5, 4294967295, %v8518_v4  ;;  %vm8521_vm8 = vcmask 777216  }
 0xf29   :  { %3745 = vmatpush1.msra.mxu0 %v3535_v57  ;;  %8520 = vst [vmem:[#allocation20_spill] sm:$0xff] %v8519_v4  ;;  %vm8526_vm2 = vmmov %vm8521_vm8 }
 0xf2a   :  { %v3493_v44 = vpop.permute.xlu1 %3492  ;;  %v3452_v25 = vpop.permute.xlu0 %3451 }
 0xf2b   :  { %v3497_v48 = vsel %vm8515_vm4, %v3491_v1, %v3493_v44  ;;  %v3507_v17 = vsel %vm8516_vm12, 0.0, %v3493_v44  ;;  %v3630_v11 = vld [vmem:[#allocation3 + $0x160] sm:$0xff]  ;;  %v3457_v28 = vsel %vm8521_vm8, %v7289_v23, %v3452_v25  ;;  %vm8522_vm4 = vnez %v8356_v9 }
 0xf2c   :  { %3512 = vst.msk [vmem:[#allocation3 + $0x110] sm:$0xff] %vm8503_vm15, %v3507_v17  ;;  %5165 = vmatprep.subr.mxu1 %v3630_v11  ;;  %5368 = vmatprep.subr.msk.mxu0 %vm7386_vm5, %v3497_v48  ;;  %vm7396_vm15 = vmneg %vm8522_vm4  ;;  %vm8528_vm8 = vcmask 785408  }
 0xf2d   :  { %5166 = vmatpush3.msra.mxu1 %v3630_v11  ;;  %v8524_v38 = vsel %vm7396_vm15, 4294967295, %v8523_v38  ;;  %5370 = vmatpush1.msk.msra.mxu0 %vm7396_vm15, %v3496_v42  ;;  %vm8529_vm4 = vmmov %vm8527_vm3 }
 0xf2e   :  { %v3454_v15 = vpop.permute.xlu1 %3453  ;;  %v3418_v24 = vpop.permute.xlu0 %3417  ;;  %v3625_v19 = vld [vmem:[#allocation3 + $0x138] sm:$0xff]  ;;  %8525 = vst [vmem:[#allocation21_spill] sm:$0xff] %v8524_v38 }
 0xf2f   :  { %v3458_v33 = vsel %vm8526_vm2, %v3452_v25, %v3454_v15  ;;  %v3468_v58 = vsel %vm8502_vm11, 0.0, %v3454_v15  ;;  %5167 = vmatprep.subr.mxu1 %v3625_v19  ;;  %vm8530_vm2 = vmmov %vm8528_vm8 }
 0xf30   :  { %3473 = vst.msk [vmem:[#allocation3 + $0xe8] sm:$0xff] %vm8527_vm3, %v3468_v58  ;;  %5168 = vmatpush3.msra.mxu1 %v3625_v19  ;;  %5372 = vmatprep.subr.msk.mxu0 %vm7357_vm10, %v3458_v33  ;;  %v3423_v27 = vsel %vm8530_vm2, %v7291_v40, %v3418_v24  ;;  %vm8531_vm3 = vcmask 793600   ;;  %vm8535_vm2 = vmmov %vm8529_vm4 }
 0xf31   :  { %5374 = vmatpush1.msk.msra.mxu0 %vm7365_vm0, %v3457_v28  ;;  %vm8532_vm9 = vmmov %vm8531_vm3 }
 0xf32   :  { %v3420_v23 = vpop.permute.xlu1 %3419  ;;  %v3379_v34 = vpop.permute.xlu0 %3378 }
 0xf33   :  { %v3424_v45 = vsel %vm8528_vm8, %v3418_v24, %v3420_v23  ;;  %3434 = vst.msk [vmem:[#allocation3 + $0xc0] sm:$0xff] %vm8529_vm4, %v3420_v23  ;;  %v3620_v35 = vld [vmem:[#allocation3 + $0x110] sm:$0xff]  ;;  %v3384_v52 = vsel %vm8531_vm3, %v7305_v0, %v3379_v34  ;;  %vm8533_vm8 = vcmask 908288   ;;  %vm8536_vm3 = vcmask 916480  }
 0xf34   :  { %5169 = vmatprep.subr.mxu1 %v3620_v35  ;;  %3750 = vmatprep.subr.mxu0 %v3424_v45 }
 0xf35   :  { %5170 = vmatpush3.msra.mxu1 %v3620_v35  ;;  %3751 = vmatpush1.msra.mxu0 %v3423_v27 }
 0xf36   :  { %v3381_v18 = vpop.permute.xlu1 %3380  ;;  %v3340_v47 = vpop.permute.xlu0 %3339 }
 0xf37   :  { %v3385_v16 = vsel %vm8532_vm9, %v3379_v34, %v3381_v18  ;;  %v3395_v54 = vsel %vm8516_vm12, 0.0, %v3381_v18  ;;  %v3615_v50 = vld [vmem:[#allocation3 + $0xe8] sm:$0xff]  ;;  %v3345_v40 = vsel %vm8533_vm8, %v7312_v53, %v3340_v47  ;;  %vm8534_vm9 = vmmov %vm8533_vm8 }
 0xf38   :  { %3400 = vst.msk [vmem:[#allocation3 + $0x98] sm:$0xff] %vm8529_vm4, %v3395_v54  ;;  %5171 = vmatprep.subr.mxu1 %v3615_v50  ;;  %5376 = vmatprep.subr.msk.mxu0 %vm7386_vm5, %v3385_v16  ;;  %vm8537_vm4 = vmmov %vm8535_vm2 }
 0xf39   :  { %5172 = vmatpush3.msra.mxu1 %v3615_v50  ;;  %5378 = vmatpush1.msk.msra.mxu0 %vm7396_vm15, %v3384_v52  ;;  %vm8538_vm8 = vmmov %vm8536_vm3 }
 0xf3a   :  { %v3342_v62 = vpop.permute.xlu1 %3341  ;;  %v3296_v0 = vpop.permute.xlu0 %3295  ;;  %v3610_v56 = vld [vmem:[#allocation3 + $0xc0] sm:$0xff] }
 0xf3b   :  { %v3346_v5 = vsel %vm8534_vm9, %v3340_v47, %v3342_v62  ;;  %v3356_v55 = vsel %vm8502_vm11, 0.0, %v3342_v62  ;;  %5173 = vmatprep.subr.mxu1 %v3610_v56  ;;  %v3301_v43 = vsel %vm8538_vm8, %v7326_v36, %v3296_v0  ;;  %vm8539_vm9 = vcmask 924672  }
 0xf3c   :  { %3361 = vst.msk [vmem:[#allocation3 + $0x70] sm:$0xff] %vm8535_vm2, %v3356_v55  ;;  %5174 = vmatpush3.msra.mxu1 %v3610_v56  ;;  %5380 = vmatprep.subr.msk.mxu0 %vm7357_vm10, %v3346_v5  ;;  %vm8540_vm2 = vmmov %vm8539_vm9 }
 0xf3d   :  { %5382 = vmatpush1.msk.msra.mxu0 %vm7365_vm0, %v3345_v40 }
 0xf3e   :  { %v3298_v61 = vpop.permute.xlu1 %3297  ;;  %v3257_v63 = vpop.permute.xlu0 %3256 }
 0xf3f   :  { %v3302_v53 = vsel %vm8536_vm3, %v3296_v0, %v3298_v61  ;;  %3312 = vst.msk [vmem:[#allocation3 + $0x48] sm:$0xff] %vm8537_vm4, %v3298_v61  ;;  %v3605_v1 = vld [vmem:[#allocation3 + $0x98] sm:$0xff]  ;;  %v3262_v57 = vsel %vm8539_vm9, %v7334_v32, %v3257_v63  ;;  %vm8541_vm3 = vmmov %vm8537_vm4  ;;  %vm8542_vm4 = vcmask 588800  }
 0xf40   :  { %5175 = vmatprep.subr.mxu1 %v3605_v1  ;;  %3756 = vmatprep.subr.mxu0 %v3302_v53  ;;  %v7450_v32 = vld [vmem:[#allocation2 + $0x48] sm:$0xff]  ;;  %vm8544_vm8 = vmmov %vm8542_vm4 }
 0xf41   :  { %5176 = vmatpush3.msra.mxu1 %v3605_v1  ;;  %3757 = vmatpush1.msra.mxu0 %v3301_v43  ;;  %8543 = vst [vmem:[#allocation22_spill] sm:$0xff] %v7450_v32  ;;  %vm8545_vm9 = vmmov %vm8542_vm4 }
 0xf42   :  { %v3259_v42 = vpop.permute.xlu1 %3258 }
 0xf43   :  { %v3263_v44 = vsel %vm8540_vm2, %v3257_v63, %v3259_v42  ;;  %v3273_v25 = vsel %vm8516_vm12, 0.0, %v3259_v42  ;;  %v3600_v48 = vld [vmem:[#allocation3 + $0x70] sm:$0xff]  ;;  %vm8546_vm2 = vnez %v8361_v21 }
 0xf44   :  { %3278 = vst.msk [vmem:[#allocation3 + $0x20] sm:$0xff] %vm8541_vm3, %v3273_v25  ;;  %5177 = vmatprep.subr.mxu1 %v3600_v48  ;;  %5384 = vmatprep.subr.msk.mxu0 %vm7386_vm5, %v3263_v44  ;;  %vm8547_vm3 = vnez %v8364_v29 }
 0xf45   :  { %5178 = vmatpush3.msra.mxu1 %v3600_v48  ;;  %5386 = vmatpush1.msk.msra.mxu0 %vm7396_vm15, %v3262_v57 }
 0xf46   :  { %v3595_v36 = vld [vmem:[#allocation3 + $0x48] sm:$0xff]  ;;  %5100 = vmatmul.mubr.msk.f32.vlgmr.msra.gmra.mxu0 %vm8542_vm4, %v7225_v37  ;;  %vm8548_vm4 = vnez %v8370_v49 }
 0xf47   :  { %5179 = vmatprep.subr.mxu1 %v3595_v36  ;;  %3798 = vmatprep.mubr.f32.mxu0 %v7450_v32 }
 0xf48   :  { %5180 = vmatpush3.msra.mxu1 %v3595_v36 }
 0xf4a   :  { %5101 = vmatmul.mubr.msk.f32.gmra.mxu0 %vm8544_vm8, %v7353_v26  ;;  %vm8549_vm8 = vnez %v8367_v39 }
 0xf4b   :  { %v3590_v17 = vld [vmem:[#allocation3 + $0x20] sm:$0xff]  ;;  %v3643_v33 = vpop.permute.xlu0 %3642 }
 0xf4c   :  { %5181 = vmatprep.subr.mxu1 %v3590_v17 }
 0xf4d   :  { %5182 = vmatpush3.msra.mxu1 %v3590_v17 }
 0xf4e   :  { %5184 = vmatmul.mubr.msk.f32.vlgmr.msra.gmra.mxu1 %vm8545_vm9, %v7353_v26  ;;  %vm8550_vm9 = vnez %v8373_v10 }
 0xf4f   :  { %v3638_v11 = vpop.permute.xlu1 %3637 }
 0xfe2   :  { %v3717_v28 = vpop.f32.mrf.mxu0 }
 0xfe3   :  { %v3718_v15 = vadd.f32 %v3717_v28, %v3638_v11 }
 0xfe4   :  { %v3719_v24 = vpop.f32.mrf.mxu0 }
 0xfe5   :  { %v3880_v19 = vmax.f32 %v3718_v15, 0.0  ;;  %v3720_v37 = vadd.f32 %v3719_v24, %v3638_v11 }
 0xfe6   :  { %v3723_v58 = vpop.f32.mrf.mxu0 }
 0xfe7   :  { %v3890_v23 = vsel %vm8546_vm2, 0.0, %v3880_v19  ;;  %v3881_v34 = vmax.f32 %v3720_v37, 0.0  ;;  %v3724_v45 = vadd.f32 %v3723_v58, %v3643_v33 }
 0xfe8   :  { %v3725_v35 = vpop.f32.mrf.mxu0  ;;  %3920 = vrot.lane.b32.xlu1 %v3890_v23, %s5569_s0 }
 0xfe9   :  { %v3891_v27 = vsel %vm8547_vm3, 0.0, %v3881_v34  ;;  %v3885_v26 = vmax.f32 %v3724_v45, 0.0  ;;  %v3726_v52 = vadd.f32 %v3725_v35, %v3643_v33 }
 0xfea   :  { %3922 = vrot.lane.b32.xlu0 %v3891_v27, %s5569_s0 }
 0xfeb   :  { %v3886_v18 = vmax.f32 %v3726_v52, 0.0  ;;  %v3895_v47 = vsel %vm8546_vm2, 0.0, %v3885_v26  ;;  %vm8551_vm2 = vcmask 1047808  }
 0xfed   :  { %v3896_v16 = vsel %vm8547_vm3, 0.0, %v3886_v18  ;;  %vm8552_vm3 = vcmask 261120  }
 0xfee   :  { %3932 = vrot.lane.b32.xlu1 %v3896_v16, %s5569_s0  ;;  %3930 = vrot.lane.b32.xlu0 %v3895_v47, %s5569_s0 }
0x1006   :  { %v3794_v54 = vpop.f32.mrf.mxu0 }
0x1007   :  { %v3795_v43 = vadd.f32 %v3794_v54, %v3638_v11 }
0x1008   :  { %v3796_v50 = vpop.f32.mrf.mxu0 }
0x1009   :  { %v3797_v40 = vadd.f32 %v3796_v50, %v3638_v11  ;;  %v3882_v36 = vmax.f32 %v3795_v43, 0.0 }
0x100a   :  { %v3800_v62 = vpop.f32.mrf.mxu0 }
0x100b   :  { %v3883_v0 = vmax.f32 %v3797_v40, 0.0  ;;  %v3801_v56 = vadd.f32 %v3800_v62, %v3643_v33  ;;  %v3892_v15 = vsel %vm8549_vm8, 0.0, %v3882_v36 }
0x100c   :  { %v3802_v5 = vpop.f32.mrf.mxu0 }
0x100d   :  { %v3893_v61 = vsel %vm8548_vm4, 0.0, %v3883_v0  ;;  %v3887_v53 = vmax.f32 %v3801_v56, 0.0  ;;  %v3803_v63 = vadd.f32 %v3802_v5, %v3643_v33 }
0x100e   :  { %v5185_v55 = vpop.f32.mrf.mxu1  ;;  %3926 = vrot.lane.b32.xlu0 %v3893_v61, %s5569_s0 }
0x100f   :  { %v3877_v1 = vadd.f32 %v5185_v55, %v3643_v33  ;;  %v3897_v44 = vsel %vm8549_vm8, 0.0, %v3887_v53  ;;  %v3888_v25 = vmax.f32 %v3803_v63, 0.0  ;;  %vm8554_vm8 = vmmov %vm8551_vm2 }
0x1010   :  { %v3871_v57 = vpop.f32.mrf.mxu1 }
0x1011   :  { %v3889_v42 = vmax.f32 %v3877_v1, 0.0  ;;  %v3872_v17 = vadd.f32 %v3871_v57, %v3638_v11  ;;  %v3898_v28 = vsel %vm8548_vm4, 0.0, %v3888_v25  ;;  %vm8553_vm4 = vmmov %vm8552_vm3 }
0x1012   :  { %3934 = vrot.lane.b32.xlu0 %v3897_v44, %s5569_s0 }
0x1013   :  { %v3899_v48 = vsel %vm8550_vm9, 0.0, %v3889_v42  ;;  %v3884_v24 = vmax.f32 %v3872_v17, 0.0 }
0x1014   :  { %3938 = vrot.lane.b32.xlu1 %v3899_v48, %s5569_s0 }
0x1015   :  { %v3894_v19 = vsel %vm8550_vm9, 0.0, %v3884_v24 }
0x1016   :  { %3936 = vrot.lane.b32.xlu0 %v3898_v28, %s5569_s0 }
0x1018   :  { %3924 = vrot.lane.b32.xlu1 %v3892_v15, %s5569_s0 }
0x101c   :  { %3928 = vrot.lane.b32.xlu1 %v3894_v19, %s5569_s0  ;;  %v7616_v19 = vld [vmem:[%s8238_s11] sm:$0x3] }
0x105a   :  { %v3921_v11 = vpop.permute.xlu1 %3920 }
0x105b   :  { %3958 = vst.msk [vmem:[#allocation2] sm:$0xff] %vm8551_vm2, %v3921_v11  ;;  %vm8555_vm2 = vmmov %vm8552_vm3 }
0x105c   :  { %v3923_v37 = vpop.permute.xlu0 %3922  ;;  %vm8559_vm9 = vmmov %vm8555_vm2 }
0x105d   :  { %v3940_v33 = vsel %vm8552_vm3, %v3921_v11, %v3923_v37  ;;  %vm8556_vm3 = vmmov %vm8555_vm2 }
0x105e   :  { %3959 = vst [vmem:[#allocation2 + $0x8] sm:$0xff] %v3940_v33 }
0x1060   :  { %v3933_v58 = vpop.permute.xlu1 %3932  ;;  %v3931_v23 = vpop.permute.xlu0 %3930 }
0x1061   :  { %v3944_v34 = vsel %vm8553_vm4, %v3931_v23, %v3933_v58  ;;  %3963 = vst.msk [vmem:[#allocation2 + $0x28] sm:$0xff] %vm8554_vm8, %v3931_v23  ;;  %vm8557_vm4 = vmmov %vm8555_vm2 }
0x1062   :  { %3964 = vst [vmem:[#allocation2 + $0x30] sm:$0xff] %v3944_v34  ;;  %v4494_v45 = vld [vmem:[#allocation2] sm:$0xff]  ;;  %vm8558_vm8 = vmmov %vm8555_vm2 }
0x1063   :  { %4514 = vrot.lane.b32.xlu1 %v4494_v45, %s5558_s18 }
0x1067   :  { %4436 = vrot.lane.b32.xlu1 %v4494_v45, %s5564_s22 }
0x1068   :  { %v4499_v35 = vld [vmem:[#allocation2 + $0x28] sm:$0xff] }
0x1069   :  { %4524 = vrot.lane.b32.xlu0 %v4499_v35, %s5558_s18 }
0x106b   :  { %4358 = vrot.lane.b32.xlu1 %v4494_v45, %s5563_s21 }
0x106d   :  { %4446 = vrot.lane.b32.xlu0 %v4499_v35, %s5564_s22 }
0x106f   :  { %4290 = vrot.lane.b32.xlu1 %v4494_v45, %s5566_s24 }
0x1071   :  { %4368 = vrot.lane.b32.xlu0 %v4499_v35, %s5563_s21 }
0x1073   :  { %4212 = vrot.lane.b32.xlu1 %v4494_v45, %s5562_s20 }
0x1075   :  { %4300 = vrot.lane.b32.xlu0 %v4499_v35, %s5566_s24 }
0x1077   :  { %4134 = vrot.lane.b32.xlu1 %v4494_v45, %s5561_s1 }
0x1079   :  { %4222 = vrot.lane.b32.xlu0 %v4499_v35, %s5562_s20 }
0x107b   :  { %4066 = vrot.lane.b32.xlu1 %v4494_v45, %s5565_s23 }
0x107d   :  { %4144 = vrot.lane.b32.xlu0 %v4499_v35, %s5561_s1 }
0x107f   :  { %3988 = vrot.lane.b32.xlu1 %v4494_v45, %s8465_s7 }
0x1080   :  { %v3927_v27 = vpop.permute.xlu0 %3926 }
0x1081   :  { %4076 = vrot.lane.b32.xlu0 %v4499_v35, %s5565_s23 }
0x1083   :  { %4582 = vrot.lane.b32.xlu1 %v4494_v45, %s5559_s12 }
0x1084   :  { %v3935_v26 = vpop.permute.xlu0 %3934 }
0x1085   :  { %v7508_v18 = vsel %vm8555_vm2, %v3933_v58, %v3935_v26  ;;  %3998 = vrot.lane.b32.xlu0 %v4499_v35, %s8465_s7  ;;  %vm8560_vm2 = vcmask 785408  }
0x1086   :  { %v3939_v52 = vpop.permute.xlu1 %3938 }
0x1087   :  { %4516 = vrot.lane.b32.xlu1 %v3940_v33, %s5558_s18 }
0x1088   :  { %v3937_v47 = vpop.permute.xlu0 %3936 }
0x1089   :  { %v7513_v54 = vsel %vm8556_vm3, %v3935_v26, %v3937_v47  ;;  %v3947_v50 = vsel %vm8557_vm4, %v3937_v47, %v3939_v52  ;;  %4592 = vrot.lane.b32.xlu0 %v4499_v35, %s5559_s12  ;;  %vm8561_vm4 = vmmov %vm8560_vm2 }
0x108a   :  { %v3925_v16 = vpop.permute.xlu1 %3924  ;;  %3967 = vst.msk [vmem:[#allocation2 + $0x48] sm:$0xff] %vm8560_vm2, %v3947_v50  ;;  %vm8565_vm2 = vcmask 654336  }
0x108b   :  { %v3941_v40 = vsel %vm8558_vm8, %v3923_v37, %v3925_v16  ;;  %v7519_v62 = vsel %vm8559_vm9, %v3925_v16, %v3927_v27  ;;  %4438 = vrot.lane.b32.xlu1 %v3940_v33, %s5564_s22  ;;  %v7624_v37 = vrot.slane %v7616_v19, %v5720_v20  ;;  %vm8563_vm9 = vcmask 130048  }
0x108c   :  { %3960 = vst [vmem:[#allocation2 + $0x10] sm:$0xff] %v3941_v40  ;;  %3961 = vst [vmem:[#allocation2 + $0x18] sm:$0xff] %v7519_v62 }
0x108d   :  { %4526 = vrot.lane.b32.xlu0 %v3944_v34, %s5558_s18  ;;  %8562 = vst [vmem:[#allocation23_spill] sm:$0xff] %v7624_v37  ;;  %5104 = vmatprep.mubr.msk.f32.mxu0 %vm8563_vm9, %v7624_v37  ;;  %vm8564_vm8 = vmmov %vm8563_vm9  ;;  %vm8568_vm9 = vcmask 777216  }
0x108e   :  { %v3929_v0 = vpop.permute.xlu1 %3928  ;;  %5105 = vmatprep.mubr.msk.f32.mxu1 %vm8564_vm8, %v7624_v37  ;;  %vm8569_vm8 = vmmov %vm8568_vm9 }
0x108f   :  { %v3943_v56 = vsel %vm8556_vm3, %v3927_v27, %v3929_v0  ;;  %4360 = vrot.lane.b32.xlu1 %v3940_v33, %s5563_s21  ;;  %vm8566_vm3 = vcmask 662528  }
0x1090   :  { %3962 = vst.msk [vmem:[#allocation2 + $0x20] sm:$0xff] %vm8561_vm4, %v3943_v56  ;;  %vm8567_vm4 = vmmov %vm8565_vm2 }
0x1091   :  { %4370 = vrot.lane.b32.xlu0 %v3944_v34, %s5563_s21  ;;  %v4503_v17 = vld [vmem:[#allocation2 + $0x48] sm:$0xff] }
0x1093   :  { %4292 = vrot.lane.b32.xlu1 %v3940_v33, %s5566_s24 }
0x1095   :  { %4302 = vrot.lane.b32.xlu0 %v3944_v34, %s5566_s24 }
0x1097   :  { %4214 = vrot.lane.b32.xlu1 %v3940_v33, %s5562_s20  ;;  %v7550_v5 = vld [vmem:[#allocation2 + $0x20] sm:$0xff] }
0x1099   :  { %4146 = vrot.lane.b32.xlu0 %v3944_v34, %s5561_s1 }
0x109b   :  { %4136 = vrot.lane.b32.xlu1 %v3940_v33, %s5561_s1 }
0x109d   :  { %4078 = vrot.lane.b32.xlu0 %v3944_v34, %s5565_s23 }
0x109f   :  { %4068 = vrot.lane.b32.xlu1 %v3940_v33, %s5565_s23 }
0x10a1   :  { %4594 = vrot.lane.b32.xlu0 %v3944_v34, %s5559_s12 }
0x10a3   :  { %3990 = vrot.lane.b32.xlu1 %v3940_v33, %s8465_s7 }
0x10a5   :  { %4518 = vrot.lane.b32.xlu0 %v3941_v40, %s5558_s18 }
0x10a7   :  { %4584 = vrot.lane.b32.xlu1 %v3940_v33, %s5559_s12 }
0x10a9   :  { %4440 = vrot.lane.b32.xlu0 %v3941_v40, %s5564_s22 }
0x10ab   :  { %4448 = vrot.lane.b32.xlu1 %v3944_v34, %s5564_s22 }
0x10ad   :  { %4362 = vrot.lane.b32.xlu0 %v3941_v40, %s5563_s21 }
0x10af   :  { %4224 = vrot.lane.b32.xlu1 %v3944_v34, %s5562_s20 }
0x10b1   :  { %4294 = vrot.lane.b32.xlu0 %v3941_v40, %s5566_s24 }
0x10b3   :  { %4000 = vrot.lane.b32.xlu1 %v3944_v34, %s8465_s7 }
0x10b5   :  { %4216 = vrot.lane.b32.xlu0 %v3941_v40, %s5562_s20 }
0x10b7   :  { %4520 = vrot.lane.b32.xlu1 %v7519_v62, %s5558_s18 }
0x10b9   :  { %4138 = vrot.lane.b32.xlu0 %v3941_v40, %s5561_s1 }
0x10bb   :  { %4444 = vrot.lane.b32.xlu1 %v7550_v5, %s5564_s22 }
0x10bd   :  { %4070 = vrot.lane.b32.xlu0 %v3941_v40, %s5565_s23 }
0x10bf   :  { %4366 = vrot.lane.b32.xlu1 %v7550_v5, %s5563_s21 }
0x10c1   :  { %3992 = vrot.lane.b32.xlu0 %v3941_v40, %s8465_s7 }
0x10c3   :  { %4298 = vrot.lane.b32.xlu1 %v7550_v5, %s5566_s24 }
0x10c5   :  { %4586 = vrot.lane.b32.xlu0 %v3941_v40, %s5559_s12 }
0x10c7   :  { %4528 = vrot.lane.b32.xlu1 %v7508_v18, %s5558_s18 }
0x10c9   :  { %4522 = vrot.lane.b32.xlu0 %v7550_v5, %s5558_s18 }
0x10cb   :  { %4220 = vrot.lane.b32.xlu1 %v7550_v5, %s5562_s20 }
0x10cd   :  { %4442 = vrot.lane.b32.xlu0 %v7519_v62, %s5564_s22 }
0x10cf   :  { %4142 = vrot.lane.b32.xlu1 %v7550_v5, %s5561_s1 }
0x10d1   :  { %4364 = vrot.lane.b32.xlu0 %v7519_v62, %s5563_s21 }
0x10d3   :  { %4372 = vrot.lane.b32.xlu1 %v7508_v18, %s5563_s21 }
0x10d5   :  { %v4515_v55 = vpop.permute.xlu1 %4514  ;;  %4296 = vrot.lane.b32.xlu0 %v7519_v62, %s5566_s24 }
0x10d7   :  { %4304 = vrot.lane.b32.xlu1 %v7508_v18, %s5566_s24 }
0x10d9   :  { %v4437_v61 = vpop.permute.xlu1 %4436  ;;  %4450 = vrot.lane.b32.xlu0 %v7508_v18, %s5564_s22 }
0x10db   :  { %v4525_v53 = vpop.permute.xlu0 %4524  ;;  %4074 = vrot.lane.b32.xlu1 %v7550_v5, %s5565_s23 }
0x10dd   :  { %v4359_v63 = vpop.permute.xlu1 %4358  ;;  %4218 = vrot.lane.b32.xlu0 %v7519_v62, %s5562_s20 }
0x10df   :  { %v7585_v1 = vpop.permute.xlu0 %4446  ;;  %3996 = vrot.lane.b32.xlu1 %v7550_v5, %s8465_s7 }
0x10e1   :  { %v4291_v43 = vpop.permute.xlu1 %4290  ;;  %4140 = vrot.lane.b32.xlu0 %v7519_v62, %s5561_s1 }
0x10e3   :  { %v4369_v57 = vpop.permute.xlu0 %4368  ;;  %4148 = vrot.lane.b32.xlu1 %v7508_v18, %s5561_s1 }
0x10e5   :  { %v4213_v42 = vpop.permute.xlu1 %4212  ;;  %4226 = vrot.lane.b32.xlu0 %v7508_v18, %s5562_s20 }
0x10e7   :  { %v4301_v44 = vpop.permute.xlu0 %4300  ;;  %4080 = vrot.lane.b32.xlu1 %v7508_v18, %s5565_s23 }
0x10e9   :  { %v4135_v25 = vpop.permute.xlu1 %4134  ;;  %4072 = vrot.lane.b32.xlu0 %v7519_v62, %s5565_s23 }
0x10eb   :  { %v7599_v48 = vpop.permute.xlu0 %4222  ;;  %4596 = vrot.lane.b32.xlu1 %v7508_v18, %s5559_s12 }
0x10ed   :  { %v7603_v36 = vpop.permute.xlu1 %4066  ;;  %3994 = vrot.lane.b32.xlu0 %v7519_v62, %s8465_s7 }
0x10ef   :  { %v4145_v28 = vpop.permute.xlu0 %4144  ;;  %4532 = vrot.lane.b32.xlu1 %v4503_v17, %s5558_s18 }
0x10f1   :  { %v7608_v15 = vpop.permute.xlu1 %3988  ;;  %4002 = vrot.lane.b32.xlu0 %v7508_v18, %s8465_s7 }
0x10f3   :  { %v4077_v24 = vpop.permute.xlu0 %4076  ;;  %4454 = vrot.lane.b32.xlu1 %v4503_v17, %s5564_s22 }
0x10f5   :  { %v7618_v11 = vpop.permute.xlu1 %4582  ;;  %4530 = vrot.lane.b32.xlu0 %v7513_v54, %s5558_s18 }
0x10f7   :  { %v7626_v33 = vpop.permute.xlu0 %3998  ;;  %4376 = vrot.lane.b32.xlu1 %v4503_v17, %s5563_s21 }
0x10f9   :  { %4452 = vrot.lane.b32.xlu0 %v7513_v54, %s5564_s22  ;;  %v4517_v58 = vpop.permute.xlu1 %4516 }
0x10fa   :  { %v7636_v23 = vsel %vm8565_vm2, %v4515_v55, %v4517_v58  ;;  %vm8570_vm2 = vcmask 785408  }
0x10fb   :  { %v4593_v34 = vpop.permute.xlu0 %4592  ;;  %4308 = vrot.lane.b32.xlu1 %v4503_v17, %s5566_s24 }
0x10fd   :  { %4374 = vrot.lane.b32.xlu0 %v7513_v54, %s5563_s21  ;;  %v4439_v20 = vpop.permute.xlu1 %4438 }
0x10fe   :  { %v7642_v45 = vsel %vm8566_vm3, %v4437_v61, %v4439_v20  ;;  %vm8571_vm3 = vmmov %vm8570_vm2 }
0x10ff   :  { %v7644_v35 = vpop.permute.xlu0 %4526  ;;  %4230 = vrot.lane.b32.xlu1 %v4503_v17, %s5562_s20 }
0x1100   :  { %v7649_v27 = vsel %vm8567_vm4, %v4525_v53, %v7644_v35  ;;  %vm8572_vm4 = vcmask 793600  }
0x1101   :  { %4306 = vrot.lane.b32.xlu0 %v7513_v54, %s5566_s24  ;;  %v4361_v26 = vpop.permute.xlu1 %4360 }
0x1102   :  { %v7654_v52 = vsel %vm8568_vm9, %v4359_v63, %v4361_v26  ;;  %vm8573_vm9 = vcmask 908288  }
0x1103   :  { %v7656_v18 = vpop.permute.xlu0 %4370  ;;  %4152 = vrot.lane.b32.xlu1 %v4503_v17, %s5561_s1 }
0x1104   :  { %v7661_v47 = vsel %vm8569_vm8, %v4369_v57, %v7656_v18  ;;  %vm8574_vm8 = vmmov %vm8573_vm9 }
0x1105   :  { %4228 = vrot.lane.b32.xlu0 %v7513_v54, %s5562_s20  ;;  %v4293_v16 = vpop.permute.xlu1 %4292 }
0x1106   :  { %v7666_v50 = vsel %vm8570_vm2, %v4291_v43, %v4293_v16  ;;  %vm8575_vm2 = vcmask 916480  }
0x1107   :  { %4328 = vst [vmem:[#allocation3 + $0x140] sm:$0xff] %v7666_v50  ;;  %v7669_v40 = vpop.permute.xlu0 %4302  ;;  %4084 = vrot.lane.b32.xlu1 %v4503_v17, %s5565_s23 }
0x1108   :  { %v7674_v0 = vsel %vm8571_vm3, %v4301_v44, %v7669_v40  ;;  %vm8576_vm3 = vmmov %vm8575_vm2 }
0x1109   :  { %4150 = vrot.lane.b32.xlu0 %v7513_v54, %s5561_s1  ;;  %v4215_v56 = vpop.permute.xlu1 %4214 }
0x110a   :  { %v7679_v55 = vsel %vm8572_vm4, %v4213_v42, %v4215_v56  ;;  %vm8579_vm4 = vcmask 924672  }
0x110b   :  { %v4250_v61 = vsel %vm8486_vm13, 0.0, %v7679_v55  ;;  %v7684_v53 = vpop.permute.xlu0 %4146  ;;  %4006 = vrot.lane.b32.xlu1 %v4503_v17, %s8465_s7 }
0x110c   :  { %4260 = vst [vmem:[#allocation3 + $0xf0] sm:$0xff] %v4250_v61  ;;  %v7689_v63 = vsel %vm8573_vm9, %v4145_v28, %v7684_v53  ;;  %vm8580_vm9 = vcmask 654336  }
0x110d   :  { %v4177_v43 = vsel %vm8475_vm1, 0.0, %v7689_v63  ;;  %4082 = vrot.lane.b32.xlu0 %v7513_v54, %s5565_s23  ;;  %v4137_v57 = vpop.permute.xlu1 %4136 }
0x110e   :  { %4187 = vst [vmem:[#allocation3 + $0xc8] sm:$0xff] %v4177_v43  ;;  %v7697_v42 = vsel %vm8574_vm8, %v4135_v25, %v4137_v57 }
0x110f   :  { %v4172_v44 = vsel %vm8475_vm1, 0.0, %v7697_v42  ;;  %v7702_v61 = vpop.permute.xlu0 %4078  ;;  %4600 = vrot.lane.b32.xlu1 %v4503_v17, %s5559_s12  ;;  %vm8577_vm1 = vcmask 646144  }
0x1110   :  { %4182 = vst [vmem:[#allocation3 + $0xa0] sm:$0xff] %v4172_v44  ;;  %v7707_v28 = vsel %vm8575_vm2, %v4077_v24, %v7702_v61  ;;  %vm8581_vm8 = vmmov %vm8577_vm1  ;;  %vm8583_vm2 = vcmask 662528  }
0x1111   :  { %4109 = vst [vmem:[#allocation3 + $0x78] sm:$0xff] %v7707_v28  ;;  %4004 = vrot.lane.b32.xlu0 %v7513_v54, %s8465_s7  ;;  %v4069_v25 = vpop.permute.xlu1 %4068 }
0x1112   :  { %v7714_v43 = vsel %vm8576_vm3, %v7603_v36, %v4069_v25  ;;  %vm8584_vm3 = vmmov %vm8583_vm2 }
0x1113   :  { %4104 = vst [vmem:[#allocation3 + $0x50] sm:$0xff] %v7714_v43  ;;  %v7717_v30 = vpop.permute.xlu0 %4594  ;;  %4590 = vrot.lane.b32.xlu1 %v7550_v5, %s5559_s12 }
0x1114   :  { %v7723_v17 = vsel %vm8577_vm1, %v4593_v34, %v7717_v30  ;;  %vm8585_vm1 = vcmask 777216  }
0x1115   :  { %8578 = vst [vmem:[#allocation24_spill] sm:$0xff] %v7723_v17  ;;  %4598 = vrot.lane.b32.xlu0 %v7513_v54, %s5559_s12  ;;  %v3991_v24 = vpop.permute.xlu1 %3990 }
0x1116   :  { %v7729_v44 = vsel %vm8579_vm4, %v7608_v15, %v3991_v24  ;;  %v4731_v15 = vld [vmem:[#allocation4] sm:$0x1]  ;;  %vm8586_vm4 = vcmask 793600  }
0x1117   :  { %v4026_v36 = vsel %vm8486_vm13, 0.0, %v7729_v44  ;;  %v4519_v3 = vpop.permute.xlu0 %4518 }
0x1118   :  { %4036 = vst [vmem:[#allocation3] sm:$0xff] %v4026_v36  ;;  %v7735_v5 = vsel %vm8580_vm9, %v4517_v58, %v4519_v3  ;;  %vm8587_vm9 = vcmask 785408  }
0x1119   :  { %4553 = vst [vmem:[#allocation3 + $0x238] sm:$0xff] %v7735_v5  ;;  %4588 = vrot.lane.b32.xlu0 %v7519_v62, %s5559_s12  ;;  %v4585_v54 = vpop.permute.xlu1 %4584 }
0x111a   :  { %v7742_v34 = vsel %vm8581_vm8, %v7618_v11, %v4585_v54  ;;  %vm8588_vm8 = vcmask 924672  }
0x111b   :  { %8582 = vst [vmem:[#allocation25_spill] sm:$0xff] %v7742_v34  ;;  %v7744_v10 = vpop.permute.xlu0 %4440 }
0x111c   :  { %v7748_v49 = vsel %vm8583_vm2, %v4439_v20, %v7744_v10  ;;  %vm8589_vm2 = vmmov %vm8586_vm4 }
0x111d   :  { %v4475_v58 = vsel %vm8482_vm6, 0.0, %v7748_v49  ;;  %4734 = vperm.xlu0 %5224, %v4731_v15   ;;  %v7753_v36 = vpop.permute.xlu1 %4448 }
0x111e   :  { %4485 = vst [vmem:[#allocation3 + $0x1e8] sm:$0xff] %v4475_v58  ;;  %v7758_v62 = vsel %vm8584_vm3, %v7585_v1, %v7753_v36  ;;  %vm8590_vm3 = vcmask 654336  }
0x111f   :  { %v7760_v11 = vpop.permute.xlu0 %4362 }
0x1120   :  { %v7764_v46 = vsel %vm8585_vm1, %v4361_v26, %v7760_v11  ;;  %vm8593_vm1 = vcmask 523264  }
0x1121   :  { %v4397_v20 = vsel %vm8472_vm7, 0.0, %v7764_v46  ;;  %v7769_v39 = vpop.permute.xlu1 %4224 }
0x1122   :  { %4407 = vst [vmem:[#allocation3 + $0x198] sm:$0xff] %v4397_v20  ;;  %v7774_v15 = vsel %vm8586_vm4, %v7599_v48, %v7769_v39  ;;  %vm8594_vm4 = vcmask 916480  }
0x1123   :  { %v4255_v1 = vsel %vm8486_vm13, 0.0, %v7774_v15  ;;  %v7779_v58 = vpop.permute.xlu0 %4294 }
0x1124   :  { %4265 = vst [vmem:[#allocation3 + $0x118] sm:$0xff] %v4255_v1  ;;  %v7783_v26 = vsel %vm8587_vm9, %v4293_v16, %v7779_v58  ;;  %vm8595_vm9 = vmmov %vm8593_vm1 }
0x1125   :  { %4329 = vst [vmem:[#allocation3 + $0x148] sm:$0xff] %v7783_v26  ;;  %v7786_v21 = vpop.permute.xlu1 %4000 }
0x1126   :  { %v7791_v48 = vsel %vm8588_vm8, %v7626_v33, %v7786_v21 }
0x1127   :  { %v4031_v20 = vsel %vm8486_vm13, 0.0, %v7791_v48  ;;  %v7796_v29 = vpop.permute.xlu0 %4216  ;;  %vm8592_vm13 = vcmask 908288  }
0x1128   :  { %4041 = vst [vmem:[#allocation3 + $0x28] sm:$0xff] %v4031_v20  ;;  %v7800_v16 = vsel %vm8589_vm2, %v4215_v56, %v7796_v29  ;;  %vm8596_vm2 = vmmov %vm8593_vm1 }
0x1129   :  { %v4251_v1 = vsel %vm8482_vm6, 0.0, %v7800_v16  ;;  %v4521_v37 = vpop.permute.xlu1 %4520 }
0x112a   :  { %4261 = vst [vmem:[#allocation3 + $0xf8] sm:$0xff] %v4251_v1  ;;  %v7806_v33 = vsel %vm8590_vm3, %v4519_v3, %v4521_v37  ;;  %vm8598_vm3 = vcmask 646144  }
0x112b   :  { %8591 = vst [vmem:[#allocation26_spill] sm:$0xff] %v7806_v33  ;;  %v7808_v22 = vpop.permute.xlu0 %4138 }
0x112c   :  { %v7812_v60 = vsel %vm8592_vm13, %v4137_v57, %v7808_v22  ;;  %vm8599_vm13 = vcmask 654336  }
0x112d   :  { %v4173_v56 = vsel %vm8472_vm7, 0.0, %v7812_v60  ;;  %v4445_v20 = vpop.permute.xlu1 %4444 }
0x112e   :  { %4183 = vst [vmem:[#allocation3 + $0xa8] sm:$0xff] %v4173_v56  ;;  %v4478_v6 = vsel %vm8516_vm12, 0.0, %v4445_v20 }
0x112f   :  { %4488 = vst.msk [vmem:[#allocation3 + $0x200] sm:$0xff] %vm8593_vm1, %v4478_v6  ;;  %v7820_v1 = vpop.permute.xlu0 %4070  ;;  %vm8600_vm1 = vmmov %vm8599_vm13 }
0x1130   :  { %v7824_v3 = vsel %vm8594_vm4, %v4069_v25, %v7820_v1  ;;  %vm8601_vm4 = vmmov %vm8596_vm2 }
0x1131   :  { %4105 = vst [vmem:[#allocation3 + $0x58] sm:$0xff] %v7824_v3  ;;  %v4367_v57 = vpop.permute.xlu1 %4366 }
0x1132   :  { %v4400_v38 = vsel %vm8502_vm11, 0.0, %v4367_v57 }
0x1133   :  { %4410 = vst.msk [vmem:[#allocation3 + $0x1b0] sm:$0xff] %vm8595_vm9, %v4400_v38  ;;  %v7830_v56 = vpop.permute.xlu0 %3992  ;;  %vm8602_vm9 = vmmov %vm8596_vm2 }
0x1134   :  { %v7834_v32 = vsel %vm8588_vm8, %v3991_v24, %v7830_v56  ;;  %vm8603_vm8 = vcmask 662528  }
0x1135   :  { %v4027_v6 = vsel %vm8482_vm6, 0.0, %v7834_v32  ;;  %v4299_v25 = vpop.permute.xlu1 %4298 }
0x1136   :  { %4037 = vst [vmem:[#allocation3 + $0x8] sm:$0xff] %v4027_v6  ;;  %4332 = vst.msk [vmem:[#allocation3 + $0x160] sm:$0xff] %vm8596_vm2, %v4299_v25 }
0x1137   :  { %v7840_v4 = vpop.permute.xlu0 %4586  ;;  %vm8604_vm2 = vmmov %vm8603_vm8 }
0x1138   :  { %8597 = vst [vmem:[#allocation27_spill] sm:$0xff] %v7840_v4  ;;  %v7844_v34 = vsel %vm8598_vm3, %v4585_v54, %v7840_v4  ;;  %vm8605_vm3 = vmmov %vm8601_vm4 }
0x1139   :  { %v4621_v38 = vsel %vm8472_vm7, 0.0, %v7844_v34  ;;  %v7849_v24 = vpop.permute.xlu1 %4528 }
0x113a   :  { %4631 = vst [vmem:[#allocation3 + $0x288] sm:$0xff] %v4621_v38  ;;  %v4539_v33 = vsel %vm8599_vm13, %v7644_v35, %v7849_v24  ;;  %vm8606_vm13 = vcmask 777216  }
0x113b   :  { %4558 = vst [vmem:[#allocation3 + $0x260] sm:$0xff] %v4539_v33  ;;  %v4523_v6 = vpop.permute.xlu0 %4522  ;;  %4753 = vmatprep.subr.mxu0 %v4539_v33 }
0x113c   :  { %v7855_v17 = vsel %vm8600_vm1, %v4521_v37, %v4523_v6  ;;  %4556 = vst.msk [vmem:[#allocation3 + $0x250] sm:$0xff] %vm8601_vm4, %v4523_v6  ;;  %4754 = vmatpush1.msra.mxu0 %v7649_v27  ;;  %vm8607_vm1 = vmmov %vm8606_vm13 }
0x113d   :  { %v4221_v54 = vpop.permute.xlu1 %4220  ;;  %4755 = vmatprep.subr.mxu0 %v7735_v5  ;;  %vm8608_vm4 = vmmov %vm8607_vm1 }
0x113e   :  { %v4254_v38 = vsel %vm8516_vm12, 0.0, %v4221_v54  ;;  %4756 = vmatpush1.msra.mxu0 %v7636_v23 }
0x113f   :  { %4264 = vst.msk [vmem:[#allocation3 + $0x110] sm:$0xff] %vm8602_vm9, %v4254_v38  ;;  %v4443_v35 = vpop.permute.xlu0 %4442  ;;  %vm8609_vm9 = vcmask 785408  }
0x1140   :  { %v7866_v33 = vsel %vm8603_vm8, %v7744_v10, %v4443_v35  ;;  %v7869_v37 = vsel %vm8604_vm2, %v4443_v35, %v4445_v20  ;;  %vm8611_vm8 = vmmov %vm8609_vm9 }
0x1141   :  { %v4143_v6 = vpop.permute.xlu1 %4142  ;;  %vm8612_vm2 = vmmov %vm8611_vm8 }
0x1142   :  { %v4176_v27 = vsel %vm8502_vm11, 0.0, %v4143_v6 }
0x1143   :  { %4186 = vst.msk [vmem:[#allocation3 + $0xc0] sm:$0xff] %vm8605_vm3, %v4176_v27  ;;  %v4365_v5 = vpop.permute.xlu0 %4364  ;;  %vm8613_vm3 = vcmask 662528  }
0x1144   :  { %v7876_v23 = vsel %vm8606_vm13, %v7760_v11, %v4365_v5  ;;  %v7879_v38 = vsel %vm8607_vm1, %v4365_v5, %v4367_v57  ;;  %vm8614_vm13 = vcmask 523264   ;;  %vm8615_vm1 = vnez %v8488_v8 }
0x1145   :  { %v7881_v4 = vpop.permute.xlu1 %4372 }
0x1146   :  { %v4383_v10 = vsel %vm8608_vm4, %v7656_v18, %v7881_v4  ;;  %vm8616_vm4 = vcmask 793600  }
0x1147   :  { %v4402_v20 = vsel %vm8472_vm7, 0.0, %v4383_v10  ;;  %v4297_v35 = vpop.permute.xlu0 %4296 }
0x1148   :  { %4412 = vst [vmem:[#allocation3 + $0x1c0] sm:$0xff] %v4402_v20  ;;  %v7890_v27 = vsel %vm8609_vm9, %v7779_v58, %v4297_v35  ;;  %v7893_v11 = vsel %vm8611_vm8, %v4297_v35, %v4299_v25  ;;  %vm8617_vm9 = vmmov %vm8616_vm4  ;;  %vm8618_vm8 = vnez %v8474_v51 }
0x1149   :  { %8610 = vst [vmem:[#allocation28_spill] sm:$0xff] %v7890_v27  ;;  %v7895_v57 = vpop.permute.xlu1 %4304 }
0x114a   :  { %v4315_v5 = vsel %vm8612_vm2, %v7669_v40, %v7895_v57  ;;  %vm8619_vm2 = vmmov %vm8614_vm13 }
0x114b   :  { %4334 = vst [vmem:[#allocation3 + $0x170] sm:$0xff] %v4315_v5  ;;  %v7900_v18 = vpop.permute.xlu0 %4450 }
0x114c   :  { %v4461_v20 = vsel %vm8613_vm3, %v7753_v36, %v7900_v18  ;;  %vm8620_vm3 = vnez %v8477_v2 }
0x114d   :  { %v4480_v58 = vsel %vm8482_vm6, 0.0, %v4461_v20  ;;  %v4075_v27 = vpop.permute.xlu1 %4074  ;;  %5388 = vmatprep.subr.msk.mxu0 %vm7282_vm14, %v4461_v20 }
0x114e   :  { %4490 = vst [vmem:[#allocation3 + $0x210] sm:$0xff] %v4480_v58  ;;  %4108 = vst.msk [vmem:[#allocation3 + $0x70] sm:$0xff] %vm8614_vm13, %v4075_v27  ;;  %5390 = vmatpush1.msk.msra.mxu0 %vm8615_vm1, %v7758_v62  ;;  %vm8621_vm13 = vcmask 908288   ;;  %v8645_v58 = vld [vmem:[#allocation22_spill] sm:$0xff] }
0x114f   :  { %v4219_v25 = vpop.permute.xlu0 %4218  ;;  %5392 = vmatprep.subr.msk.mxu0 %vm7282_vm14, %v7748_v49 }
0x1150   :  { %v7915_v40 = vsel %vm8616_vm4, %v7796_v29, %v4219_v25  ;;  %v7918_v36 = vsel %vm8617_vm9, %v4219_v25, %v4221_v54  ;;  %5394 = vmatpush1.msk.msra.mxu0 %vm8615_vm1, %v7642_v45  ;;  %vm8622_vm4 = vmmov %vm8621_vm13 }
0x1151   :  { %v3997_v35 = vpop.permute.xlu1 %3996  ;;  %5396 = vmatprep.subr.msk.mxu0 %vm8618_vm8, %v4383_v10  ;;  %vm8623_vm9 = vmmov %vm8622_vm4 }
0x1152   :  { %v4030_v20 = vsel %vm8516_vm12, 0.0, %v3997_v35  ;;  %5398 = vmatpush1.msk.msra.mxu0 %vm8620_vm3, %v7661_v47 }
0x1153   :  { %4040 = vst.msk [vmem:[#allocation3 + $0x20] sm:$0xff] %vm8619_vm2, %v4030_v20  ;;  %v4141_v29 = vpop.permute.xlu0 %4140  ;;  %5400 = vmatprep.subr.msk.mxu0 %vm8618_vm8, %v7764_v46  ;;  %vm8624_vm2 = vcmask 793600   ;;  %v4714_v20 = vld [vmem:[#allocation3 + $0x250] sm:$0xff] }
0x1154   :  { %v7936_v49 = vsel %vm8621_vm13, %v7808_v22, %v4141_v29  ;;  %v7939_v62 = vsel %vm8622_vm4, %v4141_v29, %v4143_v6  ;;  %5402 = vmatpush1.msk.msra.mxu0 %vm8620_vm3, %v7654_v52  ;;  %vm8625_vm13 = vcmask 916480  }
0x1155   :  { %v7944_v45 = vpop.permute.xlu1 %4148  ;;  %4765 = vmatprep.subr.mxu0 %v4315_v5  ;;  %vm8626_vm4 = vmmov %vm8625_vm13  ;;  %v8643_v5 = vld [vmem:[#allocation25_spill] sm:$0xff]  ;;  %v4654_v41 = vld [vmem:[#allocation3 + $0x70] sm:$0xff] }
0x1156   :  { %v4159_v47 = vsel %vm8623_vm9, %v7684_v53, %v7944_v45  ;;  %4766 = vmatpush1.msra.mxu0 %v7674_v0  ;;  %vm8627_vm9 = vmmov %vm8626_vm4 }
0x1157   :  { %v4178_v22 = vsel %vm8472_vm7, 0.0, %v4159_v47  ;;  %v7954_v54 = vpop.permute.xlu0 %4226  ;;  %4767 = vmatprep.subr.mxu0 %v7783_v26 }
0x1158   :  { %4188 = vst [vmem:[#allocation3 + $0xd0] sm:$0xff] %v4178_v22  ;;  %v4237_v46 = vsel %vm8624_vm2, %v7769_v39, %v7954_v54  ;;  %4768 = vmatpush1.msra.mxu0 %v7666_v50  ;;  %vm8628_vm2 = vcmask 646144  }
0x1159   :  { %v4256_v52 = vsel %vm8482_vm6, 0.0, %v4237_v46  ;;  %v7963_v6 = vpop.permute.xlu1 %4080  ;;  %5404 = vmatprep.subr.msk.mxu0 %vm7282_vm14, %v4237_v46 }
0x115a   :  { %4266 = vst [vmem:[#allocation3 + $0x120] sm:$0xff] %v4256_v52  ;;  %v4091_v53 = vsel %vm8625_vm13, %v7702_v61, %v7963_v6  ;;  %5406 = vmatpush1.msk.msra.mxu0 %vm8615_vm1, %v7774_v15  ;;  %vm8629_vm13 = vcmask 924672  }
0x115b   :  { %4110 = vst [vmem:[#allocation3 + $0x80] sm:$0xff] %v4091_v53  ;;  %v4073_v0 = vpop.permute.xlu0 %4072  ;;  %5408 = vmatprep.subr.msk.mxu0 %vm7282_vm14, %v7800_v16 }
0x115c   :  { %v7976_v39 = vsel %vm8626_vm4, %v7820_v1, %v4073_v0  ;;  %v7979_v50 = vsel %vm8627_vm9, %v4073_v0, %v4075_v27  ;;  %5410 = vmatpush1.msk.msra.mxu0 %vm8615_vm1, %v7679_v55  ;;  %vm8630_vm4 = vmmov %vm8629_vm13  ;;  %vm8632_vm9 = vnez %v8358_v14 }
0x115d   :  { %v7984_v61 = vpop.permute.xlu1 %4596  ;;  %5412 = vmatprep.subr.msk.mxu0 %vm8618_vm8, %v4159_v47 }
0x115e   :  { %v4607_v15 = vsel %vm8628_vm2, %v7717_v30, %v7984_v61  ;;  %5414 = vmatpush1.msk.msra.mxu0 %vm8620_vm3, %v7689_v63  ;;  %vm8633_vm2 = vcmask 523264  }
0x115f   :  { %v4626_v26 = vsel %vm8472_vm7, 0.0, %v4607_v15  ;;  %v3995_v1 = vpop.permute.xlu0 %3994  ;;  %5416 = vmatprep.subr.msk.mxu0 %vm8618_vm8, %v7812_v60  ;;  %vm8631_vm7 = vnez %v8356_v9 }
0x1160   :  { %4636 = vst [vmem:[#allocation3 + $0x2b0] sm:$0xff] %v4626_v26  ;;  %v8001_v16 = vsel %vm8629_vm13, %v7830_v56, %v3995_v1  ;;  %v8004_v55 = vsel %vm8630_vm4, %v3995_v1, %v3997_v35  ;;  %5418 = vmatpush1.msk.msra.mxu0 %vm8620_vm3, %v7697_v42  ;;  %vm8634_vm13 = vmmov %vm8630_vm4  ;;  %v8657_v1 = vld [vmem:[#allocation28_spill] sm:$0xff] }
0x1161   :  { %v4028_v31 = vsel %vm8631_vm7, 0.0, %v8001_v16  ;;  %v4029_v63 = vsel %vm8632_vm9, 0.0, %v8004_v55  ;;  %v4533_v30 = vpop.permute.xlu1 %4532  ;;  %4777 = vmatprep.subr.mxu0 %v4091_v53  ;;  %vm8635_vm4 = vmmov %vm8633_vm2  ;;  %v4704_v53 = vld [vmem:[#allocation3 + $0x200] sm:$0xff] }
0x1162   :  { %4038 = vst [vmem:[#allocation3 + $0x10] sm:$0xff] %v4028_v31  ;;  %4039 = vst [vmem:[#allocation3 + $0x18] sm:$0xff] %v4029_v63  ;;  %4778 = vmatpush1.msra.mxu0 %v7707_v28  ;;  %v4694_v31 = vld [vmem:[#allocation3 + $0x1b0] sm:$0xff] }
0x1163   :  { %4561 = vst.msk [vmem:[#allocation3 + $0x278] sm:$0xff] %vm8633_vm2, %v4533_v30  ;;  %v8019_v56 = vpop.permute.xlu0 %4002  ;;  %4779 = vmatprep.subr.mxu0 %v7824_v3  ;;  %vm8636_vm2 = vcmask 654336  }
0x1164   :  { %v4013_v60 = vsel %vm8634_vm13, %v7786_v21, %v8019_v56  ;;  %4780 = vmatpush1.msra.mxu0 %v7714_v43  ;;  %vm8638_vm13 = vmmov %vm8635_vm4 }
0x1165   :  { %v4032_v10 = vsel %vm8482_vm6, 0.0, %v4013_v60  ;;  %v4455_v27 = vpop.permute.xlu1 %4454  ;;  %5420 = vmatprep.subr.msk.mxu0 %vm7282_vm14, %v4013_v60  ;;  %vm8637_vm6 = vmmov %vm8636_vm2 }
0x1166   :  { %4042 = vst [vmem:[#allocation3 + $0x30] sm:$0xff] %v4032_v10  ;;  %v4483_v42 = vsel %vm8516_vm12, 0.0, %v4455_v27  ;;  %5422 = vmatpush1.msk.msra.mxu0 %vm8615_vm1, %v7791_v48  ;;  %v8052_v48 = vrot.slane %v7616_v19, %v5712_v13  ;;  %v8642_v19 = vld [vmem:[#allocation26_spill] sm:$0xff] }
0x1167   :  { %4493 = vst.msk [vmem:[#allocation3 + $0x228] sm:$0xff] %vm8635_vm4, %v4483_v42  ;;  %v4531_v28 = vpop.permute.xlu0 %4530  ;;  %5424 = vmatprep.subr.msk.mxu0 %vm7282_vm14, %v7834_v32  ;;  %v8639_v32 = vld [vmem:[#allocation24_spill] sm:$0xff]  ;;  %vm8640_vm14 = vcmask 662528   ;;  %v4684_v10 = vld [vmem:[#allocation3 + $0x160] sm:$0xff] }
0x1168   :  { %v4540_v59 = vsel %vm8636_vm2, %v7849_v24, %v4531_v28  ;;  %v4541_v21 = vsel %vm8637_vm6, %v4531_v28, %v4533_v30  ;;  %5426 = vmatpush1.msk.msra.mxu0 %vm8615_vm1, %v7729_v44  ;;  %vm8641_vm1 = vmmov %vm8640_vm14  ;;  %vm8652_vm6 = vcmask 785408   ;;  %v4674_v28 = vld [vmem:[#allocation3 + $0x110] sm:$0xff] }
0x1169   :  { %v4377_v43 = vpop.permute.xlu1 %4376  ;;  %4824 = vmatprep.subr.mxu1 %v4541_v21  ;;  %5428 = vmatprep.subr.msk.mxu0 %vm8618_vm8, %v4607_v15 }
0x116a   :  { %v4405_v3 = vsel %vm8502_vm11, 0.0, %v4377_v43  ;;  %4825 = vmatpush1.msra.mxu1 %v4540_v59  ;;  %5430 = vmatpush2.msk.msra.mxu0 %vm8620_vm3, %v8639_v32  ;;  %v4719_v51 = vld [vmem:[#allocation3 + $0x278] sm:$0xff]  ;;  %v4664_v32 = vld [vmem:[#allocation3 + $0xc0] sm:$0xff] }
0x116b   :  { %4415 = vst.msk [vmem:[#allocation3 + $0x1d8] sm:$0xff] %vm8638_vm13, %v4405_v3  ;;  %v4453_v12 = vpop.permute.xlu0 %4452  ;;  %4826 = vmatprep.subr.mxu1 %v7855_v17  ;;  %5432 = vmatprep.subr.msk.mxu0 %vm8618_vm8, %v7844_v34  ;;  %vm8647_vm8 = vcmask 777216   ;;  %vm8653_vm13 = vmmov %vm8652_vm6 }
0x116c   :  { %v4462_v8 = vsel %vm8640_vm14, %v7900_v18, %v4453_v12  ;;  %v4463_v44 = vsel %vm8641_vm1, %v4453_v12, %v4455_v27  ;;  %4827 = vmatpush1.msra.mxu1 %v8642_v19  ;;  %5434 = vmatpush2.msk.msra.mxu0 %vm8620_vm3, %v8643_v5  ;;  %vm8648_vm2 = vmmov %vm8647_vm8  ;;  %vm8655_vm1 = vcmask 793600  }
0x116d   :  { %v4309_v24 = vpop.permute.xlu1 %4308  ;;  %4818 = vmatmul.mubr.f32.vlgmr.msra.gmra.mxu0 %v8052_v48  ;;  %5436 = vmatprep.subr.msk.mxu1 %vm7386_vm5, %v4463_v44  ;;  %vm8650_vm3 = vmmov %vm8635_vm4  ;;  %v8670_v44 = vld [vmem:[#allocation27_spill] sm:$0xff] }
0x116e   :  { %4337 = vst.msk [vmem:[#allocation3 + $0x188] sm:$0xff] %vm8635_vm4, %v4309_v24  ;;  %4895 = vmatprep.subr.mxu0 %v8645_v58  ;;  %5438 = vmatpush1.msk.msra.mxu1 %vm7396_vm15, %v4462_v8  ;;  %v4709_v22 = vld [vmem:[#allocation3 + $0x228] sm:$0xff]  ;;  %vm8654_vm14 = vmmov %vm8650_vm3 }
0x116f   :  { %v4375_v18 = vpop.permute.xlu0 %4374  ;;  %4896 = vmatpush1.msra.mxu0 %v4719_v51  ;;  %5440 = vmatprep.subr.msk.mxu1 %vm7386_vm5, %v7869_v37  ;;  %vm8656_vm4 = vmmov %vm8655_vm1 }
0x1170   :  { %v4384_v34 = vsel %vm8647_vm8, %v7881_v4, %v4375_v18  ;;  %v4385_v2 = vsel %vm8648_vm2, %v4375_v18, %v4377_v43  ;;  %4897 = vmatprep.subr.mxu0 %v8645_v58  ;;  %5442 = vmatpush1.msk.msra.mxu1 %vm7396_vm15, %v7866_v33  ;;  %vm8658_vm8 = vmmov %vm8650_vm3  ;;  %vm8659_vm2 = vcmask 908288  }
0x1171   :  { %v4231_v35 = vpop.permute.xlu1 %4230  ;;  %4898 = vmatpush1.msra.mxu0 %v4714_v20  ;;  %5444 = vmatprep.subr.msk.mxu1 %vm7357_vm10, %v4385_v2 }
0x1172   :  { %v4259_v29 = vsel %vm8516_vm12, 0.0, %v4231_v35  ;;  %4899 = vmatprep.subr.mxu0 %v8645_v58  ;;  %5446 = vmatpush1.msk.msra.mxu1 %vm7365_vm0, %v4384_v34 }
0x1173   :  { %4269 = vst.msk [vmem:[#allocation3 + $0x138] sm:$0xff] %vm8650_vm3, %v4259_v29  ;;  %v4307_v47 = vpop.permute.xlu0 %4306  ;;  %4900 = vmatpush1.msra.mxu0 %v4709_v22  ;;  %5448 = vmatprep.subr.msk.mxu1 %vm7357_vm10, %v7879_v38  ;;  %v4699_v38 = vld [vmem:[#allocation3 + $0x1d8] sm:$0xff]  ;;  %vm8660_vm3 = vmmov %vm8659_vm2 }
0x1174   :  { %v4316_v33 = vsel %vm8652_vm6, %v7895_v57, %v4307_v47  ;;  %v4317_v46 = vsel %vm8653_vm13, %v4307_v47, %v4309_v24  ;;  %4901 = vmatprep.subr.mxu0 %v8645_v58  ;;  %5450 = vmatpush1.msk.msra.mxu1 %vm7365_vm0, %v7876_v23  ;;  %vm8661_vm6 = vmmov %vm8658_vm8  ;;  %vm8662_vm13 = vcmask 916480   ;;  %v8673_v24 = vld [vmem:[#allocation23_spill] sm:$0xff] }
0x1175   :  { %v4153_v52 = vpop.permute.xlu1 %4152  ;;  %4902 = vmatpush1.msra.mxu0 %v4704_v53  ;;  %4836 = vmatprep.subr.mxu1 %v4317_v46 }
0x1176   :  { %v4181_v0 = vsel %vm8502_vm11, 0.0, %v4153_v52  ;;  %4903 = vmatprep.subr.mxu0 %v8645_v58  ;;  %4837 = vmatpush1.msra.mxu1 %v4316_v33 }
0x1177   :  { %4191 = vst.msk [vmem:[#allocation3 + $0xe8] sm:$0xff] %vm8654_vm14, %v4181_v0  ;;  %v4229_v57 = vpop.permute.xlu0 %4228  ;;  %4904 = vmatpush1.msra.mxu0 %v4699_v38  ;;  %4838 = vmatprep.subr.mxu1 %v7893_v11  ;;  %vm8663_vm14 = vmmov %vm8662_vm13 }
0x1178   :  { %v4238_v15 = vsel %vm8655_vm1, %v7954_v54, %v4229_v57  ;;  %v4239_v26 = vsel %vm8656_vm4, %v4229_v57, %v4231_v35  ;;  %4905 = vmatprep.subr.mxu0 %v8645_v58  ;;  %4839 = vmatpush1.msra.mxu1 %v8657_v1  ;;  %v4689_v54 = vld [vmem:[#allocation3 + $0x188] sm:$0xff]  ;;  %vm8665_vm1 = vcmask 924672  }
0x1179   :  { %v4085_v23 = vpop.permute.xlu1 %4084  ;;  %4906 = vmatpush1.msra.mxu0 %v4694_v31  ;;  %5452 = vmatprep.subr.msk.mxu1 %vm7386_vm5, %v4239_v26  ;;  %vm8666_vm4 = vmmov %vm8665_vm1 }
0x117a   :  { %4113 = vst.msk [vmem:[#allocation3 + $0x98] sm:$0xff] %vm8658_vm8, %v4085_v23  ;;  %4907 = vmatprep.subr.mxu0 %v8645_v58  ;;  %5454 = vmatpush1.msk.msra.mxu1 %vm7396_vm15, %v4238_v15  ;;  %vm8667_vm8 = vmmov %vm8661_vm6 }
0x117b   :  { %v4151_v63 = vpop.permute.xlu0 %4150  ;;  %4908 = vmatpush1.msra.mxu0 %v4689_v54  ;;  %5456 = vmatprep.subr.msk.mxu1 %vm7386_vm5, %v7918_v36  ;;  %v4679_v36 = vld [vmem:[#allocation3 + $0x138] sm:$0xff] }
0x117c   :  { %v4160_v11 = vsel %vm8659_vm2, %v7944_v45, %v4151_v63  ;;  %v4161_v30 = vsel %vm8660_vm3, %v4151_v63, %v4153_v52  ;;  %4909 = vmatprep.subr.mxu0 %v8645_v58  ;;  %5458 = vmatpush1.msk.msra.mxu1 %vm7396_vm15, %v7915_v40 }
0x117d   :  { %v4007_v60 = vpop.permute.xlu1 %4006  ;;  %4910 = vmatpush1.msra.mxu0 %v4684_v10  ;;  %5460 = vmatprep.subr.msk.mxu1 %vm7357_vm10, %v4161_v30  ;;  %v8675_v30 = vld [vmem:[#allocation14_spill] sm:$0xff]  ;;  %v8677_v10 = vld [vmem:[#allocation13_spill] sm:$0xff] }
0x117e   :  { %v4035_v27 = vsel %vm8516_vm12, 0.0, %v4007_v60  ;;  %4911 = vmatprep.subr.mxu0 %v8645_v58  ;;  %5462 = vmatpush1.msk.msra.mxu1 %vm7365_vm0, %v4160_v11  ;;  %vm8664_vm12 = vmmov %vm8661_vm6 }
0x117f   :  { %4045 = vst.msk [vmem:[#allocation3 + $0x48] sm:$0xff] %vm8661_vm6, %v4035_v27  ;;  %v4083_v45 = vpop.permute.xlu0 %4082  ;;  %4912 = vmatpush1.msra.mxu0 %v4679_v36  ;;  %5464 = vmatprep.subr.msk.mxu1 %vm7357_vm10, %v7939_v62  ;;  %v4669_v62 = vld [vmem:[#allocation3 + $0xe8] sm:$0xff] }
0x1180   :  { %v4092_v40 = vsel %vm8662_vm13, %v7963_v6, %v4083_v45  ;;  %v4093_v42 = vsel %vm8663_vm14, %v4083_v45, %v4085_v23  ;;  %4913 = vmatprep.subr.mxu0 %v8645_v58  ;;  %5466 = vmatpush1.msk.msra.mxu1 %vm7365_vm0, %v7936_v49 }
0x1181   :  { %v4601_v7 = vpop.permute.xlu1 %4600  ;;  %4914 = vmatpush1.msra.mxu0 %v4674_v28  ;;  %4848 = vmatprep.subr.mxu1 %v4093_v42  ;;  %v4659_v14 = vld [vmem:[#allocation3 + $0x98] sm:$0xff] }
0x1182   :  { %v4629_v59 = vsel %vm8502_vm11, 0.0, %v4601_v7  ;;  %4915 = vmatprep.subr.mxu0 %v8645_v58  ;;  %4849 = vmatpush1.msra.mxu1 %v4092_v40  ;;  %v8679_v40 = vld [vmem:[#allocation15_spill] sm:$0xff]  ;;  %v8681_v28 = vld [vmem:[#allocation12_spill] sm:$0xff] }
0x1183   :  { %4639 = vst.msk [vmem:[#allocation3 + $0x2c8] sm:$0xff] %vm8664_vm12, %v4629_v59  ;;  %v4005_v6 = vpop.permute.xlu0 %4004  ;;  %4916 = vmatpush1.msra.mxu0 %v4669_v62  ;;  %4850 = vmatprep.subr.mxu1 %v7979_v50  ;;  %vm8680_vm2 = vnez %v8679_v40  ;;  %vm8687_vm12 = vcmask 654336  }
0x1184   :  { %v4014_v21 = vsel %vm8665_vm1, %v8019_v56, %v4005_v6  ;;  %v4015_v43 = vsel %vm8666_vm4, %v4005_v6, %v4007_v60  ;;  %4917 = vmatprep.subr.mxu0 %v8645_v58  ;;  %4851 = vmatpush1.msra.mxu1 %v7976_v39 }
0x1185   :  { %v4033_v49 = vsel %vm8631_vm7, 0.0, %v4014_v21  ;;  %v4034_v3 = vsel %vm8632_vm9, 0.0, %v4015_v43  ;;  %v4591_v12 = vpop.permute.xlu1 %4590  ;;  %4918 = vmatpush1.msra.mxu0 %v4664_v32  ;;  %5468 = vmatprep.subr.msk.mxu1 %vm7386_vm5, %v4015_v43  ;;  %vm8668_vm7 = vcmask 646144  }
0x1186   :  { %4043 = vst [vmem:[#allocation3 + $0x38] sm:$0xff] %v4033_v49  ;;  %4044 = vst [vmem:[#allocation3 + $0x40] sm:$0xff] %v4034_v3  ;;  %v4624_v56 = vsel %vm8502_vm11, 0.0, %v4591_v12  ;;  %4919 = vmatprep.subr.mxu0 %v8645_v58  ;;  %5470 = vmatpush1.msk.msra.mxu1 %vm7396_vm15, %v4014_v21  ;;  %v8682_v21 = vld [vmem:[#allocation16_spill] sm:$0xff]  ;;  %v8684_v3 = vld [vmem:[#allocation17_spill] sm:$0xff] }
0x1187   :  { %4634 = vst.msk [vmem:[#allocation3 + $0x2a0] sm:$0xff] %vm8667_vm8, %v4624_v56  ;;  %v4599_v9 = vpop.permute.xlu0 %4598  ;;  %vm8669_vm9 = vmmov %vm8668_vm7  ;;  %4920 = vmatpush1.msra.mxu0 %v4659_v14  ;;  %5472 = vmatprep.subr.msk.mxu1 %vm7386_vm5, %v8004_v55  ;;  %vm8683_vm3 = vnez %v8682_v21  ;;  %vm8685_vm6 = vnez %v8684_v3 }
0x1188   :  { %v4608_v39 = vsel %vm8668_vm7, %v7984_v61, %v4599_v9  ;;  %v4609_v50 = vsel %vm8669_vm9, %v4599_v9, %v4601_v7  ;;  %4921 = vmatprep.subr.mxu0 %v8645_v58  ;;  %5474 = vmatpush1.msk.msra.mxu1 %vm7396_vm15, %v8001_v16  ;;  %v4649_v61 = vld [vmem:[#allocation3 + $0x48] sm:$0xff]  ;;  %vm8671_vm5 = vmmov %vm8668_vm7  ;;  %vm8674_vm15 = vcmask 130048   ;;  %v4644_v16 = vld [vmem:[#allocation3 + $0x20] sm:$0xff] }
0x1189   :  { %4922 = vmatpush1.msra.mxu0 %v4654_v41  ;;  %5476 = vmatprep.subr.msk.mxu1 %vm7357_vm10, %v4609_v50  ;;  %vm8672_vm11 = vmmov %vm8671_vm5 }
0x118a   :  { %4923 = vmatprep.subr.mxu0 %v8645_v58  ;;  %5478 = vmatpush2.msk.msra.mxu1 %vm7365_vm0, %v4608_v39  ;;  %v4729_v5 = vld [vmem:[#allocation3 + $0x2c8] sm:$0xff] }
0x118b   :  { %v4589_v8 = vpop.permute.xlu0 %4588  ;;  %4924 = vmatpush1.msra.mxu0 %v4649_v61  ;;  %5106 = vmatprep.mubr.msk.f32.mxu0 %vm8674_vm15, %v8673_v24 }
0x118c   :  { %v4604_v55 = vsel %vm8671_vm5, %v8670_v44, %v4589_v8  ;;  %v4605_v19 = vsel %vm8672_vm11, %v4589_v8, %v4591_v12  ;;  %4925 = vmatprep.subr.mxu0 %v8645_v58  ;;  %v8686_v8 = vlaneseq }
0x118d   :  { %4926 = vmatpush1.msra.mxu0 %v4644_v16  ;;  %5480 = vmatprep.subr.msk.mxu1 %vm7357_vm10, %v4605_v19  ;;  %vm8676_vm10 = vnez %v8675_v30 }
0x118e   :  { %4955 = vmatprep.subr.mxu0 %v8645_v58  ;;  %5482 = vmatpush2.msk.msra.mxu1 %vm7365_vm0, %v4604_v55  ;;  %v4724_v17 = vld [vmem:[#allocation3 + $0x2a0] sm:$0xff]  ;;  %vm8678_vm0 = vnez %v8677_v10  ;;  %vm5031_vm13 = vcmp.lt.s32.totalorder %v8686_v8, 256 }
0x118f   :  { %4956 = vmatpush2.msra.mxu0 %v4729_v5  ;;  %4889 = vmatmul.mubr.f32.vlgmr.msra.gmra.mxu1 %v8052_v48 }
0x1190   :  { %4957 = vmatprep.subr.mxu0 %v8645_v58 }
0x1191   :  { %4958 = vmatpush2.msra.mxu0 %v4724_v17 }
0x1192   :  { %4960 = vmatmul.mubr.f32.vlgmr.msra.gmra.mxu0 %v8052_v48 }
0x1198   :  { %v4735_v25 = vpop.permute.xlu0 %4734 }
0x1199   :  { %v4740_v34 = vrot.slane %v4735_v25, %v5712_v13 }
0x122d   :  { %v4819_v18 = vpop.f32.mrf.mxu0 }
0x122e   :  { %v4820_v35 = vadd.f32 %v4819_v18, %v4740_v34 }
0x122f   :  { %v4821_v51 = vpop.f32.mrf.mxu0 }
0x1230   :  { %v4822_v2 = vadd.f32 %v4821_v51, %v4740_v34  ;;  %v5107_v29 = vmul.f32 -1.442695, %v4820_v35 }
0x1232   :  { %v5108_v20 = vmul.f32 -1.442695, %v4822_v2 }
0x1234   :  { %5280 = vpow2.f32 %v5108_v20 }
0x1235   :  { %5282 = vpow2.f32 %v5107_v29 }
0x1241   :  { %v5281_v53 = vpop.eup %5280 }
0x1242   :  { %v5283_v13 = vpop.eup %5282  ;;  %v4981_v57 = vadd.f32 1.0, %v5281_v53 }
0x1243   :  { %v4980_v38 = vadd.f32 1.0, %v5283_v13 }
0x124f   :  { %v4890_v4 = vpop.f32.mrf.mxu1 }
0x1250   :  { %v4891_v47 = vadd.f32 %v4890_v4, %v4740_v34 }
0x1251   :  { %v4892_v37 = vpop.f32.mrf.mxu1 }
0x1252   :  { %v5109_v22 = vmul.f32 -1.442695, %v4891_v47  ;;  %v4893_v58 = vadd.f32 %v4892_v37, %v4740_v34  ;;  %v4961_v33 = vpop.f32.mrf.mxu0 }
0x1253   :  { %v4962_v46 = vadd.f32 %v4961_v33, %v4740_v34 }
0x1254   :  { %5284 = vpow2.f32 %v5109_v22  ;;  %v5110_v48 = vmul.f32 -1.442695, %v4893_v58  ;;  %v4963_v52 = vpop.f32.mrf.mxu0 }
0x1255   :  { %v5111_v0 = vmul.f32 -1.442695, %v4962_v46 }
0x1256   :  { %5286 = vpow2.f32 %v5110_v48 }
0x1257   :  { %5288 = vpow2.f32 %v5111_v0 }
0x1258   :  { %5290 = vrcp.f32 %v4981_v57 }
0x1259   :  { %5292 = vrcp.f32 %v4980_v38 }
0x1261   :  { %v5285_v15 = vpop.eup %5284 }
0x1262   :  { %v4982_v26 = vadd.f32 1.0, %v5285_v15 }
0x1263   :  { %v5287_v23 = vpop.eup %5286 }
0x1264   :  { %v5289_v1 = vpop.eup %5288  ;;  %5294 = vrcp.f32 %v4982_v26  ;;  %v4983_v31 = vadd.f32 1.0, %v5287_v23 }
0x1265   :  { %v4984_v63 = vadd.f32 1.0, %v5289_v1  ;;  %v5291_v54 = vpop.eup %5290 }
0x1266   :  { %5296 = vrcp.f32 %v4983_v31  ;;  %v5293_v11 = vpop.eup %5292  ;;  %v4996_v60 = vsel %vm8676_vm10, 0.0, %v5291_v54 }
0x1267   :  { %5298 = vrcp.f32 %v4984_v63  ;;  %v4995_v27 = vsel %vm8678_vm0, 0.0, %v5293_v11 }
0x1268   :  { %v5003_v45 = vcombine.low %v4995_v27, %v4996_v60 }
0x126a   :  { %v5010_v59 = vrot.slane %v5003_v45, %v8681_v28 }
0x1271   :  { %v5295_v36 = vpop.eup %5294 }
0x1272   :  { %v4997_v42 = vsel %vm8680_vm2, 0.0, %v5295_v36 }
0x1273   :  { %v5297_v7 = vpop.eup %5296  ;;  %v5017_v6 = vrot.slane %v4997_v42, %v8681_v28 }
0x1274   :  { %v5299_v62 = vpop.eup %5298  ;;  %v4998_v43 = vsel %vm8683_vm3, 0.0, %v5297_v7 }
0x1275   :  { %v5018_v49 = vcombine.low %v5010_v59, %v5017_v6  ;;  %v4999_v12 = vsel %vm8685_vm6, 0.0, %v5299_v62  ;;  %v5036_v32 = vcombine.low %v4997_v42, %v4998_v43 }
0x1276   :  { %v5050_v14 = vrot.slane %v4999_v12, %v8681_v28 }
0x1277   :  { %v5025_v56 = vrot.slane %v5018_v49, %v8681_v28  ;;  %v5043_v9 = vrot.slane %v5036_v32, %v8681_v28 }
0x1279   :  { %5026 = vrot.lane.b32.xlu1 %v5025_v56, %s5565_s23  ;;  %v5051_v39 = vcombine.low %v5043_v9, %v5050_v14 }
0x127b   :  { %v5058_v50 = vrot.slane %v5051_v39, %v8681_v28 }
0x127d   :  { %5059 = vrot.lane.b32.xlu0 %v5058_v50, %s5558_s18 }
0x12eb   :  { %v5027_v41 = vpop.permute.xlu1 %5026 }
0x12ec   :  { %v5028_v61 = vrot.slane %v5027_v41, 1 }
0x12ee   :  { %v5029_v44 = vsel %vm8663_vm14, %v5027_v41, %v5028_v61 }
0x12ef   :  { %5033 = vst.msk [vmem:[%s8244_s17] sm:$0x3] %vm5031_vm13, %v5029_v44  ;;  %v5060_v55 = vpop.permute.xlu0 %5059 }
0x12f0   :  { %v5061_v19 = vrot.slane %v5060_v55, 1 }
0x12f2   :  { %v5062_v24 = vsel %vm8687_vm12, %v5060_v55, %v5061_v19 }
0x12f3   :  { %5064 = vst.msk [vmem:[%s8244_s17 + $0x2] sm:$0x3] %vm5031_vm13, %v5062_v24 }
0x12f4   :  { %5069 = vsyncpa [#allocation6], 1 }
0x12f5   :  { %5070 = vsyncpa [#allocation8], 1 }

</bundles_post_ra>
